<compile_context>
chip_gen: v7x
topology: tpu7x:2x2x1
jax: 0.10.0
libtpu: 0.0.40
codegen_flags: <defaults>
</compile_context>

<pallas_src>
import math

import jax
import jax.numpy as jnp
from jax.experimental import pallas as pl
from jax.experimental.pallas import tpu as pltpu

# ------------------------------ config (small) --------------------------------
HIDDEN = 32                       # config.hidden_size
NUM_HEADS = 4                     # config.transformer['num_heads']
HEAD_DIM = HIDDEN // NUM_HEADS
MLP_DIM = 64                      # config.transformer['mlp_dim']
NUM_LAYERS = 2                    # config.transformer['num_layers']
EPS = 1e-6                        # LayerNorm eps
SCALE = 1.0 / math.sqrt(HEAD_DIM)

BATCH = 2
SEQ = 16                          # sublane-friendly sequence length for demo
# NOTE: all nn.Dropout layers are identity at inference time.

PARAM_ORDER = ('ln1g', 'ln1b', 'wqkv', 'bqkv', 'wo', 'bo',
               'ln2g', 'ln2b', 'w1', 'b1', 'w2', 'b2', 'encg', 'encb')


# ------------------------------ kernel helpers ---------------------------------
def _layernorm(v, g, b):
    m = jnp.mean(v, axis=-1, keepdims=True)
    c = v - m
    var = jnp.mean(c * c, axis=-1, keepdims=True)
    return c * jax.lax.rsqrt(var + EPS) * g + b


# ------------------------------ fused Pallas kernel ----------------------------
def encoder_kernel(x_ref,
                   ln1g_ref, ln1b_ref, wqkv_ref, bqkv_ref, wo_ref, bo_ref,
                   ln2g_ref, ln2b_ref, w1_ref, b1_ref, w2_ref, b2_ref,
                   encg_ref, encb_ref,
                   o_ref):
    """Full Encoder forward, all batch elements in one grid step.

    Weight layouts (stacked over layers L):
      wqkv: (L, H, 3H) bf16  columns = [Q*scale | K | V], head-major inside
      bqkv: (L, 1, 3H) f32   (Q part pre-scaled)
      wo:   (L, NH, HD, H) bf16      bo: (L, 1, H) f32
      w1:   (L, H, MLP) bf16         b1: (L, 1, MLP) f32
      w2:   (L, MLP, H) bf16         b2: (L, 1, H) f32
      ln*/enc*: (L, 1, H) / (1, H) f32
    """
    B, S, H = x_ref.shape
    BS = B * S
    x = x_ref[...].reshape(BS, H)                             # (B*S, H) f32

    for l in range(NUM_LAYERS):                               # static unroll
        # ---------------- attention branch (pre-LN) ----------------
        res = x
        xn = _layernorm(x, ln1g_ref[l], ln1b_ref[l])
        # single lane-dense fused QKV projection: (BS, H) @ (H, 3H)
        qkv = (jnp.dot(xn.astype(jnp.bfloat16), wqkv_ref[l],
                       preferred_element_type=jnp.float32)
               + bqkv_ref[l]).astype(jnp.bfloat16)            # (BS, 3H)

        def heads(block):
            # per-head (z = head*B + batch, S, HD) layout; lane slices only
            # where attention forces the HD=8 layout.
            base = block * H
            return jnp.concatenate(
                [qkv[:, base + hh * HEAD_DIM: base + (hh + 1) * HEAD_DIM]
                 .reshape(B, S, HEAD_DIM) for hh in range(NUM_HEADS)],
                axis=0)

        q = heads(0)                                          # scale folded in
        k = heads(1)
        v = heads(2)

        s = jnp.einsum('zqd,zkd->zqk', q, k,
                       preferred_element_type=jnp.float32)    # (NH*B, S, S)
        s = s - jnp.max(s, axis=-1, keepdims=True)
        e = jnp.exp(s)
        p = e * pl.reciprocal(jnp.sum(e, axis=-1, keepdims=True), approx=True)

        ctx = jnp.einsum('zqk,zkd->zqd', p.astype(jnp.bfloat16), v,
                         preferred_element_type=jnp.float32)  # (NH*B, S, HD)

        # output projection: accumulate the head reduction directly into one
        # (BS, H) f32 buffer (no (NH, S, H) intermediate).
        wo_l = wo_ref[l]                                      # (NH, HD, H)
        attn = jnp.zeros((BS, H), jnp.float32)
        for hh in range(NUM_HEADS):
            ctx_h = ctx[hh * B:(hh + 1) * B].reshape(BS, HEAD_DIM)
            attn = attn + jnp.dot(ctx_h.astype(jnp.bfloat16), wo_l[hh],
                                  preferred_element_type=jnp.float32)
        x = attn + bo_ref[l] + res

        # ---------------- MLP branch (pre-LN) ----------------
        res = x
        xn = _layernorm(x, ln2g_ref[l], ln2b_ref[l])
        y = jnp.dot(xn.astype(jnp.bfloat16), w1_ref[l],
                    preferred_element_type=jnp.float32) + b1_ref[l]
        y = jax.nn.gelu(y, approximate=True)                  # tanh GELU (EUP)
        y = jnp.dot(y.astype(jnp.bfloat16), w2_ref[l],
                    preferred_element_type=jnp.float32) + b2_ref[l]
        x = y + res

    # ---------------- final encode_norm over all tokens ----------------
    out = _layernorm(x, encg_ref[...], encb_ref[...])
    # TODO(synk): output last dim is 32 (<128 lanes) -> masked stores; a
    # lane-dense (B, S*H) output layout would help if S/H grow.
    o_ref[...] = out.reshape(B, S, H)


# ------------------------------ pallas_call wrapper ----------------------------
@jax.jit
def encoder_forward(x, kparams):
    B, S, H = x.shape
    args = [kparams[name] for name in PARAM_ORDER]
    weight_specs = [pl.BlockSpec(a.shape, lambda i, n=a.ndim: (0,) * n)
                    for a in args]
    return pl.pallas_call(
        encoder_kernel,
        out_shape=jax.ShapeDtypeStruct((B, S, H), jnp.float32),
        grid=(1,),
        in_specs=[pl.BlockSpec((B, S, H), lambda i: (0, 0, 0))] + weight_specs,
        out_specs=pl.BlockSpec((B, S, H), lambda i: (0, 0, 0)),
        compiler_params=pltpu.CompilerParams(
            dimension_semantics=("arbitrary",)),
    )(x, *args)


# ------------------------------ parameters -------------------------------------
def init_params(key):
    """Per-layer params in plain (x @ W + b) convention, f32."""
    keys = iter(jax.random.split(key, 64))

    def nrm(shape, scale=0.02):
        return (scale * jax.random.normal(next(keys), shape)).astype(jnp.float32)

    ones = lambda s: jnp.ones(s, jnp.float32)
    zeros = lambda s: jnp.zeros(s, jnp.float32)

    layers = []
    for _ in range(NUM_LAYERS):
        layers.append({
            'ln1g': ones((1, HIDDEN)), 'ln1b': zeros((1, HIDDEN)),
            'wq': nrm((HIDDEN, HIDDEN)), 'bq': nrm((HIDDEN,)),
            'wk': nrm((HIDDEN, HIDDEN)), 'bk': nrm((HIDDEN,)),
            'wv': nrm((HIDDEN, HIDDEN)), 'bv': nrm((HIDDEN,)),
            'wo': nrm((HIDDEN, HIDDEN)), 'bo': nrm((HIDDEN,)),
            'ln2g': ones((1, HIDDEN)), 'ln2b': zeros((1, HIDDEN)),
            'w1': nrm((HIDDEN, MLP_DIM)), 'b1': nrm((MLP_DIM,), 1e-6),
            'w2': nrm((MLP_DIM, HIDDEN)), 'b2': nrm((HIDDEN,), 1e-6),
        })
    enc = {'encg': ones((1, HIDDEN)), 'encb': zeros((1, HIDDEN))}
    return layers, enc


def prep_kernel_params(layers, enc):
    """Stack over layers, fuse QKV (with 1/sqrt(HD) folded into Q), cast
    matmul weights to bf16, split the output projection per head."""
    L, H, NH, HD, F = NUM_LAYERS, HIDDEN, NUM_HEADS, HEAD_DIM, MLP_DIM

    def stack(name):
        return jnp.stack([lyr[name] for lyr in layers], axis=0)

    wqkv = jnp.concatenate([stack('wq') * SCALE, stack('wk'), stack('wv')],
                           axis=-1)                                  # (L,H,3H)
    bqkv = jnp.concatenate([stack('bq') * SCALE, stack('bk'), stack('bv')],
                           axis=-1).reshape(L, 1, 3 * H)             # (L,1,3H)

    return {
        'ln1g': stack('ln1g'), 'ln1b': stack('ln1b'),                # (L,1,H)
        'wqkv': wqkv.astype(jnp.bfloat16),
        'bqkv': bqkv,
        'wo': stack('wo').reshape(L, NH, HD, H).astype(jnp.bfloat16),
        'bo': stack('bo').reshape(L, 1, H),
        'ln2g': stack('ln2g'), 'ln2b': stack('ln2b'),
        'w1': stack('w1').astype(jnp.bfloat16),                      # (L,H,F)
        'b1': stack('b1').reshape(L, 1, F),
        'w2': stack('w2').astype(jnp.bfloat16),                      # (L,F,H)
        'b2': stack('b2').reshape(L, 1, H),
        'encg': enc['encg'], 'encb': enc['encb'],                    # (1,H)
    }


# ------------------------------ pure-JAX reference ------------------------------
def encoder_reference(x, layers, enc):
    B, S, H = x.shape

    def ln(v, g, b):
        m = jnp.mean(v, -1, keepdims=True)
        c = v - m
        var = jnp.mean(c * c, -1, keepdims=True)
        return c * jax.lax.rsqrt(var + EPS) * g + b

    def split(t):
        return t.reshape(B, S, NUM_HEADS, HEAD_DIM).transpose(0, 2, 1, 3)

    for prm in layers:
        h = x
        xn = ln(x, prm['ln1g'], prm['ln1b'])
        q = split(xn @ prm['wq'] + prm['bq'])
        k = split(xn @ prm['wk'] + prm['bk'])
        v = split(xn @ prm['wv'] + prm['bv'])
        s = jnp.einsum('bhqd,bhkd->bhqk', q, k) * SCALE
        p = jax.nn.softmax(s, axis=-1)
        ctx = jnp.einsum('bhqk,bhkd->bhqd', p, v).transpose(0, 2, 1, 3).reshape(B, S, H)
        x = ctx @ prm['wo'] + prm['bo'] + h
        h = x
        xn = ln(x, prm['ln2g'], prm['ln2b'])
        y = jax.nn.gelu(xn @ prm['w1'] + prm['b1'], approximate=False)
        x = y @ prm['w2'] + prm['b2'] + h
    return ln(x, enc['encg'], enc['encb'])


# ------------------------------ main --------------------------------------------
if __name__ == "__main__":
    key = jax.random.PRNGKey(0)
    pkey, xkey = jax.random.split(key)
    layers, enc = init_params(pkey)
    kparams = prep_kernel_params(layers, enc)

    hidden_states = jax.random.normal(xkey, (BATCH, SEQ, HIDDEN), dtype=jnp.float32)

    out = encoder_forward(hidden_states, kparams)
    out = jax.block_until_ready(out)

    assert out.shape == (BATCH, SEQ, HIDDEN)
    assert bool(jnp.all(jnp.isfinite(out)))

    ref = encoder_reference(hidden_states, layers, enc)
    max_err = float(jnp.max(jnp.abs(out - ref)))
    assert max_err < 5e-2, f"kernel vs reference max abs err = {max_err}"

    print("KERNEL_OK")
</pallas_src>

<mosaic_0001>
module attributes {stable_mosaic.version = 11 : i64} {
  func.func @encoder_kernel(%arg0: i32, %arg1: memref<2x16x32xf32, #tpu.memory_space<vmem>>, %arg2: memref<2x1x32xf32, #tpu.memory_space<vmem>>, %arg3: memref<2x1x32xf32, #tpu.memory_space<vmem>>, %arg4: memref<2x32x96xbf16, #tpu.memory_space<vmem>>, %arg5: memref<2x1x96xf32, #tpu.memory_space<vmem>>, %arg6: memref<2x4x8x32xbf16, #tpu.memory_space<vmem>>, %arg7: memref<2x1x32xf32, #tpu.memory_space<vmem>>, %arg8: memref<2x1x32xf32, #tpu.memory_space<vmem>>, %arg9: memref<2x1x32xf32, #tpu.memory_space<vmem>>, %arg10: memref<2x32x64xbf16, #tpu.memory_space<vmem>>, %arg11: memref<2x1x64xf32, #tpu.memory_space<vmem>>, %arg12: memref<2x64x32xbf16, #tpu.memory_space<vmem>>, %arg13: memref<2x1x32xf32, #tpu.memory_space<vmem>>, %arg14: memref<1x32xf32, #tpu.memory_space<vmem>>, %arg15: memref<1x32xf32, #tpu.memory_space<vmem>>, %arg16: memref<2x16x32xf32, #tpu.memory_space<vmem>>) attributes {dimension_semantics = [#tpu.dimension_semantics<arbitrary>], iteration_bounds = array<i64: 1>, scalar_prefetch = 0 : i64, scratch_operands = 0 : i64, tpu.core_type = #tpu.core_type<tc>, window_params = [{pipeline_mode = #tpu.pipeline_mode<synchronous>, transform_indices = @transform_0, window_bounds = array<i64: 2, 16, 32>}, {pipeline_mode = #tpu.pipeline_mode<synchronous>, transform_indices = @transform_1, window_bounds = array<i64: 2, 1, 32>}, {pipeline_mode = #tpu.pipeline_mode<synchronous>, transform_indices = @transform_2, window_bounds = array<i64: 2, 1, 32>}, {pipeline_mode = #tpu.pipeline_mode<synchronous>, transform_indices = @transform_3, window_bounds = array<i64: 2, 32, 96>}, {pipeline_mode = #tpu.pipeline_mode<synchronous>, transform_indices = @transform_4, window_bounds = array<i64: 2, 1, 96>}, {pipeline_mode = #tpu.pipeline_mode<synchronous>, transform_indices = @transform_5, window_bounds = array<i64: 2, 4, 8, 32>}, {pipeline_mode = #tpu.pipeline_mode<synchronous>, transform_indices = @transform_6, window_bounds = array<i64: 2, 1, 32>}, {pipeline_mode = #tpu.pipeline_mode<synchronous>, transform_indices = @transform_7, window_bounds = array<i64: 2, 1, 32>}, {pipeline_mode = #tpu.pipeline_mode<synchronous>, transform_indices = @transform_8, window_bounds = array<i64: 2, 1, 32>}, {pipeline_mode = #tpu.pipeline_mode<synchronous>, transform_indices = @transform_9, window_bounds = array<i64: 2, 32, 64>}, {pipeline_mode = #tpu.pipeline_mode<synchronous>, transform_indices = @transform_10, window_bounds = array<i64: 2, 1, 64>}, {pipeline_mode = #tpu.pipeline_mode<synchronous>, transform_indices = @transform_11, window_bounds = array<i64: 2, 64, 32>}, {pipeline_mode = #tpu.pipeline_mode<synchronous>, transform_indices = @transform_12, window_bounds = array<i64: 2, 1, 32>}, {pipeline_mode = #tpu.pipeline_mode<synchronous>, transform_indices = @transform_13, window_bounds = array<i64: 1, 32>}, {pipeline_mode = #tpu.pipeline_mode<synchronous>, transform_indices = @transform_14, window_bounds = array<i64: 1, 32>}, {pipeline_mode = #tpu.pipeline_mode<synchronous>, transform_indices = @transform_15, window_bounds = array<i64: 2, 16, 32>}]} {
    %c0 = arith.constant 0 : index
    %c0_0 = arith.constant 0 : index
    %c0_1 = arith.constant 0 : index
    %0 = vector.load %arg1[%c0, %c0_0, %c0_1] : memref<2x16x32xf32, #tpu.memory_space<vmem>>, vector<2x16x32xf32>
    %1 = vector.shape_cast %0 : vector<2x16x32xf32> to vector<32x32xf32>
    %c0_2 = arith.constant 0 : index
    %c0_3 = arith.constant 0 : index
    %c0_4 = arith.constant 0 : index
    %2 = vector.load %arg2[%c0_2, %c0_3, %c0_4] : memref<2x1x32xf32, #tpu.memory_space<vmem>>, vector<1x1x32xf32>
    %3 = vector.shape_cast %2 : vector<1x1x32xf32> to vector<1x32xf32>
    %c0_5 = arith.constant 0 : index
    %c0_6 = arith.constant 0 : index
    %c0_7 = arith.constant 0 : index
    %4 = vector.load %arg3[%c0_5, %c0_6, %c0_7] : memref<2x1x32xf32, #tpu.memory_space<vmem>>, vector<1x1x32xf32>
    %5 = vector.shape_cast %4 : vector<1x1x32xf32> to vector<1x32xf32>
    %cst = arith.constant dense<0.000000e+00> : vector<32xf32>
    %6 = vector.multi_reduction <add>, %1, %cst [1] : vector<32x32xf32> to vector<32xf32>
    %7 = vector.shape_cast %6 : vector<32xf32> to vector<32x1xf32>
    %cst_8 = arith.constant 3.200000e+01 : f32
    %8 = vector.broadcast %cst_8 : f32 to vector<32x1xf32>
    %9 = arith.divf %7, %8 : vector<32x1xf32>
    %10 = vector.broadcast %9 : vector<32x1xf32> to vector<32x32xf32>
    %11 = arith.subf %1, %10 : vector<32x32xf32>
    %12 = arith.mulf %11, %11 : vector<32x32xf32>
    %cst_9 = arith.constant dense<0.000000e+00> : vector<32xf32>
    %13 = vector.multi_reduction <add>, %12, %cst_9 [1] : vector<32x32xf32> to vector<32xf32>
    %14 = vector.shape_cast %13 : vector<32xf32> to vector<32x1xf32>
    %cst_10 = arith.constant 3.200000e+01 : f32
    %15 = vector.broadcast %cst_10 : f32 to vector<32x1xf32>
    %16 = arith.divf %14, %15 : vector<32x1xf32>
    %cst_11 = arith.constant 9.99999997E-7 : f32
    %17 = vector.broadcast %cst_11 : f32 to vector<32x1xf32>
    %18 = arith.addf %16, %17 : vector<32x1xf32>
    %19 = math.rsqrt %18 : vector<32x1xf32>
    %20 = vector.broadcast %19 : vector<32x1xf32> to vector<32x32xf32>
    %21 = arith.mulf %11, %20 : vector<32x32xf32>
    %22 = vector.broadcast %3 : vector<1x32xf32> to vector<32x32xf32>
    %23 = arith.mulf %21, %22 : vector<32x32xf32>
    %24 = vector.broadcast %5 : vector<1x32xf32> to vector<32x32xf32>
    %25 = arith.addf %23, %24 : vector<32x32xf32>
    %26 = arith.truncf %25 : vector<32x32xf32> to vector<32x32xbf16>
    %c0_12 = arith.constant 0 : index
    %c0_13 = arith.constant 0 : index
    %c0_14 = arith.constant 0 : index
    %27 = vector.load %arg4[%c0_12, %c0_13, %c0_14] : memref<2x32x96xbf16, #tpu.memory_space<vmem>>, vector<1x32x96xbf16>
    %28 = vector.shape_cast %27 : vector<1x32x96xbf16> to vector<32x96xbf16>
    %cst_15 = arith.constant dense<0.000000e+00> : vector<32x96xf32>
    %29 = tpu.matmul %26, %28, %cst_15 {dimension_numbers = #tpu.dot_dimension_numbers<[1], [0], [0], [1], [0, 0, 1, 1], [], []>} : vector<32x32xbf16>, vector<32x96xbf16>, vector<32x96xf32> -> vector<32x96xf32>
    %c0_16 = arith.constant 0 : index
    %c0_17 = arith.constant 0 : index
    %c0_18 = arith.constant 0 : index
    %30 = vector.load %arg5[%c0_16, %c0_17, %c0_18] : memref<2x1x96xf32, #tpu.memory_space<vmem>>, vector<1x1x96xf32>
    %31 = vector.shape_cast %30 : vector<1x1x96xf32> to vector<1x96xf32>
    %32 = vector.broadcast %31 : vector<1x96xf32> to vector<32x96xf32>
    %33 = arith.addf %29, %32 : vector<32x96xf32>
    %34 = arith.truncf %33 : vector<32x96xf32> to vector<32x96xbf16>
    %35 = vector.extract_strided_slice %34 {offsets = [0, 0], sizes = [32, 8], strides = [1, 1]} : vector<32x96xbf16> to vector<32x8xbf16>
    %36 = vector.shape_cast %35 : vector<32x8xbf16> to vector<2x16x8xbf16>
    %37 = vector.extract_strided_slice %34 {offsets = [0, 8], sizes = [32, 8], strides = [1, 1]} : vector<32x96xbf16> to vector<32x8xbf16>
    %38 = vector.shape_cast %37 : vector<32x8xbf16> to vector<2x16x8xbf16>
    %39 = vector.extract_strided_slice %34 {offsets = [0, 16], sizes = [32, 8], strides = [1, 1]} : vector<32x96xbf16> to vector<32x8xbf16>
    %40 = vector.shape_cast %39 : vector<32x8xbf16> to vector<2x16x8xbf16>
    %41 = vector.extract_strided_slice %34 {offsets = [0, 24], sizes = [32, 8], strides = [1, 1]} : vector<32x96xbf16> to vector<32x8xbf16>
    %42 = vector.shape_cast %41 : vector<32x8xbf16> to vector<2x16x8xbf16>
    %43 = tpu.concatenate %36, %38, %40, %42 in 0 : vector<2x16x8xbf16>, vector<2x16x8xbf16>, vector<2x16x8xbf16>, vector<2x16x8xbf16> -> vector<8x16x8xbf16>
    %44 = vector.extract_strided_slice %34 {offsets = [0, 32], sizes = [32, 8], strides = [1, 1]} : vector<32x96xbf16> to vector<32x8xbf16>
    %45 = vector.shape_cast %44 : vector<32x8xbf16> to vector<2x16x8xbf16>
    %46 = vector.extract_strided_slice %34 {offsets = [0, 40], sizes = [32, 8], strides = [1, 1]} : vector<32x96xbf16> to vector<32x8xbf16>
    %47 = vector.shape_cast %46 : vector<32x8xbf16> to vector<2x16x8xbf16>
    %48 = vector.extract_strided_slice %34 {offsets = [0, 48], sizes = [32, 8], strides = [1, 1]} : vector<32x96xbf16> to vector<32x8xbf16>
    %49 = vector.shape_cast %48 : vector<32x8xbf16> to vector<2x16x8xbf16>
    %50 = vector.extract_strided_slice %34 {offsets = [0, 56], sizes = [32, 8], strides = [1, 1]} : vector<32x96xbf16> to vector<32x8xbf16>
    %51 = vector.shape_cast %50 : vector<32x8xbf16> to vector<2x16x8xbf16>
    %52 = tpu.concatenate %45, %47, %49, %51 in 0 : vector<2x16x8xbf16>, vector<2x16x8xbf16>, vector<2x16x8xbf16>, vector<2x16x8xbf16> -> vector<8x16x8xbf16>
    %53 = vector.extract_strided_slice %34 {offsets = [0, 64], sizes = [32, 8], strides = [1, 1]} : vector<32x96xbf16> to vector<32x8xbf16>
    %54 = vector.shape_cast %53 : vector<32x8xbf16> to vector<2x16x8xbf16>
    %55 = vector.extract_strided_slice %34 {offsets = [0, 72], sizes = [32, 8], strides = [1, 1]} : vector<32x96xbf16> to vector<32x8xbf16>
    %56 = vector.shape_cast %55 : vector<32x8xbf16> to vector<2x16x8xbf16>
    %57 = vector.extract_strided_slice %34 {offsets = [0, 80], sizes = [32, 8], strides = [1, 1]} : vector<32x96xbf16> to vector<32x8xbf16>
    %58 = vector.shape_cast %57 : vector<32x8xbf16> to vector<2x16x8xbf16>
    %59 = vector.extract_strided_slice %34 {offsets = [0, 88], sizes = [32, 8], strides = [1, 1]} : vector<32x96xbf16> to vector<32x8xbf16>
    %60 = vector.shape_cast %59 : vector<32x8xbf16> to vector<2x16x8xbf16>
    %61 = tpu.concatenate %54, %56, %58, %60 in 0 : vector<2x16x8xbf16>, vector<2x16x8xbf16>, vector<2x16x8xbf16>, vector<2x16x8xbf16> -> vector<8x16x8xbf16>
    "tpu.trace_start"() <{level = 10 : i32, message = "zqd,zkd->zqk"}> : () -> ()
    %cst_19 = arith.constant dense<0.000000e+00> : vector<8x16x16xf32>
    %62 = tpu.matmul %43, %52, %cst_19 {dimension_numbers = #tpu.dot_dimension_numbers<[2], [2], [1], [1], [0, 0, 0, 1, 1, 1], [0], [0]>} : vector<8x16x8xbf16>, vector<8x16x8xbf16>, vector<8x16x16xf32> -> vector<8x16x16xf32>
    "tpu.trace_stop"() : () -> ()
    %cst_20 = arith.constant dense<0xFF800000> : vector<8x16xf32>
    %63 = vector.multi_reduction <maximumf>, %62, %cst_20 [2] : vector<8x16x16xf32> to vector<8x16xf32>
    %64 = vector.shape_cast %63 : vector<8x16xf32> to vector<8x16x1xf32>
    %65 = vector.broadcast %64 : vector<8x16x1xf32> to vector<8x16x16xf32>
    %66 = arith.subf %62, %65 : vector<8x16x16xf32>
    %67 = math.exp %66 : vector<8x16x16xf32>
    %cst_21 = arith.constant dense<0.000000e+00> : vector<8x16xf32>
    %68 = vector.multi_reduction <add>, %67, %cst_21 [2] : vector<8x16x16xf32> to vector<8x16xf32>
    %69 = vector.shape_cast %68 : vector<8x16xf32> to vector<8x16x1xf32>
    %70 = tpu.reciprocal %69 {approx = true} : vector<8x16x1xf32> -> vector<8x16x1xf32>
    %71 = vector.broadcast %70 : vector<8x16x1xf32> to vector<8x16x16xf32>
    %72 = arith.mulf %67, %71 : vector<8x16x16xf32>
    %73 = arith.truncf %72 : vector<8x16x16xf32> to vector<8x16x16xbf16>
    "tpu.trace_start"() <{level = 10 : i32, message = "zqk,zkd->zqd"}> : () -> ()
    %cst_22 = arith.constant dense<0.000000e+00> : vector<8x16x8xf32>
    %74 = tpu.matmul %73, %61, %cst_22 {dimension_numbers = #tpu.dot_dimension_numbers<[2], [1], [1], [2], [0, 0, 0, 1, 1, 2], [0], [0]>} : vector<8x16x16xbf16>, vector<8x16x8xbf16>, vector<8x16x8xf32> -> vector<8x16x8xf32>
    "tpu.trace_stop"() : () -> ()
    %c0_23 = arith.constant 0 : index
    %c0_24 = arith.constant 0 : index
    %c0_25 = arith.constant 0 : index
    %c0_26 = arith.constant 0 : index
    %75 = vector.load %arg6[%c0_23, %c0_24, %c0_25, %c0_26] : memref<2x4x8x32xbf16, #tpu.memory_space<vmem>>, vector<1x4x8x32xbf16>
    %76 = vector.shape_cast %75 : vector<1x4x8x32xbf16> to vector<4x8x32xbf16>
    %cst_27 = arith.constant 0.000000e+00 : f32
    %77 = vector.broadcast %cst_27 : f32 to vector<32x32xf32>
    %78 = vector.extract_strided_slice %74 {offsets = [0, 0, 0], sizes = [2, 16, 8], strides = [1, 1, 1]} : vector<8x16x8xf32> to vector<2x16x8xf32>
    %79 = vector.shape_cast %78 : vector<2x16x8xf32> to vector<32x8xf32>
    %80 = arith.truncf %79 : vector<32x8xf32> to vector<32x8xbf16>
    %81 = vector.extract_strided_slice %76 {offsets = [0, 0, 0], sizes = [1, 8, 32], strides = [1, 1, 1]} : vector<4x8x32xbf16> to vector<1x8x32xbf16>
    %82 = vector.shape_cast %81 : vector<1x8x32xbf16> to vector<8x32xbf16>
    %cst_28 = arith.constant dense<0.000000e+00> : vector<32x32xf32>
    %83 = tpu.matmul %80, %82, %cst_28 {dimension_numbers = #tpu.dot_dimension_numbers<[1], [0], [0], [1], [0, 0, 1, 1], [], []>} : vector<32x8xbf16>, vector<8x32xbf16>, vector<32x32xf32> -> vector<32x32xf32>
    %84 = arith.addf %77, %83 : vector<32x32xf32>
    %85 = vector.extract_strided_slice %74 {offsets = [2, 0, 0], sizes = [2, 16, 8], strides = [1, 1, 1]} : vector<8x16x8xf32> to vector<2x16x8xf32>
    %86 = vector.shape_cast %85 : vector<2x16x8xf32> to vector<32x8xf32>
    %87 = arith.truncf %86 : vector<32x8xf32> to vector<32x8xbf16>
    %88 = vector.extract_strided_slice %76 {offsets = [1, 0, 0], sizes = [1, 8, 32], strides = [1, 1, 1]} : vector<4x8x32xbf16> to vector<1x8x32xbf16>
    %89 = vector.shape_cast %88 : vector<1x8x32xbf16> to vector<8x32xbf16>
    %cst_29 = arith.constant dense<0.000000e+00> : vector<32x32xf32>
    %90 = tpu.matmul %87, %89, %cst_29 {dimension_numbers = #tpu.dot_dimension_numbers<[1], [0], [0], [1], [0, 0, 1, 1], [], []>} : vector<32x8xbf16>, vector<8x32xbf16>, vector<32x32xf32> -> vector<32x32xf32>
    %91 = arith.addf %84, %90 : vector<32x32xf32>
    %92 = vector.extract_strided_slice %74 {offsets = [4, 0, 0], sizes = [2, 16, 8], strides = [1, 1, 1]} : vector<8x16x8xf32> to vector<2x16x8xf32>
    %93 = vector.shape_cast %92 : vector<2x16x8xf32> to vector<32x8xf32>
    %94 = arith.truncf %93 : vector<32x8xf32> to vector<32x8xbf16>
    %95 = vector.extract_strided_slice %76 {offsets = [2, 0, 0], sizes = [1, 8, 32], strides = [1, 1, 1]} : vector<4x8x32xbf16> to vector<1x8x32xbf16>
    %96 = vector.shape_cast %95 : vector<1x8x32xbf16> to vector<8x32xbf16>
    %cst_30 = arith.constant dense<0.000000e+00> : vector<32x32xf32>
    %97 = tpu.matmul %94, %96, %cst_30 {dimension_numbers = #tpu.dot_dimension_numbers<[1], [0], [0], [1], [0, 0, 1, 1], [], []>} : vector<32x8xbf16>, vector<8x32xbf16>, vector<32x32xf32> -> vector<32x32xf32>
    %98 = arith.addf %91, %97 : vector<32x32xf32>
    %99 = vector.extract_strided_slice %74 {offsets = [6, 0, 0], sizes = [2, 16, 8], strides = [1, 1, 1]} : vector<8x16x8xf32> to vector<2x16x8xf32>
    %100 = vector.shape_cast %99 : vector<2x16x8xf32> to vector<32x8xf32>
    %101 = arith.truncf %100 : vector<32x8xf32> to vector<32x8xbf16>
    %102 = vector.extract_strided_slice %76 {offsets = [3, 0, 0], sizes = [1, 8, 32], strides = [1, 1, 1]} : vector<4x8x32xbf16> to vector<1x8x32xbf16>
    %103 = vector.shape_cast %102 : vector<1x8x32xbf16> to vector<8x32xbf16>
    %cst_31 = arith.constant dense<0.000000e+00> : vector<32x32xf32>
    %104 = tpu.matmul %101, %103, %cst_31 {dimension_numbers = #tpu.dot_dimension_numbers<[1], [0], [0], [1], [0, 0, 1, 1], [], []>} : vector<32x8xbf16>, vector<8x32xbf16>, vector<32x32xf32> -> vector<32x32xf32>
    %105 = arith.addf %98, %104 : vector<32x32xf32>
    %c0_32 = arith.constant 0 : index
    %c0_33 = arith.constant 0 : index
    %c0_34 = arith.constant 0 : index
    %106 = vector.load %arg7[%c0_32, %c0_33, %c0_34] : memref<2x1x32xf32, #tpu.memory_space<vmem>>, vector<1x1x32xf32>
    %107 = vector.shape_cast %106 : vector<1x1x32xf32> to vector<1x32xf32>
    %108 = vector.broadcast %107 : vector<1x32xf32> to vector<32x32xf32>
    %109 = arith.addf %105, %108 : vector<32x32xf32>
    %110 = arith.addf %109, %1 : vector<32x32xf32>
    %c0_35 = arith.constant 0 : index
    %c0_36 = arith.constant 0 : index
    %c0_37 = arith.constant 0 : index
    %111 = vector.load %arg8[%c0_35, %c0_36, %c0_37] : memref<2x1x32xf32, #tpu.memory_space<vmem>>, vector<1x1x32xf32>
    %112 = vector.shape_cast %111 : vector<1x1x32xf32> to vector<1x32xf32>
    %c0_38 = arith.constant 0 : index
    %c0_39 = arith.constant 0 : index
    %c0_40 = arith.constant 0 : index
    %113 = vector.load %arg9[%c0_38, %c0_39, %c0_40] : memref<2x1x32xf32, #tpu.memory_space<vmem>>, vector<1x1x32xf32>
    %114 = vector.shape_cast %113 : vector<1x1x32xf32> to vector<1x32xf32>
    %cst_41 = arith.constant dense<0.000000e+00> : vector<32xf32>
    %115 = vector.multi_reduction <add>, %110, %cst_41 [1] : vector<32x32xf32> to vector<32xf32>
    %116 = vector.shape_cast %115 : vector<32xf32> to vector<32x1xf32>
    %cst_42 = arith.constant 3.200000e+01 : f32
    %117 = vector.broadcast %cst_42 : f32 to vector<32x1xf32>
    %118 = arith.divf %116, %117 : vector<32x1xf32>
    %119 = vector.broadcast %118 : vector<32x1xf32> to vector<32x32xf32>
    %120 = arith.subf %110, %119 : vector<32x32xf32>
    %121 = arith.mulf %120, %120 : vector<32x32xf32>
    %cst_43 = arith.constant dense<0.000000e+00> : vector<32xf32>
    %122 = vector.multi_reduction <add>, %121, %cst_43 [1] : vector<32x32xf32> to vector<32xf32>
    %123 = vector.shape_cast %122 : vector<32xf32> to vector<32x1xf32>
    %cst_44 = arith.constant 3.200000e+01 : f32
    %124 = vector.broadcast %cst_44 : f32 to vector<32x1xf32>
    %125 = arith.divf %123, %124 : vector<32x1xf32>
    %cst_45 = arith.constant 9.99999997E-7 : f32
    %126 = vector.broadcast %cst_45 : f32 to vector<32x1xf32>
    %127 = arith.addf %125, %126 : vector<32x1xf32>
    %128 = math.rsqrt %127 : vector<32x1xf32>
    %129 = vector.broadcast %128 : vector<32x1xf32> to vector<32x32xf32>
    %130 = arith.mulf %120, %129 : vector<32x32xf32>
    %131 = vector.broadcast %112 : vector<1x32xf32> to vector<32x32xf32>
    %132 = arith.mulf %130, %131 : vector<32x32xf32>
    %133 = vector.broadcast %114 : vector<1x32xf32> to vector<32x32xf32>
    %134 = arith.addf %132, %133 : vector<32x32xf32>
    %135 = arith.truncf %134 : vector<32x32xf32> to vector<32x32xbf16>
    %c0_46 = arith.constant 0 : index
    %c0_47 = arith.constant 0 : index
    %c0_48 = arith.constant 0 : index
    %136 = vector.load %arg10[%c0_46, %c0_47, %c0_48] : memref<2x32x64xbf16, #tpu.memory_space<vmem>>, vector<1x32x64xbf16>
    %137 = vector.shape_cast %136 : vector<1x32x64xbf16> to vector<32x64xbf16>
    %cst_49 = arith.constant dense<0.000000e+00> : vector<32x64xf32>
    %138 = tpu.matmul %135, %137, %cst_49 {dimension_numbers = #tpu.dot_dimension_numbers<[1], [0], [0], [1], [0, 0, 1, 1], [], []>} : vector<32x32xbf16>, vector<32x64xbf16>, vector<32x64xf32> -> vector<32x64xf32>
    %c0_50 = arith.constant 0 : index
    %c0_51 = arith.constant 0 : index
    %c0_52 = arith.constant 0 : index
    %139 = vector.load %arg11[%c0_50, %c0_51, %c0_52] : memref<2x1x64xf32, #tpu.memory_space<vmem>>, vector<1x1x64xf32>
    %140 = vector.shape_cast %139 : vector<1x1x64xf32> to vector<1x64xf32>
    %141 = vector.broadcast %140 : vector<1x64xf32> to vector<32x64xf32>
    %142 = arith.addf %138, %141 : vector<32x64xf32>
    %143 = arith.mulf %142, %142 : vector<32x64xf32>
    %144 = arith.mulf %142, %143 : vector<32x64xf32>
    %cst_53 = arith.constant 4.471500e-02 : f32
    %145 = vector.broadcast %cst_53 : f32 to vector<32x64xf32>
    %146 = arith.mulf %145, %144 : vector<32x64xf32>
    %147 = arith.addf %142, %146 : vector<32x64xf32>
    %cst_54 = arith.constant 0.797884583 : f32
    %148 = vector.broadcast %cst_54 : f32 to vector<32x64xf32>
    %149 = arith.mulf %148, %147 : vector<32x64xf32>
    %150 = math.tanh %149 : vector<32x64xf32>
    %cst_55 = arith.constant 1.000000e+00 : f32
    %151 = vector.broadcast %cst_55 : f32 to vector<32x64xf32>
    %152 = arith.addf %151, %150 : vector<32x64xf32>
    %cst_56 = arith.constant 5.000000e-01 : f32
    %153 = vector.broadcast %cst_56 : f32 to vector<32x64xf32>
    %154 = arith.mulf %153, %152 : vector<32x64xf32>
    %155 = arith.mulf %142, %154 : vector<32x64xf32>
    %156 = arith.truncf %155 : vector<32x64xf32> to vector<32x64xbf16>
    %c0_57 = arith.constant 0 : index
    %c0_58 = arith.constant 0 : index
    %c0_59 = arith.constant 0 : index
    %157 = vector.load %arg12[%c0_57, %c0_58, %c0_59] : memref<2x64x32xbf16, #tpu.memory_space<vmem>>, vector<1x64x32xbf16>
    %158 = vector.shape_cast %157 : vector<1x64x32xbf16> to vector<64x32xbf16>
    %cst_60 = arith.constant dense<0.000000e+00> : vector<32x32xf32>
    %159 = tpu.matmul %156, %158, %cst_60 {dimension_numbers = #tpu.dot_dimension_numbers<[1], [0], [0], [1], [0, 0, 1, 1], [], []>} : vector<32x64xbf16>, vector<64x32xbf16>, vector<32x32xf32> -> vector<32x32xf32>
    %c0_61 = arith.constant 0 : index
    %c0_62 = arith.constant 0 : index
    %c0_63 = arith.constant 0 : index
    %160 = vector.load %arg13[%c0_61, %c0_62, %c0_63] : memref<2x1x32xf32, #tpu.memory_space<vmem>>, vector<1x1x32xf32>
    %161 = vector.shape_cast %160 : vector<1x1x32xf32> to vector<1x32xf32>
    %162 = vector.broadcast %161 : vector<1x32xf32> to vector<32x32xf32>
    %163 = arith.addf %159, %162 : vector<32x32xf32>
    %164 = arith.addf %163, %110 : vector<32x32xf32>
    %c1 = arith.constant 1 : index
    %c0_64 = arith.constant 0 : index
    %c0_65 = arith.constant 0 : index
    %165 = vector.load %arg2[%c1, %c0_64, %c0_65] : memref<2x1x32xf32, #tpu.memory_space<vmem>>, vector<1x1x32xf32>
    %166 = vector.shape_cast %165 : vector<1x1x32xf32> to vector<1x32xf32>
    %c1_66 = arith.constant 1 : index
    %c0_67 = arith.constant 0 : index
    %c0_68 = arith.constant 0 : index
    %167 = vector.load %arg3[%c1_66, %c0_67, %c0_68] : memref<2x1x32xf32, #tpu.memory_space<vmem>>, vector<1x1x32xf32>
    %168 = vector.shape_cast %167 : vector<1x1x32xf32> to vector<1x32xf32>
    %cst_69 = arith.constant dense<0.000000e+00> : vector<32xf32>
    %169 = vector.multi_reduction <add>, %164, %cst_69 [1] : vector<32x32xf32> to vector<32xf32>
    %170 = vector.shape_cast %169 : vector<32xf32> to vector<32x1xf32>
    %cst_70 = arith.constant 3.200000e+01 : f32
    %171 = vector.broadcast %cst_70 : f32 to vector<32x1xf32>
    %172 = arith.divf %170, %171 : vector<32x1xf32>
    %173 = vector.broadcast %172 : vector<32x1xf32> to vector<32x32xf32>
    %174 = arith.subf %164, %173 : vector<32x32xf32>
    %175 = arith.mulf %174, %174 : vector<32x32xf32>
    %cst_71 = arith.constant dense<0.000000e+00> : vector<32xf32>
    %176 = vector.multi_reduction <add>, %175, %cst_71 [1] : vector<32x32xf32> to vector<32xf32>
    %177 = vector.shape_cast %176 : vector<32xf32> to vector<32x1xf32>
    %cst_72 = arith.constant 3.200000e+01 : f32
    %178 = vector.broadcast %cst_72 : f32 to vector<32x1xf32>
    %179 = arith.divf %177, %178 : vector<32x1xf32>
    %cst_73 = arith.constant 9.99999997E-7 : f32
    %180 = vector.broadcast %cst_73 : f32 to vector<32x1xf32>
    %181 = arith.addf %179, %180 : vector<32x1xf32>
    %182 = math.rsqrt %181 : vector<32x1xf32>
    %183 = vector.broadcast %182 : vector<32x1xf32> to vector<32x32xf32>
    %184 = arith.mulf %174, %183 : vector<32x32xf32>
    %185 = vector.broadcast %166 : vector<1x32xf32> to vector<32x32xf32>
    %186 = arith.mulf %184, %185 : vector<32x32xf32>
    %187 = vector.broadcast %168 : vector<1x32xf32> to vector<32x32xf32>
    %188 = arith.addf %186, %187 : vector<32x32xf32>
    %189 = arith.truncf %188 : vector<32x32xf32> to vector<32x32xbf16>
    %c1_74 = arith.constant 1 : index
    %c0_75 = arith.constant 0 : index
    %c0_76 = arith.constant 0 : index
    %190 = vector.load %arg4[%c1_74, %c0_75, %c0_76] : memref<2x32x96xbf16, #tpu.memory_space<vmem>>, vector<1x32x96xbf16>
    %191 = vector.shape_cast %190 : vector<1x32x96xbf16> to vector<32x96xbf16>
    %cst_77 = arith.constant dense<0.000000e+00> : vector<32x96xf32>
    %192 = tpu.matmul %189, %191, %cst_77 {dimension_numbers = #tpu.dot_dimension_numbers<[1], [0], [0], [1], [0, 0, 1, 1], [], []>} : vector<32x32xbf16>, vector<32x96xbf16>, vector<32x96xf32> -> vector<32x96xf32>
    %c1_78 = arith.constant 1 : index
    %c0_79 = arith.constant 0 : index
    %c0_80 = arith.constant 0 : index
    %193 = vector.load %arg5[%c1_78, %c0_79, %c0_80] : memref<2x1x96xf32, #tpu.memory_space<vmem>>, vector<1x1x96xf32>
    %194 = vector.shape_cast %193 : vector<1x1x96xf32> to vector<1x96xf32>
    %195 = vector.broadcast %194 : vector<1x96xf32> to vector<32x96xf32>
    %196 = arith.addf %192, %195 : vector<32x96xf32>
    %197 = arith.truncf %196 : vector<32x96xf32> to vector<32x96xbf16>
    %198 = vector.extract_strided_slice %197 {offsets = [0, 0], sizes = [32, 8], strides = [1, 1]} : vector<32x96xbf16> to vector<32x8xbf16>
    %199 = vector.shape_cast %198 : vector<32x8xbf16> to vector<2x16x8xbf16>
    %200 = vector.extract_strided_slice %197 {offsets = [0, 8], sizes = [32, 8], strides = [1, 1]} : vector<32x96xbf16> to vector<32x8xbf16>
    %201 = vector.shape_cast %200 : vector<32x8xbf16> to vector<2x16x8xbf16>
    %202 = vector.extract_strided_slice %197 {offsets = [0, 16], sizes = [32, 8], strides = [1, 1]} : vector<32x96xbf16> to vector<32x8xbf16>
    %203 = vector.shape_cast %202 : vector<32x8xbf16> to vector<2x16x8xbf16>
    %204 = vector.extract_strided_slice %197 {offsets = [0, 24], sizes = [32, 8], strides = [1, 1]} : vector<32x96xbf16> to vector<32x8xbf16>
    %205 = vector.shape_cast %204 : vector<32x8xbf16> to vector<2x16x8xbf16>
    %206 = tpu.concatenate %199, %201, %203, %205 in 0 : vector<2x16x8xbf16>, vector<2x16x8xbf16>, vector<2x16x8xbf16>, vector<2x16x8xbf16> -> vector<8x16x8xbf16>
    %207 = vector.extract_strided_slice %197 {offsets = [0, 32], sizes = [32, 8], strides = [1, 1]} : vector<32x96xbf16> to vector<32x8xbf16>
    %208 = vector.shape_cast %207 : vector<32x8xbf16> to vector<2x16x8xbf16>
    %209 = vector.extract_strided_slice %197 {offsets = [0, 40], sizes = [32, 8], strides = [1, 1]} : vector<32x96xbf16> to vector<32x8xbf16>
    %210 = vector.shape_cast %209 : vector<32x8xbf16> to vector<2x16x8xbf16>
    %211 = vector.extract_strided_slice %197 {offsets = [0, 48], sizes = [32, 8], strides = [1, 1]} : vector<32x96xbf16> to vector<32x8xbf16>
    %212 = vector.shape_cast %211 : vector<32x8xbf16> to vector<2x16x8xbf16>
    %213 = vector.extract_strided_slice %197 {offsets = [0, 56], sizes = [32, 8], strides = [1, 1]} : vector<32x96xbf16> to vector<32x8xbf16>
    %214 = vector.shape_cast %213 : vector<32x8xbf16> to vector<2x16x8xbf16>
    %215 = tpu.concatenate %208, %210, %212, %214 in 0 : vector<2x16x8xbf16>, vector<2x16x8xbf16>, vector<2x16x8xbf16>, vector<2x16x8xbf16> -> vector<8x16x8xbf16>
    %216 = vector.extract_strided_slice %197 {offsets = [0, 64], sizes = [32, 8], strides = [1, 1]} : vector<32x96xbf16> to vector<32x8xbf16>
    %217 = vector.shape_cast %216 : vector<32x8xbf16> to vector<2x16x8xbf16>
    %218 = vector.extract_strided_slice %197 {offsets = [0, 72], sizes = [32, 8], strides = [1, 1]} : vector<32x96xbf16> to vector<32x8xbf16>
    %219 = vector.shape_cast %218 : vector<32x8xbf16> to vector<2x16x8xbf16>
    %220 = vector.extract_strided_slice %197 {offsets = [0, 80], sizes = [32, 8], strides = [1, 1]} : vector<32x96xbf16> to vector<32x8xbf16>
    %221 = vector.shape_cast %220 : vector<32x8xbf16> to vector<2x16x8xbf16>
    %222 = vector.extract_strided_slice %197 {offsets = [0, 88], sizes = [32, 8], strides = [1, 1]} : vector<32x96xbf16> to vector<32x8xbf16>
    %223 = vector.shape_cast %222 : vector<32x8xbf16> to vector<2x16x8xbf16>
    %224 = tpu.concatenate %217, %219, %221, %223 in 0 : vector<2x16x8xbf16>, vector<2x16x8xbf16>, vector<2x16x8xbf16>, vector<2x16x8xbf16> -> vector<8x16x8xbf16>
    "tpu.trace_start"() <{level = 10 : i32, message = "zqd,zkd->zqk"}> : () -> ()
    %cst_81 = arith.constant dense<0.000000e+00> : vector<8x16x16xf32>
    %225 = tpu.matmul %206, %215, %cst_81 {dimension_numbers = #tpu.dot_dimension_numbers<[2], [2], [1], [1], [0, 0, 0, 1, 1, 1], [0], [0]>} : vector<8x16x8xbf16>, vector<8x16x8xbf16>, vector<8x16x16xf32> -> vector<8x16x16xf32>
    "tpu.trace_stop"() : () -> ()
    %cst_82 = arith.constant dense<0xFF800000> : vector<8x16xf32>
    %226 = vector.multi_reduction <maximumf>, %225, %cst_82 [2] : vector<8x16x16xf32> to vector<8x16xf32>
    %227 = vector.shape_cast %226 : vector<8x16xf32> to vector<8x16x1xf32>
    %228 = vector.broadcast %227 : vector<8x16x1xf32> to vector<8x16x16xf32>
    %229 = arith.subf %225, %228 : vector<8x16x16xf32>
    %230 = math.exp %229 : vector<8x16x16xf32>
    %cst_83 = arith.constant dense<0.000000e+00> : vector<8x16xf32>
    %231 = vector.multi_reduction <add>, %230, %cst_83 [2] : vector<8x16x16xf32> to vector<8x16xf32>
    %232 = vector.shape_cast %231 : vector<8x16xf32> to vector<8x16x1xf32>
    %233 = tpu.reciprocal %232 {approx = true} : vector<8x16x1xf32> -> vector<8x16x1xf32>
    %234 = vector.broadcast %233 : vector<8x16x1xf32> to vector<8x16x16xf32>
    %235 = arith.mulf %230, %234 : vector<8x16x16xf32>
    %236 = arith.truncf %235 : vector<8x16x16xf32> to vector<8x16x16xbf16>
    "tpu.trace_start"() <{level = 10 : i32, message = "zqk,zkd->zqd"}> : () -> ()
    %cst_84 = arith.constant dense<0.000000e+00> : vector<8x16x8xf32>
    %237 = tpu.matmul %236, %224, %cst_84 {dimension_numbers = #tpu.dot_dimension_numbers<[2], [1], [1], [2], [0, 0, 0, 1, 1, 2], [0], [0]>} : vector<8x16x16xbf16>, vector<8x16x8xbf16>, vector<8x16x8xf32> -> vector<8x16x8xf32>
    "tpu.trace_stop"() : () -> ()
    %c1_85 = arith.constant 1 : index
    %c0_86 = arith.constant 0 : index
    %c0_87 = arith.constant 0 : index
    %c0_88 = arith.constant 0 : index
    %238 = vector.load %arg6[%c1_85, %c0_86, %c0_87, %c0_88] : memref<2x4x8x32xbf16, #tpu.memory_space<vmem>>, vector<1x4x8x32xbf16>
    %239 = vector.shape_cast %238 : vector<1x4x8x32xbf16> to vector<4x8x32xbf16>
    %cst_89 = arith.constant 0.000000e+00 : f32
    %240 = vector.broadcast %cst_89 : f32 to vector<32x32xf32>
    %241 = vector.extract_strided_slice %237 {offsets = [0, 0, 0], sizes = [2, 16, 8], strides = [1, 1, 1]} : vector<8x16x8xf32> to vector<2x16x8xf32>
    %242 = vector.shape_cast %241 : vector<2x16x8xf32> to vector<32x8xf32>
    %243 = arith.truncf %242 : vector<32x8xf32> to vector<32x8xbf16>
    %244 = vector.extract_strided_slice %239 {offsets = [0, 0, 0], sizes = [1, 8, 32], strides = [1, 1, 1]} : vector<4x8x32xbf16> to vector<1x8x32xbf16>
    %245 = vector.shape_cast %244 : vector<1x8x32xbf16> to vector<8x32xbf16>
    %cst_90 = arith.constant dense<0.000000e+00> : vector<32x32xf32>
    %246 = tpu.matmul %243, %245, %cst_90 {dimension_numbers = #tpu.dot_dimension_numbers<[1], [0], [0], [1], [0, 0, 1, 1], [], []>} : vector<32x8xbf16>, vector<8x32xbf16>, vector<32x32xf32> -> vector<32x32xf32>
    %247 = arith.addf %240, %246 : vector<32x32xf32>
    %248 = vector.extract_strided_slice %237 {offsets = [2, 0, 0], sizes = [2, 16, 8], strides = [1, 1, 1]} : vector<8x16x8xf32> to vector<2x16x8xf32>
    %249 = vector.shape_cast %248 : vector<2x16x8xf32> to vector<32x8xf32>
    %250 = arith.truncf %249 : vector<32x8xf32> to vector<32x8xbf16>
    %251 = vector.extract_strided_slice %239 {offsets = [1, 0, 0], sizes = [1, 8, 32], strides = [1, 1, 1]} : vector<4x8x32xbf16> to vector<1x8x32xbf16>
    %252 = vector.shape_cast %251 : vector<1x8x32xbf16> to vector<8x32xbf16>
    %cst_91 = arith.constant dense<0.000000e+00> : vector<32x32xf32>
    %253 = tpu.matmul %250, %252, %cst_91 {dimension_numbers = #tpu.dot_dimension_numbers<[1], [0], [0], [1], [0, 0, 1, 1], [], []>} : vector<32x8xbf16>, vector<8x32xbf16>, vector<32x32xf32> -> vector<32x32xf32>
    %254 = arith.addf %247, %253 : vector<32x32xf32>
    %255 = vector.extract_strided_slice %237 {offsets = [4, 0, 0], sizes = [2, 16, 8], strides = [1, 1, 1]} : vector<8x16x8xf32> to vector<2x16x8xf32>
    %256 = vector.shape_cast %255 : vector<2x16x8xf32> to vector<32x8xf32>
    %257 = arith.truncf %256 : vector<32x8xf32> to vector<32x8xbf16>
    %258 = vector.extract_strided_slice %239 {offsets = [2, 0, 0], sizes = [1, 8, 32], strides = [1, 1, 1]} : vector<4x8x32xbf16> to vector<1x8x32xbf16>
    %259 = vector.shape_cast %258 : vector<1x8x32xbf16> to vector<8x32xbf16>
    %cst_92 = arith.constant dense<0.000000e+00> : vector<32x32xf32>
    %260 = tpu.matmul %257, %259, %cst_92 {dimension_numbers = #tpu.dot_dimension_numbers<[1], [0], [0], [1], [0, 0, 1, 1], [], []>} : vector<32x8xbf16>, vector<8x32xbf16>, vector<32x32xf32> -> vector<32x32xf32>
    %261 = arith.addf %254, %260 : vector<32x32xf32>
    %262 = vector.extract_strided_slice %237 {offsets = [6, 0, 0], sizes = [2, 16, 8], strides = [1, 1, 1]} : vector<8x16x8xf32> to vector<2x16x8xf32>
    %263 = vector.shape_cast %262 : vector<2x16x8xf32> to vector<32x8xf32>
    %264 = arith.truncf %263 : vector<32x8xf32> to vector<32x8xbf16>
    %265 = vector.extract_strided_slice %239 {offsets = [3, 0, 0], sizes = [1, 8, 32], strides = [1, 1, 1]} : vector<4x8x32xbf16> to vector<1x8x32xbf16>
    %266 = vector.shape_cast %265 : vector<1x8x32xbf16> to vector<8x32xbf16>
    %cst_93 = arith.constant dense<0.000000e+00> : vector<32x32xf32>
    %267 = tpu.matmul %264, %266, %cst_93 {dimension_numbers = #tpu.dot_dimension_numbers<[1], [0], [0], [1], [0, 0, 1, 1], [], []>} : vector<32x8xbf16>, vector<8x32xbf16>, vector<32x32xf32> -> vector<32x32xf32>
    %268 = arith.addf %261, %267 : vector<32x32xf32>
    %c1_94 = arith.constant 1 : index
    %c0_95 = arith.constant 0 : index
    %c0_96 = arith.constant 0 : index
    %269 = vector.load %arg7[%c1_94, %c0_95, %c0_96] : memref<2x1x32xf32, #tpu.memory_space<vmem>>, vector<1x1x32xf32>
    %270 = vector.shape_cast %269 : vector<1x1x32xf32> to vector<1x32xf32>
    %271 = vector.broadcast %270 : vector<1x32xf32> to vector<32x32xf32>
    %272 = arith.addf %268, %271 : vector<32x32xf32>
    %273 = arith.addf %272, %164 : vector<32x32xf32>
    %c1_97 = arith.constant 1 : index
    %c0_98 = arith.constant 0 : index
    %c0_99 = arith.constant 0 : index
    %274 = vector.load %arg8[%c1_97, %c0_98, %c0_99] : memref<2x1x32xf32, #tpu.memory_space<vmem>>, vector<1x1x32xf32>
    %275 = vector.shape_cast %274 : vector<1x1x32xf32> to vector<1x32xf32>
    %c1_100 = arith.constant 1 : index
    %c0_101 = arith.constant 0 : index
    %c0_102 = arith.constant 0 : index
    %276 = vector.load %arg9[%c1_100, %c0_101, %c0_102] : memref<2x1x32xf32, #tpu.memory_space<vmem>>, vector<1x1x32xf32>
    %277 = vector.shape_cast %276 : vector<1x1x32xf32> to vector<1x32xf32>
    %cst_103 = arith.constant dense<0.000000e+00> : vector<32xf32>
    %278 = vector.multi_reduction <add>, %273, %cst_103 [1] : vector<32x32xf32> to vector<32xf32>
    %279 = vector.shape_cast %278 : vector<32xf32> to vector<32x1xf32>
    %cst_104 = arith.constant 3.200000e+01 : f32
    %280 = vector.broadcast %cst_104 : f32 to vector<32x1xf32>
    %281 = arith.divf %279, %280 : vector<32x1xf32>
    %282 = vector.broadcast %281 : vector<32x1xf32> to vector<32x32xf32>
    %283 = arith.subf %273, %282 : vector<32x32xf32>
    %284 = arith.mulf %283, %283 : vector<32x32xf32>
    %cst_105 = arith.constant dense<0.000000e+00> : vector<32xf32>
    %285 = vector.multi_reduction <add>, %284, %cst_105 [1] : vector<32x32xf32> to vector<32xf32>
    %286 = vector.shape_cast %285 : vector<32xf32> to vector<32x1xf32>
    %cst_106 = arith.constant 3.200000e+01 : f32
    %287 = vector.broadcast %cst_106 : f32 to vector<32x1xf32>
    %288 = arith.divf %286, %287 : vector<32x1xf32>
    %cst_107 = arith.constant 9.99999997E-7 : f32
    %289 = vector.broadcast %cst_107 : f32 to vector<32x1xf32>
    %290 = arith.addf %288, %289 : vector<32x1xf32>
    %291 = math.rsqrt %290 : vector<32x1xf32>
    %292 = vector.broadcast %291 : vector<32x1xf32> to vector<32x32xf32>
    %293 = arith.mulf %283, %292 : vector<32x32xf32>
    %294 = vector.broadcast %275 : vector<1x32xf32> to vector<32x32xf32>
    %295 = arith.mulf %293, %294 : vector<32x32xf32>
    %296 = vector.broadcast %277 : vector<1x32xf32> to vector<32x32xf32>
    %297 = arith.addf %295, %296 : vector<32x32xf32>
    %298 = arith.truncf %297 : vector<32x32xf32> to vector<32x32xbf16>
    %c1_108 = arith.constant 1 : index
    %c0_109 = arith.constant 0 : index
    %c0_110 = arith.constant 0 : index
    %299 = vector.load %arg10[%c1_108, %c0_109, %c0_110] : memref<2x32x64xbf16, #tpu.memory_space<vmem>>, vector<1x32x64xbf16>
    %300 = vector.shape_cast %299 : vector<1x32x64xbf16> to vector<32x64xbf16>
    %cst_111 = arith.constant dense<0.000000e+00> : vector<32x64xf32>
    %301 = tpu.matmul %298, %300, %cst_111 {dimension_numbers = #tpu.dot_dimension_numbers<[1], [0], [0], [1], [0, 0, 1, 1], [], []>} : vector<32x32xbf16>, vector<32x64xbf16>, vector<32x64xf32> -> vector<32x64xf32>
    %c1_112 = arith.constant 1 : index
    %c0_113 = arith.constant 0 : index
    %c0_114 = arith.constant 0 : index
    %302 = vector.load %arg11[%c1_112, %c0_113, %c0_114] : memref<2x1x64xf32, #tpu.memory_space<vmem>>, vector<1x1x64xf32>
    %303 = vector.shape_cast %302 : vector<1x1x64xf32> to vector<1x64xf32>
    %304 = vector.broadcast %303 : vector<1x64xf32> to vector<32x64xf32>
    %305 = arith.addf %301, %304 : vector<32x64xf32>
    %306 = arith.mulf %305, %305 : vector<32x64xf32>
    %307 = arith.mulf %305, %306 : vector<32x64xf32>
    %cst_115 = arith.constant 4.471500e-02 : f32
    %308 = vector.broadcast %cst_115 : f32 to vector<32x64xf32>
    %309 = arith.mulf %308, %307 : vector<32x64xf32>
    %310 = arith.addf %305, %309 : vector<32x64xf32>
    %cst_116 = arith.constant 0.797884583 : f32
    %311 = vector.broadcast %cst_116 : f32 to vector<32x64xf32>
    %312 = arith.mulf %311, %310 : vector<32x64xf32>
    %313 = math.tanh %312 : vector<32x64xf32>
    %cst_117 = arith.constant 1.000000e+00 : f32
    %314 = vector.broadcast %cst_117 : f32 to vector<32x64xf32>
    %315 = arith.addf %314, %313 : vector<32x64xf32>
    %cst_118 = arith.constant 5.000000e-01 : f32
    %316 = vector.broadcast %cst_118 : f32 to vector<32x64xf32>
    %317 = arith.mulf %316, %315 : vector<32x64xf32>
    %318 = arith.mulf %305, %317 : vector<32x64xf32>
    %319 = arith.truncf %318 : vector<32x64xf32> to vector<32x64xbf16>
    %c1_119 = arith.constant 1 : index
    %c0_120 = arith.constant 0 : index
    %c0_121 = arith.constant 0 : index
    %320 = vector.load %arg12[%c1_119, %c0_120, %c0_121] : memref<2x64x32xbf16, #tpu.memory_space<vmem>>, vector<1x64x32xbf16>
    %321 = vector.shape_cast %320 : vector<1x64x32xbf16> to vector<64x32xbf16>
    %cst_122 = arith.constant dense<0.000000e+00> : vector<32x32xf32>
    %322 = tpu.matmul %319, %321, %cst_122 {dimension_numbers = #tpu.dot_dimension_numbers<[1], [0], [0], [1], [0, 0, 1, 1], [], []>} : vector<32x64xbf16>, vector<64x32xbf16>, vector<32x32xf32> -> vector<32x32xf32>
    %c1_123 = arith.constant 1 : index
    %c0_124 = arith.constant 0 : index
    %c0_125 = arith.constant 0 : index
    %323 = vector.load %arg13[%c1_123, %c0_124, %c0_125] : memref<2x1x32xf32, #tpu.memory_space<vmem>>, vector<1x1x32xf32>
    %324 = vector.shape_cast %323 : vector<1x1x32xf32> to vector<1x32xf32>
    %325 = vector.broadcast %324 : vector<1x32xf32> to vector<32x32xf32>
    %326 = arith.addf %322, %325 : vector<32x32xf32>
    %327 = arith.addf %326, %273 : vector<32x32xf32>
    %c0_126 = arith.constant 0 : index
    %c0_127 = arith.constant 0 : index
    %328 = vector.load %arg14[%c0_126, %c0_127] : memref<1x32xf32, #tpu.memory_space<vmem>>, vector<1x32xf32>
    %c0_128 = arith.constant 0 : index
    %c0_129 = arith.constant 0 : index
    %329 = vector.load %arg15[%c0_128, %c0_129] : memref<1x32xf32, #tpu.memory_space<vmem>>, vector<1x32xf32>
    %cst_130 = arith.constant dense<0.000000e+00> : vector<32xf32>
    %330 = vector.multi_reduction <add>, %327, %cst_130 [1] : vector<32x32xf32> to vector<32xf32>
    %331 = vector.shape_cast %330 : vector<32xf32> to vector<32x1xf32>
    %cst_131 = arith.constant 3.200000e+01 : f32
    %332 = vector.broadcast %cst_131 : f32 to vector<32x1xf32>
    %333 = arith.divf %331, %332 : vector<32x1xf32>
    %334 = vector.broadcast %333 : vector<32x1xf32> to vector<32x32xf32>
    %335 = arith.subf %327, %334 : vector<32x32xf32>
    %336 = arith.mulf %335, %335 : vector<32x32xf32>
    %cst_132 = arith.constant dense<0.000000e+00> : vector<32xf32>
    %337 = vector.multi_reduction <add>, %336, %cst_132 [1] : vector<32x32xf32> to vector<32xf32>
    %338 = vector.shape_cast %337 : vector<32xf32> to vector<32x1xf32>
    %cst_133 = arith.constant 3.200000e+01 : f32
    %339 = vector.broadcast %cst_133 : f32 to vector<32x1xf32>
    %340 = arith.divf %338, %339 : vector<32x1xf32>
    %cst_134 = arith.constant 9.99999997E-7 : f32
    %341 = vector.broadcast %cst_134 : f32 to vector<32x1xf32>
    %342 = arith.addf %340, %341 : vector<32x1xf32>
    %343 = math.rsqrt %342 : vector<32x1xf32>
    %344 = vector.broadcast %343 : vector<32x1xf32> to vector<32x32xf32>
    %345 = arith.mulf %335, %344 : vector<32x32xf32>
    %346 = vector.broadcast %328 : vector<1x32xf32> to vector<32x32xf32>
    %347 = arith.mulf %345, %346 : vector<32x32xf32>
    %348 = vector.broadcast %329 : vector<1x32xf32> to vector<32x32xf32>
    %349 = arith.addf %347, %348 : vector<32x32xf32>
    %350 = vector.shape_cast %349 : vector<32x32xf32> to vector<2x16x32xf32>
    %c0_135 = arith.constant 0 : index
    %c0_136 = arith.constant 0 : index
    %c0_137 = arith.constant 0 : index
    %351 = vector.load %arg16[%c0_135, %c0_136, %c0_137] : memref<2x16x32xf32, #tpu.memory_space<vmem>>, vector<2x16x32xf32>
    tpu.vector_store %arg16[%c0_135, %c0_136, %c0_137], %350 {strides = array<i32>} : memref<2x16x32xf32, #tpu.memory_space<vmem>>, vector<2x16x32xf32>,
    return
  }
  func.func @transform_0(%arg0: i32) -> (i32, i32, i32) {
    %c0_i32 = arith.constant 0 : i32
    %c0_i32_0 = arith.constant 0 : i32
    %c0_i32_1 = arith.constant 0 : i32
    %c0_i32_2 = arith.constant 0 : i32
    return %c0_i32, %c0_i32_0, %c0_i32_1 : i32, i32, i32
  }
  func.func @transform_1(%arg0: i32) -> (i32, i32, i32) {
    %c0_i32 = arith.constant 0 : i32
    %c0_i32_0 = arith.constant 0 : i32
    %c0_i32_1 = arith.constant 0 : i32
    %c0_i32_2 = arith.constant 0 : i32
    return %c0_i32, %c0_i32_0, %c0_i32_1 : i32, i32, i32
  }
  func.func @transform_2(%arg0: i32) -> (i32, i32, i32) {
    %c0_i32 = arith.constant 0 : i32
    %c0_i32_0 = arith.constant 0 : i32
    %c0_i32_1 = arith.constant 0 : i32
    %c0_i32_2 = arith.constant 0 : i32
    return %c0_i32, %c0_i32_0, %c0_i32_1 : i32, i32, i32
  }
  func.func @transform_3(%arg0: i32) -> (i32, i32, i32) {
    %c0_i32 = arith.constant 0 : i32
    %c0_i32_0 = arith.constant 0 : i32
    %c0_i32_1 = arith.constant 0 : i32
    %c0_i32_2 = arith.constant 0 : i32
    return %c0_i32, %c0_i32_0, %c0_i32_1 : i32, i32, i32
  }
  func.func @transform_4(%arg0: i32) -> (i32, i32, i32) {
    %c0_i32 = arith.constant 0 : i32
    %c0_i32_0 = arith.constant 0 : i32
    %c0_i32_1 = arith.constant 0 : i32
    %c0_i32_2 = arith.constant 0 : i32
    return %c0_i32, %c0_i32_0, %c0_i32_1 : i32, i32, i32
  }
  func.func @transform_5(%arg0: i32) -> (i32, i32, i32, i32) {
    %c0_i32 = arith.constant 0 : i32
    %c0_i32_0 = arith.constant 0 : i32
    %c0_i32_1 = arith.constant 0 : i32
    %c0_i32_2 = arith.constant 0 : i32
    %c0_i32_3 = arith.constant 0 : i32
    return %c0_i32, %c0_i32_0, %c0_i32_1, %c0_i32_2 : i32, i32, i32, i32
  }
  func.func @transform_6(%arg0: i32) -> (i32, i32, i32) {
    %c0_i32 = arith.constant 0 : i32
    %c0_i32_0 = arith.constant 0 : i32
    %c0_i32_1 = arith.constant 0 : i32
    %c0_i32_2 = arith.constant 0 : i32
    return %c0_i32, %c0_i32_0, %c0_i32_1 : i32, i32, i32
  }
  func.func @transform_7(%arg0: i32) -> (i32, i32, i32) {
    %c0_i32 = arith.constant 0 : i32
    %c0_i32_0 = arith.constant 0 : i32
    %c0_i32_1 = arith.constant 0 : i32
    %c0_i32_2 = arith.constant 0 : i32
    return %c0_i32, %c0_i32_0, %c0_i32_1 : i32, i32, i32
  }
  func.func @transform_8(%arg0: i32) -> (i32, i32, i32) {
    %c0_i32 = arith.constant 0 : i32
    %c0_i32_0 = arith.constant 0 : i32
    %c0_i32_1 = arith.constant 0 : i32
    %c0_i32_2 = arith.constant 0 : i32
    return %c0_i32, %c0_i32_0, %c0_i32_1 : i32, i32, i32
  }
  func.func @transform_9(%arg0: i32) -> (i32, i32, i32) {
    %c0_i32 = arith.constant 0 : i32
    %c0_i32_0 = arith.constant 0 : i32
    %c0_i32_1 = arith.constant 0 : i32
    %c0_i32_2 = arith.constant 0 : i32
    return %c0_i32, %c0_i32_0, %c0_i32_1 : i32, i32, i32
  }
  func.func @transform_10(%arg0: i32) -> (i32, i32, i32) {
    %c0_i32 = arith.constant 0 : i32
    %c0_i32_0 = arith.constant 0 : i32
    %c0_i32_1 = arith.constant 0 : i32
    %c0_i32_2 = arith.constant 0 : i32
    return %c0_i32, %c0_i32_0, %c0_i32_1 : i32, i32, i32
  }
  func.func @transform_11(%arg0: i32) -> (i32, i32, i32) {
    %c0_i32 = arith.constant 0 : i32
    %c0_i32_0 = arith.constant 0 : i32
    %c0_i32_1 = arith.constant 0 : i32
    %c0_i32_2 = arith.constant 0 : i32
    return %c0_i32, %c0_i32_0, %c0_i32_1 : i32, i32, i32
  }
  func.func @transform_12(%arg0: i32) -> (i32, i32, i32) {
    %c0_i32 = arith.constant 0 : i32
    %c0_i32_0 = arith.constant 0 : i32
    %c0_i32_1 = arith.constant 0 : i32
    %c0_i32_2 = arith.constant 0 : i32
    return %c0_i32, %c0_i32_0, %c0_i32_1 : i32, i32, i32
  }
  func.func @transform_13(%arg0: i32) -> (i32, i32) {
    %c0_i32 = arith.constant 0 : i32
    %c0_i32_0 = arith.constant 0 : i32
    %c0_i32_1 = arith.constant 0 : i32
    return %c0_i32, %c0_i32_0 : i32, i32
  }
  func.func @transform_14(%arg0: i32) -> (i32, i32) {
    %c0_i32 = arith.constant 0 : i32
    %c0_i32_0 = arith.constant 0 : i32
    %c0_i32_1 = arith.constant 0 : i32
    return %c0_i32, %c0_i32_0 : i32, i32
  }
  func.func @transform_15(%arg0: i32) -> (i32, i32, i32) {
    %c0_i32 = arith.constant 0 : i32
    %c0_i32_0 = arith.constant 0 : i32
    %c0_i32_1 = arith.constant 0 : i32
    %c0_i32_2 = arith.constant 0 : i32
    return %c0_i32, %c0_i32_0, %c0_i32_1 : i32, i32, i32
  }
}

</mosaic_0001>

<bundles_post_ra>
// kernel: encoder_forward.1
= control target key start
LH: loop header
LB: loop body
LE: loop exit
PB: predicated region body
PF: predicated region fallthrough
CT: control target
= control target key end

     0   :  { %20 = vsyncpa [#allocation3], 0  ;;  %s5501_s0 = inlined_call_operand.vmem [shape: f32[2,16,32], index: 0, kind: input, shape index: {}]   ;;  %s5502_s1 = inlined_call_operand.vmem [shape: f32[2,1,32], index: 1, kind: input, shape index: {}]   ;;  %s5503_s2 = inlined_call_operand.vmem [shape: f32[2,1,32], index: 2, kind: input, shape index: {}]   ;;  %s5504_s3 = inlined_call_operand.vmem [shape: bf16[2,32,96], index: 3, kind: input, shape index: {}]   ;;  %s5505_s4 = inlined_call_operand.vmem [shape: f32[2,1,96], index: 4, kind: input, shape index: {}]   ;;  %s5506_s5 = inlined_call_operand.vmem [shape: bf16[2,4,8,32], index: 5, kind: input, shape index: {}]   ;;  %s5507_s6 = inlined_call_operand.vmem [shape: f32[2,1,32], index: 6, kind: input, shape index: {}]   ;;  %s5508_s7 = inlined_call_operand.vmem [shape: f32[2,1,32], index: 7, kind: input, shape index: {}]   ;;  %s5509_s8 = inlined_call_operand.vmem [shape: f32[2,1,32], index: 8, kind: input, shape index: {}]   ;;  %s5510_s9 = inlined_call_operand.hbm [shape: bf16[2,32,64], index: 9, kind: input, shape index: {}]   ;;  %s5511_s10 = inlined_call_operand.hbm [shape: f32[2,1,64], index: 10, kind: input, shape index: {}]   ;;  %s5512_s11 = inlined_call_operand.vmem [shape: bf16[2,64,32], index: 11, kind: input, shape index: {}]   ;;  %s5513_s12 = inlined_call_operand.hbm [shape: f32[2,1,32], index: 12, kind: input, shape index: {}]   ;;  %s5514_s13 = inlined_call_operand.vmem [shape: f32[1,32], index: 13, kind: input, shape index: {}]   ;;  %s5515_s14 = inlined_call_operand.hbm [shape: f32[1,32], index: 14, kind: input, shape index: {}]   ;;  %s5516_s15 = inlined_call_operand.hbm [shape: f32[2,16,32], index: 15, kind: output, shape index: {}]  }
   0x1   :  { %21 = vsyncpa [#allocation6], 0 }
   0x2   :  { %22 = vsyncpa [#allocation9], 0 }
   0x3   :  { %23 = vsyncpa [#allocation4], 0  ;;  %s4481_s18 = smov [#allocation5]   ;;  %s4363_s22 = scalar_lea.hbm %s5511_s10, 32 }
   0x4   :  { %s59_s19 = sshll.u32 %s4481_s18, 4  ;;  %p4364_p0 = scmp.ne.s32.totalorder %s5511_s10, %s4363_s22  ;;  %s60_s19 = int_to_ptr.vmem [resolvable:$true] %s59_s19 }
   0x5   :  { %p4367_p1 = scmp.lt.u32.totalorder %s4363_s22, %s5511_s10 }
   0x7   :  { %p4369_p2 = pnand %p4367_p1, %p4364_p0 }
   0x9   :  { %4372 = shalt.err (!%p4369_p2)
}
   0xa   :  { %s4373_s27 = scalar_lea.vmem %s60_s19, 32  ;;  %p4378_p4 = scmp.lt.s32.totalorder %s60_s19, %s60_s19 }
   0xb   :  { %p4374_p3 = scmp.ne.s32.totalorder %s60_s19, %s4373_s27  ;;  %p4379_p5 = scmp.lt.s32.totalorder %s4373_s27, %s4373_s27 }
   0xd   :  { %p4380_p6 = por %p4379_p5, %p4378_p4 }
   0xf   :  { %p4381_p7 = pnand %p4380_p6, %p4374_p3 }
  0x11   :  { %4384 = shalt.err (!%p4381_p7)
}
  0x12   :  { %s5517_s28 = smov 16   ;;  %s5518_s29 = smov 1  }
  0x13   :  { %65 = dma.hbm_to_vmem [thread:$0]  %s5511_s10, 32, %s60_s19, [#allocation6], %s5517_s28, %s5517_s28, %s5518_s29  }
  0x14   :  { %s4484_s17 = smov [#allocation2]   ;;  %s4385_s22 = scalar_lea.hbm %s5510_s9, 512 }
  0x15   :  { %s47_s18 = sshll.u32 %s4484_s17, 4  ;;  %p4386_p8 = scmp.ne.s32.totalorder %s5510_s9, %s4385_s22  ;;  %s48_s18 = int_to_ptr.vmem [resolvable:$true] %s47_s18 }
  0x16   :  { %p4389_p9 = scmp.lt.u32.totalorder %s4385_s22, %s5510_s9 }
  0x18   :  { %p4391_p10 = pnand %p4389_p9, %p4386_p8 }
  0x1a   :  { %4394 = shalt.err (!%p4391_p10)
}
  0x1b   :  { %s4395_s27 = scalar_lea.vmem %s48_s18, 512  ;;  %p4400_p12 = scmp.lt.s32.totalorder %s48_s18, %s48_s18 }
  0x1c   :  { %p4396_p11 = scmp.ne.s32.totalorder %s48_s18, %s4395_s27  ;;  %p4401_p13 = scmp.lt.s32.totalorder %s4395_s27, %s4395_s27 }
  0x1e   :  { %p4402_p0 = por %p4401_p13, %p4400_p12 }
  0x20   :  { %p4403_p1 = pnand %p4402_p0, %p4396_p11 }
  0x22   :  { %4406 = shalt.err (!%p4403_p1)
}
  0x23   :  { %s4485_s10 = smov 64   ;;  %s4486_s19 = smov 4  }
  0x24   :  { %53 = dma.hbm_to_vmem [thread:$0]  %s5510_s9, 512, %s48_s18, [#allocation3], %s4485_s10, %s4485_s10, %s4486_s19  }
  0x25   :  { %s4487_s17 = smov [#allocation7]   ;;  %s4488_s21 = smov [#allocation8]  }
  0x26   :  { %s73_s20 = sshll.u32 %s4487_s17, 4  ;;  %s88_s22 = sshll.u32 %s4488_s21, 4  ;;  %s74_s20 = int_to_ptr.vmem [resolvable:$true] %s73_s20  ;;  %s89_s22 = int_to_ptr.vmem [resolvable:$true] %s88_s22 }
  0x27   :  { %s4407_s25 = scalar_lea.hbm %s5513_s12, 32 }
  0x28   :  { %p4408_p2 = scmp.ne.s32.totalorder %s5513_s12, %s4407_s25  ;;  %p4411_p3 = scmp.lt.u32.totalorder %s4407_s25, %s5513_s12 }
  0x2a   :  { %p4413_p4 = pnand %p4411_p3, %p4408_p2 }
  0x2c   :  { %4416 = shalt.err (!%p4413_p4)
}
  0x2d   :  { %s4417_s9 = scalar_lea.vmem %s74_s20, 32  ;;  %p4422_p6 = scmp.lt.s32.totalorder %s74_s20, %s74_s20 }
  0x2e   :  { %p4418_p5 = scmp.ne.s32.totalorder %s74_s20, %s4417_s9  ;;  %p4423_p7 = scmp.lt.s32.totalorder %s4417_s9, %s4417_s9 }
  0x30   :  { %p4424_p8 = por %p4423_p7, %p4422_p6 }
  0x32   :  { %p4425_p9 = pnand %p4424_p8, %p4418_p5 }
  0x34   :  { %4428 = shalt.err (!%p4425_p9)
}
  0x35   :  { %s5519_s18 = smov 1   ;;  %s5520_s19 = smov 16  }
  0x36   :  { %79 = dma.hbm_to_vmem [thread:$0]  %s5513_s12, 32, %s74_s20, [#allocation6], %s5520_s19, %s5520_s19, %s5519_s18  }
  0x37   :  { %s4429_s28 = scalar_lea.hbm %s5515_s14, 16 }
  0x38   :  { %p4430_p10 = scmp.ne.s32.totalorder %s5515_s14, %s4429_s28  ;;  %p4433_p11 = scmp.lt.u32.totalorder %s4429_s28, %s5515_s14 }
  0x3a   :  { %p4435_p12 = pnand %p4433_p11, %p4430_p10 }
  0x3c   :  { %4438 = shalt.err (!%p4435_p12)
}
  0x3d   :  { %s4439_s26 = scalar_lea.vmem %s89_s22, 16  ;;  %s4443_s27 = scalar_lea.vmem %s89_s22, 32 }
  0x3e   :  { %p4440_p13 = scmp.ne.s32.totalorder %s89_s22, %s4439_s26  ;;  %p4444_p0 = scmp.lt.s32.totalorder %s89_s22, %s89_s22 }
  0x3f   :  { %p4445_p1 = scmp.lt.s32.totalorder %s4443_s27, %s4439_s26 }
  0x41   :  { %p4446_p2 = por %p4445_p1, %p4444_p0 }
  0x43   :  { %p4447_p3 = pnand %p4446_p2, %p4440_p13 }
  0x45   :  { %4450 = shalt.err (!%p4447_p3)
}
  0x46   :  { %91 = dma.hbm_to_vmem [thread:$0]  %s5515_s14, 16, %s89_s22, [#allocation9]  }
  0x47   :  { %4473 = dma.done.wait [#allocation3], 512  }
  0x48   :  { %4474 = vsyncadd [#allocation3], 4294966784 }
  0x49   :  { %4475 = dma.done.wait [#allocation6], 64  }
  0x4a   :  { %4476 = vsyncadd [#allocation6], 4294967232 }
  0x4b   :  { %4477 = dma.done.wait [#allocation9], 16  }
  0x4c   :  { %4478 = vsyncadd [#allocation9], 4294967280  ;;  %vm111_vm0 = vcmask 261120   ;;  %v105_v0 = vld [vmem:[%s5501_s0] sm:$0xff]  ;;  %v107_v1 = vld [vmem:[%s5501_s0 + $0x10] sm:$0xff]  ;;  %s4490_s9 = smov 120  }
  0x4d   :  { %v106_v2 = vld [vmem:[%s5501_s0 + $0x8] sm:$0xff]  ;;  %v112_v3 = vsel %vm111_vm0, %v105_v0, 0.0  ;;  %v118_v4 = vsel %vm111_vm0, %v107_v1, 0.0  ;;  %v108_v5 = vld [vmem:[%s5501_s0 + $0x18] sm:$0xff]  ;;  %v4159_v28 = vld [vmem:[%s5504_s3] sm:$0xff]   ;;  %s4491_s18 = smov 112  }
  0x4e   :  { %113 = vadd.xlane.f32.xlu0 %v112_v3  ;;  %119 = vadd.xlane.f32.xlu1 %v118_v4  ;;  %v115_v6 = vsel %vm111_vm0, %v106_v2, 0.0  ;;  %v121_v7 = vsel %vm111_vm0, %v108_v5, 0.0  ;;  %v4160_v29 = vld [vmem:[%s5504_s3 + $0x8] sm:$0xff]   ;;  %v3582_v44 = vld [vmem:[%s5502_s1] ss:$0 sm:$0xff]  ;;  %vm4492_vm1 = vmmov 0  }
  0x4f   :  { %3814 = vmatprep.subr.bf16.mxu0 %v4159_v28  ;;  %v3583_v49 = vld [vmem:[%s5503_s2] ss:$0 sm:$0xff]  ;;  %s4493_s19 = smov 104   ;;  %s4494_s30 = smov 96   ;;  %vm283_vm2 = vcmask 64512   ;;  %vm674_vm3 = vcmask 130048  }
  0x50   :  { %3815 = vmatpush3.bf16.msra.mxu0 %v4159_v28  ;;  %v3584_v63 = vld [vmem:[%s5505_s4] ss:$0 sm:$0xff]  ;;  %vm1249_vm4 = vcmask 1043456   ;;  %vm1734_vm5 = vcmask 523264   ;;  %s4495_s21 = smov [#allocation10]  }
  0x51   :  { %3816 = vmatprep.subr.bf16.mxu0 %v4160_v29  ;;  %s3568_s28 = sshll.u32 %s4495_s21, 4  ;;  %s3569_s28 = int_to_ptr.vmem [resolvable:$true] %s3568_s28 }
  0x52   :  { %116 = vadd.xlane.f32.xlu0 %v115_v6  ;;  %122 = vadd.xlane.f32.xlu1 %v121_v7  ;;  %p4456_p5 = scmp.lt.s32.totalorder %s3569_s28, %s3569_s28 }
  0x54   :  { %3817 = vmatpush3.bf16.msra.mxu0 %v4160_v29 }
  0xdb   :  { %v114_v8 = vpop.xlane.xlu0 %113  ;;  %v120_v9 = vpop.xlane.xlu1 %119 }
  0xdc   :  { %v125_v10 = vmul.f32 0.03125, %v114_v8  ;;  %v127_v11 = vmul.f32 0.03125, %v120_v9 }
  0xde   :  { %v129_v12 = vsub.f32 %v105_v0, %v125_v10  ;;  %v131_v13 = vsub.f32 %v107_v1, %v127_v11 }
  0xdf   :  { %v117_v14 = vpop.xlane.xlu0 %116  ;;  %v123_v15 = vpop.xlane.xlu1 %122 }
  0xe0   :  { %v126_v16 = vmul.f32 0.03125, %v117_v14  ;;  %v128_v17 = vmul.f32 0.03125, %v123_v15  ;;  %v133_v18 = vmul.f32 %v129_v12, %v129_v12  ;;  %v135_v19 = vmul.f32 %v131_v13, %v131_v13 }
  0xe2   :  { %v130_v20 = vsub.f32 %v106_v2, %v126_v16  ;;  %v132_v21 = vsub.f32 %v108_v5, %v128_v17  ;;  %v137_v22 = vsel %vm111_vm0, %v133_v18, 0.0  ;;  %v143_v23 = vsel %vm111_vm0, %v135_v19, 0.0 }
  0xe3   :  { %138 = vadd.xlane.f32.xlu0 %v137_v22  ;;  %v4489_v5 = vmov 0.0  }
  0xe4   :  { %v134_v24 = vmul.f32 %v130_v20, %v130_v20  ;;  %v136_v25 = vmul.f32 %v132_v21, %v132_v21  ;;  %3822 = vmatprep.subr.bf16.mxu1 %v4489_v5  ;;  %3828 = vmatprep.subr.bf16.mxu0 %v4489_v5 }
  0xe5   :  { %3824 = vmatprep.mubr.msk.bf16.mxu1 %vm4492_vm1, %v4489_v5 }
  0xe6   :  { %v140_v26 = vsel %vm111_vm0, %v134_v24, 0.0  ;;  %v146_v27 = vsel %vm111_vm0, %v136_v25, 0.0 }
  0xe7   :  { %144 = vadd.xlane.f32.xlu0 %v143_v23  ;;  %141 = vadd.xlane.f32.xlu1 %v140_v26 }
  0xeb   :  { %147 = vadd.xlane.f32.xlu1 %v146_v27 }
 0x170   :  { %v139_v30 = vpop.xlane.xlu0 %138 }
 0x171   :  { %v149_v31 = vmul.f32 0.03125, %v139_v30 }
 0x173   :  { %v153_v32 = vadd.f32 1e-06, %v149_v31 }
 0x174   :  { %v142_v33 = vpop.xlane.xlu1 %141  ;;  %v145_v34 = vpop.xlane.xlu0 %144 }
 0x175   :  { %4175 = vrsqrt.f32 %v153_v32  ;;  %v150_v35 = vmul.f32 0.03125, %v142_v33  ;;  %v151_v36 = vmul.f32 0.03125, %v145_v34 }
 0x177   :  { %v154_v37 = vadd.f32 1e-06, %v150_v35  ;;  %v155_v38 = vadd.f32 1e-06, %v151_v36 }
 0x178   :  { %v148_v39 = vpop.xlane.xlu1 %147 }
 0x179   :  { %4177 = vrsqrt.f32 %v154_v37  ;;  %v152_v40 = vmul.f32 0.03125, %v148_v39 }
 0x17a   :  { %4179 = vrsqrt.f32 %v155_v38 }
 0x17b   :  { %v156_v41 = vadd.f32 1e-06, %v152_v40 }
 0x17d   :  { %4181 = vrsqrt.f32 %v156_v41 }
 0x17f   :  { %v4176_v42 = vpop.eup %4175 }
 0x180   :  { %v161_v43 = vmul.f32 %v4176_v42, %v129_v12 }
 0x182   :  { %v171_v48 = vmul.f32 %v3582_v44, %v161_v43 }
 0x183   :  { %v4178_v45 = vpop.eup %4177 }
 0x184   :  { %v4180_v46 = vpop.eup %4179  ;;  %v162_v47 = vmul.f32 %v4178_v45, %v130_v20  ;;  %v181_v53 = vadd.f32 %v3583_v49, %v171_v48 }
 0x185   :  { %v163_v50 = vmul.f32 %v4180_v46, %v131_v13 }
 0x186   :  { %v172_v51 = vmul.f32 %v3582_v44, %v162_v47 }
 0x187   :  { %v4182_v52 = vpop.eup %4181  ;;  %v173_v56 = vmul.f32 %v3582_v44, %v163_v50 }
 0x188   :  { %v182_v54 = vadd.f32 %v3583_v49, %v172_v51  ;;  %v164_v55 = vmul.f32 %v4182_v52, %v132_v21 }
 0x189   :  { %v183_v59 = vadd.f32 %v3583_v49, %v173_v56 }
 0x18a   :  { %v185_v57 = vpack.c.bf16 %v182_v54, %v181_v53  ;;  %v174_v58 = vmul.f32 %v3582_v44, %v164_v55 }
 0x18c   :  { %3818 = vmatprep.mubr.msk.bf16.mxu0 %vm111_vm0, %v185_v57  ;;  %v184_v60 = vadd.f32 %v3583_v49, %v174_v58 }
 0x18e   :  { %v186_v61 = vpack.c.bf16 %v184_v60, %v183_v59 }
 0x190   :  { %3819 = vmatmul.mubr.msk.bf16.vlgmr.msra.gmra.mrb[0].mxu0 %vm111_vm0, %v186_v61 }
 0x191   :  { %3830 = vmatprep.mubr.msk.bf16.mxu0 %vm4492_vm1, %v4489_v5 }
 0x263   :  { %v3820_v62 = vpop.f32.mrb[0].mxu0 }
 0x264   :  { %v250_v0 = vpop.f32.mrb[1].mxu0  ;;  %v259_v2 = vadd.f32 %v3820_v62, %v3584_v63 }
 0x265   :  { %v3821_v1 = vpop.f32.mrb[2].mxu0  ;;  %v251_v6 = vadd.f32 %v3584_v63, %v250_v0 }
 0x266   :  { %v262_v3 = vadd.f32 %v3821_v1, %v3584_v63  ;;  %v253_v4 = vpop.f32.mrb[3].mxu0 }
 0x267   :  { %v254_v7 = vadd.f32 %v3584_v63, %v253_v4 }
 0x268   :  { %v4673_v8 = vpack.c.bf16 %v262_v3, %v259_v2 }
 0x269   :  { %v4675_v9 = vpack.c.bf16 %v254_v7, %v251_v6 }
 0x26a   :  { %271 = vrot.lane.b32.xlu1 %v4673_v8, %s4490_s9 }
 0x26b   :  { %269 = vrot.lane.b32.xlu0 %v4675_v9, %s4490_s9 }
 0x26e   :  { %273 = vrot.lane.b32.xlu1 %v4675_v9, %s4491_s18 }
 0x26f   :  { %277 = vrot.lane.b32.xlu0 %v4675_v9, %s4493_s19 }
 0x272   :  { %275 = vrot.lane.b32.xlu1 %v4673_v8, %s4491_s18 }
 0x273   :  { %281 = vrot.lane.b32.xlu0 %v4675_v9, %s4494_s30 }
 0x276   :  { %279 = vrot.lane.b32.xlu1 %v4673_v8, %s4493_s19 }
 0x27a   :  { %331 = vrot.lane.b32.xlu1 %v4673_v8, %s4494_s30 }
 0x2dc   :  { %v4697_v10 = vpop.permute.xlu1 %271 }
 0x2dd   :  { %429 = vrot.lane.b32.xlu1 %v4697_v10, %s4494_s30  ;;  %v4701_v11 = vpop.permute.xlu0 %269 }
 0x2de   :  { %380 = vrot.lane.b32.xlu0 %v4701_v11, %s4494_s30 }
 0x2e0   :  { %v4705_v12 = vpop.permute.xlu1 %273 }
 0x2e1   :  { %v4707_v13 = vpop.permute.xlu0 %277 }
 0x2e2   :  { %478 = vrot.lane.b32.xlu0 %v4705_v12, %s4494_s30 }
 0x2e4   :  { %v4711_v14 = vpop.permute.xlu1 %275 }
 0x2e5   :  { %527 = vrot.lane.b32.xlu1 %v4711_v14, %s4494_s30  ;;  %v282_v15 = vpop.permute.xlu0 %281 }
 0x2e6   :  { %576 = vrot.lane.b32.xlu0 %v4707_v13, %s4494_s30  ;;  %v288_v16 = vsel %vm283_vm2, %v282_v15, 0 }
 0x2e7   :  { %3823 = vmatpush3.bf16.xpose.msra.mxu1 %v288_v16 }
 0x2e8   :  { %v4718_v17 = vpop.permute.xlu1 %279  ;;  %3834 = vmatprep.subr.bf16.mxu1 %v4489_v5 }
 0x2e9   :  { %625 = vrot.lane.b32.xlu1 %v4718_v17, %s4494_s30 }
 0x2ec   :  { %v332_v18 = vpop.permute.xlu1 %331 }
 0x2ed   :  { %v337_v19 = vsel %vm283_vm2, %v332_v18, 0 }
 0x2ee   :  { %3825 = vmatmul.mubr.msk.bf16.vlgmr.msra.gmra.mrb[0].mxu1 %vm283_vm2, %v4675_v9  ;;  %3829 = vmatpush3.bf16.xpose.msra.mxu0 %v337_v19 }
 0x2ef   :  { %3840 = vmatprep.subr.bf16.mxu0 %v4489_v5  ;;  %3836 = vmatprep.mubr.msk.bf16.mxu1 %vm4492_vm1, %v4489_v5 }
 0x2f5   :  { %3831 = vmatmul.mubr.msk.bf16.vlgmr.msra.gmra.mrb[4].mxu0 %vm283_vm2, %v4673_v8 }
 0x2f6   :  { %3842 = vmatprep.mubr.msk.bf16.mxu0 %vm4492_vm1, %v4489_v5 }
 0x34f   :  { %v430_v20 = vpop.permute.xlu1 %429 }
 0x350   :  { %v435_v21 = vsel %vm283_vm2, %v430_v20, 0  ;;  %v381_v22 = vpop.permute.xlu0 %380 }
 0x351   :  { %v386_v23 = vsel %vm283_vm2, %v381_v22, 0  ;;  %3841 = vmatpush3.bf16.xpose.msra.mxu0 %v435_v21 }
 0x352   :  { %3835 = vmatpush3.bf16.xpose.msra.mxu1 %v386_v23  ;;  %3852 = vmatprep.subr.bf16.mxu0 %v4489_v5 }
 0x353   :  { %3846 = vmatprep.subr.bf16.mxu1 %v4489_v5 }
 0x354   :  { %v479_v24 = vpop.permute.xlu0 %478 }
 0x355   :  { %v484_v27 = vsel %vm283_vm2, %v479_v24, 0 }
 0x357   :  { %v528_v25 = vpop.permute.xlu1 %527 }
 0x358   :  { %v533_v26 = vsel %vm283_vm2, %v528_v25, 0  ;;  %3843 = vmatmul.mubr.msk.bf16.vlgmr.msra.gmra.mrb[8].mxu0 %vm283_vm2, %v4697_v10  ;;  %v577_v29 = vpop.permute.xlu0 %576 }
 0x359   :  { %3837 = vmatmul.mubr.msk.bf16.vlgmr.msra.gmra.mrb[4].mxu1 %vm283_vm2, %v4701_v11  ;;  %3853 = vmatpush3.bf16.xpose.msra.mxu0 %v533_v26  ;;  %v582_v31 = vsel %vm283_vm2, %v577_v29, 0 }
 0x35a   :  { %3847 = vmatpush3.bf16.xpose.msra.mxu1 %v484_v27  ;;  %3854 = vmatprep.mubr.msk.bf16.mxu0 %vm4492_vm1, %v4489_v5 }
 0x35b   :  { %3848 = vmatprep.mubr.msk.bf16.mxu1 %vm4492_vm1, %v4489_v5  ;;  %3864 = vmatprep.subr.bf16.mxu0 %v4489_v5  ;;  %v626_v28 = vpop.permute.xlu1 %625 }
 0x35c   :  { %3858 = vmatprep.subr.bf16.mxu1 %v4489_v5  ;;  %v631_v30 = vsel %vm283_vm2, %v626_v28, 0 }
 0x360   :  { %3855 = vmatmul.mubr.msk.bf16.vlgmr.msra.gmra.mrb[12].mxu0 %vm283_vm2, %v4711_v14 }
 0x361   :  { %3849 = vmatmul.mubr.msk.bf16.vlgmr.msra.gmra.mrb[8].mxu1 %vm283_vm2, %v4705_v12  ;;  %3865 = vmatpush3.bf16.xpose.msra.mxu0 %v631_v30 }
 0x362   :  { %3859 = vmatpush3.bf16.xpose.msra.mxu1 %v582_v31  ;;  %3866 = vmatprep.mubr.msk.bf16.mxu0 %vm4492_vm1, %v4489_v5 }
 0x363   :  { %3860 = vmatprep.mubr.msk.bf16.mxu1 %vm4492_vm1, %v4489_v5  ;;  %3870 = vmatprep.subr.bf16.mxu1 %v4489_v5 }
 0x364   :  { %3876 = vmatprep.subr.bf16.mxu0 %v4489_v5 }
 0x368   :  { %3867 = vmatmul.mubr.msk.bf16.vlgmr.msra.gmra.mrb[16].mxu0 %vm283_vm2, %v4718_v17 }
 0x369   :  { %3861 = vmatmul.mubr.msk.bf16.vlgmr.msra.gmra.mrb[12].mxu1 %vm283_vm2, %v4707_v13  ;;  %3878 = vmatprep.mubr.msk.bf16.mxu0 %vm4492_vm1, %v4489_v5 }
 0x36a   :  { %3872 = vmatprep.mubr.msk.bf16.mxu1 %vm4492_vm1, %v4489_v5 }
 0x3c1   :  { %v4769_v32 = vpop.f32.mrb[0].mxu1 }
 0x3c2   :  { %v3826_v33 = vpop.f32.mrb[1].mxu1  ;;  %v675_v42 = vsel %vm674_vm3, %v4769_v32, -inf }
 0x3c3   :  { %v4771_v34 = vpop.f32.mrb[2].mxu1 }
 0x3c4   :  { %v3827_v35 = vpop.f32.mrb[3].mxu1  ;;  %v678_v36 = vsel %vm674_vm3, %v4771_v34, -inf }
 0x3c5   :  { %679 = vmax.xlane.f32.xlu1 %v678_v36 }
 0x3c8   :  { %v373_v37 = vpop.f32.mrb[4].mxu0 }
 0x3c9   :  { %v3832_v38 = vpop.f32.mrb[5].mxu0  ;;  %v681_v39 = vsel %vm674_vm3, %v373_v37, -inf }
 0x3ca   :  { %v376_v40 = vpop.f32.mrb[6].mxu0  ;;  %682 = vmax.xlane.f32.xlu0 %v681_v39 }
 0x3cb   :  { %v3833_v41 = vpop.f32.mrb[7].mxu0  ;;  %v684_v43 = vsel %vm674_vm3, %v376_v40, -inf }
 0x3ce   :  { %676 = vmax.xlane.f32.xlu0 %v675_v42 }
 0x3d2   :  { %685 = vmax.xlane.f32.xlu0 %v684_v43 }
 0x42b   :  { %v4779_v44 = vpop.f32.mrb[8].mxu0 }
 0x42c   :  { %v4781_v45 = vpop.f32.mrb[4].mxu1  ;;  %v3844_v46 = vpop.f32.mrb[9].mxu0  ;;  %v693_v47 = vsel %vm674_vm3, %v4779_v44, -inf }
 0x42d   :  { %v4785_v48 = vpop.f32.mrb[10].mxu0  ;;  %694 = vmax.xlane.f32.xlu0 %v693_v47  ;;  %v3838_v49 = vpop.f32.mrb[5].mxu1  ;;  %v687_v54 = vsel %vm674_vm3, %v4781_v45, -inf }
 0x42e   :  { %v4787_v50 = vpop.f32.mrb[6].mxu1  ;;  %v3845_v51 = vpop.f32.mrb[11].mxu0  ;;  %v696_v52 = vsel %vm674_vm3, %v4785_v48, -inf }
 0x42f   :  { %697 = vmax.xlane.f32.xlu1 %v696_v52  ;;  %v3839_v53 = vpop.f32.mrb[7].mxu1  ;;  %v690_v55 = vsel %vm674_vm3, %v4787_v50, -inf }
 0x431   :  { %688 = vmax.xlane.f32.xlu0 %v687_v54 }
 0x433   :  { %v4795_v56 = vpop.f32.mrb[12].mxu0  ;;  %691 = vmax.xlane.f32.xlu1 %v690_v55 }
 0x434   :  { %v4797_v57 = vpop.f32.mrb[8].mxu1  ;;  %v3856_v58 = vpop.f32.mrb[13].mxu0  ;;  %v705_v25 = vsel %vm674_vm3, %v4795_v56, -inf }
 0x435   :  { %v3850_v59 = vpop.f32.mrb[9].mxu1  ;;  %v4799_v60 = vpop.f32.mrb[14].mxu0  ;;  %v699_v28 = vsel %vm674_vm3, %v4797_v57, -inf }
 0x436   :  { %v4801_v61 = vpop.f32.mrb[10].mxu1  ;;  %v3857_v62 = vpop.f32.mrb[15].mxu0 }
 0x437   :  { %v3851_v63 = vpop.f32.mrb[11].mxu1  ;;  %v702_v30 = vsel %vm674_vm3, %v4801_v61, -inf }
 0x43b   :  { %v4803_v0 = vpop.f32.mrb[16].mxu0 }
 0x43c   :  { %v4805_v1 = vpop.f32.mrb[12].mxu1  ;;  %v3868_v2 = vpop.f32.mrb[17].mxu0  ;;  %v717_v31 = vsel %vm674_vm3, %v4803_v0, -inf }
 0x43d   :  { %v3862_v3 = vpop.f32.mrb[13].mxu1  ;;  %v4807_v4 = vpop.f32.mrb[18].mxu0  ;;  %v711_v33 = vsel %vm674_vm3, %v4805_v1, -inf }
 0x43e   :  { %v4809_v6 = vpop.f32.mrb[14].mxu1  ;;  %v3869_v7 = vpop.f32.mrb[19].mxu0 }
 0x43f   :  { %v3863_v15 = vpop.f32.mrb[15].mxu1  ;;  %v714_v35 = vsel %vm674_vm3, %v4809_v6, -inf }
 0x444   :  { %906 = vrot.lane.b32.xlu1 %v4673_v8, %s4485_s10  ;;  %v708_v8 = vsel %vm674_vm3, %v4799_v60, -inf }
 0x447   :  { %859 = vrot.lane.b32.xlu0 %v4675_v9, %s4485_s10 }
 0x452   :  { %v680_v22 = vpop.xlane.xlu1 %679 }
 0x453   :  { %v724_v26 = vsub.f32 %v4771_v34, %v680_v22 }
 0x455   :  { %v741_v29 = vmul.f32 1.442695, %v724_v26 }
 0x457   :  { %v683_v16 = vpop.xlane.xlu0 %682 }
 0x458   :  { %v725_v20 = vsub.f32 %v373_v37, %v683_v16 }
 0x45a   :  { %v743_v23 = vmul.f32 1.442695, %v725_v20 }
 0x45b   :  { %v677_v18 = vpop.xlane.xlu0 %676 }
 0x45c   :  { %v723_v24 = vsub.f32 %v4769_v32, %v677_v18  ;;  %4183 = vpow2.f32 %v743_v23  ;;  %v720_v32 = vsel %vm674_vm3, %v4807_v4, -inf }
 0x45e   :  { %v739_v9 = vmul.f32 1.442695, %v723_v24 }
 0x45f   :  { %v686_v19 = vpop.xlane.xlu0 %685 }
 0x460   :  { %v726_v21 = vsub.f32 %v376_v40, %v686_v19 }
 0x462   :  { %v745_v27 = vmul.f32 1.442695, %v726_v21 }
 0x464   :  { %4185 = vpow2.f32 %v745_v27 }
 0x465   :  { %4187 = vpow2.f32 %v739_v9 }
 0x466   :  { %706 = vmax.xlane.f32.xlu0 %v705_v25  ;;  %4189 = vpow2.f32 %v741_v29  ;;  %v4831_v34 = vpop.eup %4183 }
 0x467   :  { %v777_v37 = vsel %vm674_vm3, %v4831_v34, 0.0 }
 0x468   :  { %709 = vmax.xlane.f32.xlu1 %v708_v8 }
 0x46a   :  { %700 = vmax.xlane.f32.xlu0 %v699_v28 }
 0x46c   :  { %703 = vmax.xlane.f32.xlu1 %v702_v30 }
 0x46e   :  { %718 = vmax.xlane.f32.xlu0 %v717_v31  ;;  %v4835_v36 = vpop.eup %4185 }
 0x46f   :  { %v4839_v38 = vpop.eup %4187  ;;  %v780_v39 = vsel %vm674_vm3, %v4835_v36, 0.0 }
 0x470   :  { %721 = vmax.xlane.f32.xlu1 %v720_v32  ;;  %v4843_v40 = vpop.eup %4189  ;;  %v771_v41 = vsel %vm674_vm3, %v4839_v38, 0.0 }
 0x471   :  { %v774_v42 = vsel %vm674_vm3, %v4843_v40, 0.0 }
 0x472   :  { %712 = vmax.xlane.f32.xlu0 %v711_v33 }
 0x474   :  { %715 = vmax.xlane.f32.xlu1 %v714_v35 }
 0x476   :  { %778 = vadd.xlane.f32.xlu0 %v777_v37 }
 0x478   :  { %781 = vadd.xlane.f32.xlu1 %v780_v39 }
 0x47a   :  { %772 = vadd.xlane.f32.xlu0 %v771_v41 }
 0x47c   :  { %775 = vadd.xlane.f32.xlu1 %v774_v42 }
 0x48d   :  { %1000 = vrot.lane.b32.xlu1 %v4697_v10, %s4485_s10 }
 0x4ba   :  { %v695_v43 = vpop.xlane.xlu0 %694 }
 0x4bb   :  { %v729_v46 = vsub.f32 %v4779_v44, %v695_v43 }
 0x4bc   :  { %v698_v47 = vpop.xlane.xlu1 %697 }
 0x4bd   :  { %v751_v49 = vmul.f32 1.442695, %v729_v46  ;;  %v730_v51 = vsub.f32 %v4785_v48, %v698_v47 }
 0x4be   :  { %v689_v52 = vpop.xlane.xlu0 %688 }
 0x4bf   :  { %4191 = vpow2.f32 %v751_v49  ;;  %v753_v53 = vmul.f32 1.442695, %v730_v51  ;;  %v727_v54 = vsub.f32 %v4781_v45, %v689_v52 }
 0x4c0   :  { %v692_v55 = vpop.xlane.xlu1 %691 }
 0x4c1   :  { %4193 = vpow2.f32 %v753_v53  ;;  %v747_v58 = vmul.f32 1.442695, %v727_v54  ;;  %v728_v59 = vsub.f32 %v4787_v50, %v692_v55 }
 0x4c2   :  { %v860_v62 = vpop.permute.xlu0 %859 }
 0x4c3   :  { %4195 = vpow2.f32 %v747_v58  ;;  %v749_v10 = vmul.f32 1.442695, %v728_v59  ;;  %3871 = vmatpush3.bf16.msra.mxu1 %v860_v62 }
 0x4c4   :  { %v907_v63 = vpop.permute.xlu1 %906  ;;  %3882 = vmatprep.subr.bf16.mxu1 %v4489_v5 }
 0x4c5   :  { %4197 = vpow2.f32 %v749_v10  ;;  %3877 = vmatpush3.bf16.msra.mxu0 %v907_v63 }
 0x4c6   :  { %3888 = vmatprep.subr.bf16.mxu0 %v4489_v5 }
 0x4c9   :  { %v4857_v44 = vpop.eup %4191 }
 0x4ca   :  { %v789_v45 = vsel %vm674_vm3, %v4857_v44, 0.0 }
 0x4cb   :  { %v4861_v48 = vpop.eup %4193  ;;  %790 = vadd.xlane.f32.xlu0 %v789_v45 }
 0x4cc   :  { %v792_v50 = vsel %vm674_vm3, %v4861_v48, 0.0 }
 0x4cd   :  { %v4865_v2 = vpop.eup %4195  ;;  %793 = vadd.xlane.f32.xlu1 %v792_v50 }
 0x4ce   :  { %v783_v3 = vsel %vm674_vm3, %v4865_v2, 0.0 }
 0x4cf   :  { %v4869_v7 = vpop.eup %4197  ;;  %784 = vadd.xlane.f32.xlu0 %v783_v3 }
 0x4d0   :  { %v786_v15 = vsel %vm674_vm3, %v4869_v7, 0.0 }
 0x4d1   :  { %787 = vadd.xlane.f32.xlu1 %v786_v15 }
 0x4e5   :  { %953 = vrot.lane.b32.xlu0 %v4701_v11, %s4485_s10 }
 0x4f3   :  { %v707_v16 = vpop.xlane.xlu0 %706 }
 0x4f4   :  { %v733_v18 = vsub.f32 %v4795_v56, %v707_v16 }
 0x4f5   :  { %v710_v19 = vpop.xlane.xlu1 %709 }
 0x4f6   :  { %v759_v20 = vmul.f32 1.442695, %v733_v18  ;;  %v734_v21 = vsub.f32 %v4799_v60, %v710_v19 }
 0x4f7   :  { %v701_v22 = vpop.xlane.xlu0 %700 }
 0x4f8   :  { %4199 = vpow2.f32 %v759_v20  ;;  %v731_v23 = vsub.f32 %v4797_v57, %v701_v22  ;;  %v761_v24 = vmul.f32 1.442695, %v734_v21 }
 0x4f9   :  { %v704_v25 = vpop.xlane.xlu1 %703 }
 0x4fa   :  { %v755_v26 = vmul.f32 1.442695, %v731_v23  ;;  %v732_v27 = vsub.f32 %v4801_v61, %v704_v25 }
 0x4fb   :  { %v719_v8 = vpop.xlane.xlu0 %718 }
 0x4fc   :  { %4201 = vpow2.f32 %v755_v26  ;;  %v757_v9 = vmul.f32 1.442695, %v732_v27  ;;  %v737_v11 = vsub.f32 %v4803_v0, %v719_v8 }
 0x4fd   :  { %4203 = vpow2.f32 %v761_v24  ;;  %v722_v56 = vpop.xlane.xlu1 %721 }
 0x4fe   :  { %4205 = vpow2.f32 %v757_v9  ;;  %v767_v28 = vmul.f32 1.442695, %v737_v11  ;;  %v738_v60 = vsub.f32 %v4807_v4, %v722_v56 }
 0x4ff   :  { %v713_v29 = vpop.xlane.xlu0 %712 }
 0x500   :  { %4207 = vpow2.f32 %v767_v28  ;;  %v769_v30 = vmul.f32 1.442695, %v738_v60  ;;  %v735_v57 = vsub.f32 %v4805_v1, %v713_v29 }
 0x501   :  { %v716_v31 = vpop.xlane.xlu1 %715 }
 0x502   :  { %v4882_v32 = vpop.eup %4199  ;;  %v763_v61 = vmul.f32 1.442695, %v735_v57  ;;  %v736_v33 = vsub.f32 %v4809_v6, %v716_v31  ;;  %4209 = vpow2.f32 %v769_v30 }
 0x503   :  { %v779_v35 = vpop.xlane.xlu0 %778  ;;  %v801_v0 = vsel %vm674_vm3, %v4882_v32, 0.0 }
 0x504   :  { %4211 = vpow2.f32 %v763_v61  ;;  %v765_v37 = vmul.f32 1.442695, %v736_v33  ;;  %802 = vadd.xlane.f32.xlu0 %v801_v0 }
 0x505   :  { %4213 = vrcp.f32 %v779_v35  ;;  %v782_v4 = vpop.xlane.xlu1 %781 }
 0x506   :  { %v4887_v39 = vpop.eup %4201  ;;  %4215 = vpow2.f32 %v765_v37 }
 0x507   :  { %v4889_v1 = vpop.eup %4203  ;;  %4217 = vrcp.f32 %v782_v4  ;;  %v773_v41 = vpop.xlane.xlu0 %772  ;;  %v795_v6 = vsel %vm674_vm3, %v4887_v39, 0.0 }
 0x508   :  { %v4893_v42 = vpop.eup %4205  ;;  %4219 = vrcp.f32 %v773_v41  ;;  %796 = vadd.xlane.f32.xlu1 %v795_v6  ;;  %v804_v49 = vsel %vm674_vm3, %v4889_v1, 0.0 }
 0x509   :  { %v776_v43 = vpop.xlane.xlu1 %775  ;;  %v798_v46 = vsel %vm674_vm3, %v4893_v42, 0.0 }
 0x50a   :  { %v4897_v47 = vpop.eup %4207  ;;  %4221 = vrcp.f32 %v776_v43  ;;  %799 = vadd.xlane.f32.xlu0 %v798_v46 }
 0x50b   :  { %v813_v52 = vsel %vm674_vm3, %v4897_v47, 0.0 }
 0x50c   :  { %805 = vadd.xlane.f32.xlu1 %v804_v49  ;;  %v4901_v51 = vpop.eup %4209 }
 0x50d   :  { %v816_v50 = vsel %vm674_vm3, %v4901_v51, 0.0  ;;  %v1001_v19 = vpop.permute.xlu1 %1000 }
 0x50e   :  { %v4905_v53 = vpop.eup %4211  ;;  %814 = vadd.xlane.f32.xlu0 %v813_v52 }
 0x50f   :  { %v4214_v54 = vpop.eup %4213  ;;  %v807_v55 = vsel %vm674_vm3, %v4905_v53, 0.0 }
 0x510   :  { %v4909_v58 = vpop.eup %4215  ;;  %808 = vadd.xlane.f32.xlu1 %v807_v55  ;;  %v837_v63 = vmul.f32 %v4214_v54, %v4831_v34 }
 0x511   :  { %v4218_v59 = vpop.eup %4217  ;;  %v810_v62 = vsel %vm674_vm3, %v4909_v58, 0.0 }
 0x512   :  { %v4220_v10 = vpop.eup %4219  ;;  %v838_v45 = vmul.f32 %v4218_v59, %v4835_v36  ;;  %811 = vadd.xlane.f32.xlu0 %v810_v62  ;;  %v1236_v59 = vld [vmem:[%s5506_s5 + $0x4] sm:$0xf] }
 0x513   :  { %v835_v16 = vmul.f32 %v4220_v10, %v4839_v38 }
 0x514   :  { %v4222_v3 = vpop.eup %4221  ;;  %817 = vadd.xlane.f32.xlu1 %v816_v50  ;;  %v852_v15 = vpack.c.bf16 %v838_v45, %v837_v63 }
 0x515   :  { %v836_v18 = vmul.f32 %v4222_v3, %v4843_v40 }
 0x516   :  { %3879 = vmatmul.mubr.msk.bf16.vlgmr.msra.gmra.mrb[20].mxu0 %vm674_vm3, %v852_v15 }
 0x517   :  { %3889 = vmatpush3.bf16.msra.mxu0 %v1001_v19  ;;  %v851_v20 = vpack.c.bf16 %v836_v18, %v835_v16  ;;  %3890 = vmatprep.mubr.msk.bf16.mxu0 %vm4492_vm1, %v4489_v5 }
 0x518   :  { %3900 = vmatprep.subr.bf16.mxu0 %v4489_v5 }
 0x519   :  { %3873 = vmatmul.mubr.msk.bf16.vlgmr.msra.gmra.mrb[16].mxu1 %vm674_vm3, %v851_v20 }
 0x51a   :  { %3884 = vmatprep.mubr.msk.bf16.mxu1 %vm4492_vm1, %v4489_v5 }
 0x525   :  { %1094 = vrot.lane.b32.xlu1 %v4711_v14, %s4485_s10 }
 0x528   :  { %1047 = vrot.lane.b32.xlu0 %v4705_v12, %s4485_s10 }
 0x529   :  { %1141 = vrot.lane.b32.xlu1 %v4707_v13, %s4485_s10 }
 0x52d   :  { %1188 = vrot.lane.b32.xlu1 %v4718_v17, %s4485_s10 }
 0x558   :  { %v791_v34 = vpop.xlane.xlu0 %790 }
 0x559   :  { %4223 = vrcp.f32 %v791_v34 }
 0x55a   :  { %v794_v36 = vpop.xlane.xlu1 %793 }
 0x55b   :  { %4225 = vrcp.f32 %v794_v36 }
 0x55c   :  { %v785_v38 = vpop.xlane.xlu0 %784 }
 0x55d   :  { %4227 = vrcp.f32 %v785_v38 }
 0x55e   :  { %v788_v40 = vpop.xlane.xlu1 %787 }
 0x55f   :  { %4229 = vrcp.f32 %v788_v40 }
 0x560   :  { %v954_v21 = vpop.permute.xlu0 %953 }
 0x561   :  { %3883 = vmatpush3.bf16.msra.mxu1 %v954_v21 }
 0x562   :  { %3894 = vmatprep.subr.bf16.mxu1 %v4489_v5 }
 0x563   :  { %v4224_v14 = vpop.eup %4223 }
 0x564   :  { %v841_v22 = vmul.f32 %v4224_v14, %v4857_v44 }
 0x565   :  { %v4226_v12 = vpop.eup %4225 }
 0x566   :  { %v842_v13 = vmul.f32 %v4226_v12, %v4861_v48 }
 0x567   :  { %v4228_v23 = vpop.eup %4227 }
 0x568   :  { %v854_v17 = vpack.c.bf16 %v842_v13, %v841_v22  ;;  %v839_v25 = vmul.f32 %v4228_v23, %v4865_v2  ;;  %v1237_v13 = vld [vmem:[%s5506_s5 + $0x8] sm:$0xf] }
 0x569   :  { %v4230_v24 = vpop.eup %4229  ;;  %v1369_v23 = vsel %vm1249_vm4, %v1237_v13, 0 }
 0x56a   :  { %v840_v26 = vmul.f32 %v4230_v24, %v4869_v7  ;;  %3891 = vmatmul.mubr.msk.bf16.vlgmr.msra.gmra.mrb[24].mxu0 %vm674_vm3, %v854_v17  ;;  %v1238_v17 = vld [vmem:[%s5506_s5 + $0xc] sm:$0xf] }
 0x56b   :  { %3902 = vmatprep.mubr.msk.bf16.mxu0 %vm4492_vm1, %v4489_v5 }
 0x56c   :  { %v853_v27 = vpack.c.bf16 %v840_v26, %v839_v25 }
 0x56e   :  { %3885 = vmatmul.mubr.msk.bf16.vlgmr.msra.gmra.mrb[20].mxu1 %vm674_vm3, %v853_v27 }
 0x56f   :  { %3896 = vmatprep.mubr.msk.bf16.mxu1 %vm4492_vm1, %v4489_v5 }
 0x591   :  { %v803_v44 = vpop.xlane.xlu0 %802 }
 0x595   :  { %v797_v48 = vpop.xlane.xlu1 %796 }
 0x596   :  { %4231 = vrcp.f32 %v797_v48 }
 0x597   :  { %4233 = vrcp.f32 %v803_v44  ;;  %v800_v8 = vpop.xlane.xlu0 %799 }
 0x598   :  { %4235 = vrcp.f32 %v800_v8 }
 0x599   :  { %v806_v2 = vpop.xlane.xlu1 %805 }
 0x59a   :  { %4237 = vrcp.f32 %v806_v2 }
 0x59b   :  { %v815_v7 = vpop.xlane.xlu0 %814 }
 0x59d   :  { %v809_v9 = vpop.xlane.xlu1 %808 }
 0x59e   :  { %4239 = vrcp.f32 %v809_v9 }
 0x59f   :  { %4241 = vrcp.f32 %v815_v7  ;;  %v812_v11 = vpop.xlane.xlu0 %811 }
 0x5a0   :  { %v4232_v56 = vpop.eup %4231  ;;  %4243 = vrcp.f32 %v812_v11  ;;  %v1433_v11 = vsel %vm1249_vm4, %v1238_v17, 0 }
 0x5a1   :  { %v4234_v28 = vpop.eup %4233  ;;  %v818_v60 = vpop.xlane.xlu1 %817  ;;  %v843_v30 = vmul.f32 %v4232_v56, %v4887_v39 }
 0x5a2   :  { %v4236_v29 = vpop.eup %4235  ;;  %4245 = vrcp.f32 %v818_v60  ;;  %v845_v33 = vmul.f32 %v4234_v28, %v4882_v32 }
 0x5a3   :  { %v844_v57 = vmul.f32 %v4236_v29, %v4893_v42  ;;  %v1048_v31 = vpop.permute.xlu0 %1047 }
 0x5a4   :  { %v4238_v61 = vpop.eup %4237  ;;  %3895 = vmatpush3.bf16.msra.mxu1 %v1048_v31 }
 0x5a5   :  { %v846_v35 = vmul.f32 %v4238_v61, %v4889_v1  ;;  %v1095_v0 = vpop.permute.xlu1 %1094  ;;  %v855_v37 = vpack.c.bf16 %v844_v57, %v843_v30  ;;  %3906 = vmatprep.subr.bf16.mxu1 %v4489_v5 }
 0x5a6   :  { %3901 = vmatpush3.bf16.msra.mxu0 %v1095_v0  ;;  %v3613_v0 = vld [vmem:[%s5507_s6] ss:$0 sm:$0xff] }
 0x5a7   :  { %3897 = vmatmul.mubr.msk.bf16.vlgmr.msra.gmra.mrb[24].mxu1 %vm674_vm3, %v855_v37  ;;  %v856_v4 = vpack.c.bf16 %v846_v35, %v845_v33  ;;  %3912 = vmatprep.subr.bf16.mxu0 %v4489_v5 }
 0x5a8   :  { %v4240_v39 = vpop.eup %4239  ;;  %3908 = vmatprep.mubr.msk.bf16.mxu1 %vm4492_vm1, %v4489_v5 }
 0x5a9   :  { %v4242_v41 = vpop.eup %4241  ;;  %v1142_v6 = vpop.permute.xlu1 %1141  ;;  %3903 = vmatmul.mubr.msk.bf16.vlgmr.msra.gmra.mrb[28].mxu0 %vm674_vm3, %v856_v4  ;;  %v847_v1 = vmul.f32 %v4240_v39, %v4905_v53  ;;  %v1251_v53 = vsel %vm1249_vm4, %v1236_v59, 0 }
 0x5aa   :  { %v4244_v32 = vpop.eup %4243  ;;  %3907 = vmatpush3.bf16.msra.mxu1 %v1142_v6  ;;  %3914 = vmatprep.mubr.msk.bf16.mxu0 %vm4492_vm1, %v4489_v5  ;;  %v849_v46 = vmul.f32 %v4242_v41, %v4897_v47  ;;  %v1235_v47 = vld [vmem:[%s5506_s5] sm:$0xf] }
 0x5ab   :  { %v848_v42 = vmul.f32 %v4244_v32, %v4909_v58  ;;  %4134 = vmatprep.subr.msk.bf16.mxu1 %vm1249_vm4, %v1236_v59  ;;  %v1309_v22 = vsel %vm1249_vm4, %v1235_v47, 0 }
 0x5ac   :  { %v4246_v43 = vpop.eup %4245 }
 0x5ad   :  { %v850_v49 = vmul.f32 %v4246_v43, %v4901_v51  ;;  %v1189_v52 = vpop.permute.xlu1 %1188  ;;  %v857_v54 = vpack.c.bf16 %v848_v42, %v847_v1  ;;  %v4359_v1 = vld [vmem:[%s5501_s0] sm:$0xff] }
 0x5ae   :  { %3913 = vmatpush3.bf16.msra.mxu0 %v1189_v52 }
 0x5af   :  { %3909 = vmatmul.mubr.msk.bf16.vlgmr.msra.gmra.mrb[28].mxu1 %vm674_vm3, %v857_v54  ;;  %v858_v55 = vpack.c.bf16 %v850_v49, %v849_v46  ;;  %v4360_v46 = vld [vmem:[%s5501_s0 + $0x10] sm:$0xff]  ;;  %v4361_v54 = vld [vmem:[%s5501_s0 + $0x8] sm:$0xff] }
 0x5b0   :  { %3919 = vmatpush3.bf16.msra.mxu1 %v1251_v53 }
 0x5b1   :  { %3915 = vmatmul.mubr.msk.bf16.vlgmr.msra.gmra.mrb[32].mxu0 %vm674_vm3, %v858_v55  ;;  %4135 = vmatprep.subr.msk.bf16.mxu1 %vm1249_vm4, %v1235_v47  ;;  %v4362_v47 = vld [vmem:[%s5501_s0 + $0x18] sm:$0xff] }
 0x5e9   :  { %v946_v51 = vpop.f32.mrb[20].mxu0 }
 0x5ea   :  { %v3880_v58 = vpop.f32.mrb[21].mxu0 }
 0x5eb   :  { %v949_v62 = vpop.f32.mrb[22].mxu0 }
 0x5ec   :  { %v1240_v10 = vpack.c.bf16 %v949_v62, %v946_v51  ;;  %v3881_v63 = vpop.f32.mrb[23].mxu0  ;;  %v899_v45 = vpop.f32.mrb[16].mxu1 }
 0x5ed   :  { %v3874_v50 = vpop.f32.mrb[17].mxu1 }
 0x5ee   :  { %v902_v3 = vpop.f32.mrb[18].mxu1 }
 0x5ef   :  { %v1239_v15 = vpack.c.bf16 %v902_v3, %v899_v45  ;;  %v3875_v16 = vpop.f32.mrb[19].mxu1 }
 0x63d   :  { %v1040_v18 = vpop.f32.mrb[24].mxu0 }
 0x63e   :  { %v3892_v19 = vpop.f32.mrb[25].mxu0 }
 0x63f   :  { %v1043_v20 = vpop.f32.mrb[26].mxu0 }
 0x640   :  { %v1242_v34 = vpack.c.bf16 %v1043_v20, %v1040_v18  ;;  %v3893_v36 = vpop.f32.mrb[27].mxu0 }
 0x641   :  { %v993_v38 = vpop.f32.mrb[20].mxu1 }
 0x642   :  { %v3886_v40 = vpop.f32.mrb[21].mxu1 }
 0x643   :  { %v996_v21 = vpop.f32.mrb[22].mxu1 }
 0x644   :  { %v1241_v14 = vpack.c.bf16 %v996_v21, %v993_v38  ;;  %v3887_v12 = vpop.f32.mrb[23].mxu1 }
 0x646   :  { %3920 = vmatprep.mubr.msk.bf16.mxu1 %vm283_vm2, %v1241_v14 }
 0x647   :  { %3921 = vmatmul.mubr.msk.bf16.vlgmr.msra.gmra.mrb[32].mxu1 %vm283_vm2, %v1242_v34 }
 0x648   :  { %3926 = vmatprep.mubr.msk.bf16.mxu1 %vm283_vm2, %v1239_v15  ;;  %3925 = vmatpush3.bf16.msra.mxu1 %v1309_v22 }
 0x649   :  { %4136 = vmatprep.subr.msk.bf16.mxu1 %vm1249_vm4, %v1237_v13 }
 0x653   :  { %3927 = vmatmul.mubr.msk.bf16.vlgmr.msra.gmra.mrb[32].mxu1 %vm283_vm2, %v1240_v10 }
 0x654   :  { %3931 = vmatpush3.bf16.msra.mxu1 %v1369_v23 }
 0x655   :  { %4137 = vmatprep.subr.msk.bf16.mxu1 %vm1249_vm4, %v1238_v17  ;;  %v4161_v17 = vld [vmem:[#allocation2] sm:$0xff]  }
 0x656   :  { %3942 = vmatprep.subr.bf16.mxu0 %v4161_v17 }
 0x657   :  { %3943 = vmatpush3.bf16.msra.mxu0 %v4161_v17 }
 0x67a   :  { %v1087_v24 = vpop.f32.mrb[24].mxu1 }
 0x67b   :  { %v3898_v25 = vpop.f32.mrb[25].mxu1 }
 0x67c   :  { %v1090_v26 = vpop.f32.mrb[26].mxu1  ;;  %v1134_v27 = vpop.f32.mrb[28].mxu0 }
 0x67d   :  { %v1360_v44 = vpack.c.bf16 %v1090_v26, %v1087_v24  ;;  %v3899_v48 = vpop.f32.mrb[27].mxu1  ;;  %v3904_v8 = vpop.f32.mrb[29].mxu0  ;;  %v4162_v24 = vld [vmem:[#allocation2 + $0x8] sm:$0xff]  }
 0x67e   :  { %v1137_v2 = vpop.f32.mrb[30].mxu0  ;;  %3944 = vmatprep.subr.bf16.mxu0 %v4162_v24 }
 0x67f   :  { %v1361_v7 = vpack.c.bf16 %v1137_v2, %v1134_v27  ;;  %v3905_v9 = vpop.f32.mrb[31].mxu0  ;;  %3932 = vmatprep.mubr.msk.bf16.mxu1 %vm283_vm2, %v1360_v44  ;;  %3945 = vmatpush3.bf16.msra.mxu0 %v4162_v24 }
 0x681   :  { %3933 = vmatmul.mubr.msk.bf16.vlgmr.msra.gmra.mrb[32].mxu1 %vm283_vm2, %v1361_v7 }
 0x682   :  { %v1181_v56 = vpop.f32.mrb[28].mxu1  ;;  %3937 = vmatpush3.bf16.msra.mxu1 %v1433_v11 }
 0x683   :  { %v3910_v28 = vpop.f32.mrb[29].mxu1  ;;  %3970 = vmatprep.subr.bf16.mxu1 %v4489_v5 }
 0x684   :  { %v1184_v60 = vpop.f32.mrb[30].mxu1  ;;  %v1228_v29 = vpop.f32.mrb[32].mxu0 }
 0x685   :  { %v1424_v30 = vpack.c.bf16 %v1184_v60, %v1181_v56  ;;  %v3911_v57 = vpop.f32.mrb[31].mxu1  ;;  %v3916_v31 = vpop.f32.mrb[33].mxu0 }
 0x686   :  { %v1231_v61 = vpop.f32.mrb[34].mxu0 }
 0x687   :  { %v1425_v33 = vpack.c.bf16 %v1231_v61, %v1228_v29  ;;  %v3917_v35 = vpop.f32.mrb[35].mxu0  ;;  %3938 = vmatprep.mubr.msk.bf16.mxu1 %vm283_vm2, %v1424_v30  ;;  %v3614_v29 = vld [vmem:[%s5508_s7] ss:$0 sm:$0xff] }
 0x688   :  { %v3615_v35 = vld [vmem:[%s5509_s8] ss:$0 sm:$0xff] }
 0x68d   :  { %3939 = vmatmul.mubr.msk.bf16.vlgmr.msra.gmra.mrb[32].mxu1 %vm283_vm2, %v1425_v33 }
 0x68e   :  { %3972 = vmatprep.mubr.msk.bf16.mxu1 %vm4492_vm1, %v4489_v5 }
 0x760   :  { %v3940_v37 = vpop.f32.mrb[32].mxu1 }
 0x761   :  { %v1469_v4 = vpop.f32.mrb[33].mxu1  ;;  %v1497_v39 = vadd.f32 %v3940_v37, %v3613_v0 }
 0x762   :  { %v1495_v41 = vadd.f32 %v3613_v0, %v1469_v4  ;;  %v3941_v6 = vpop.f32.mrb[34].mxu1 }
 0x763   :  { %v1472_v32 = vpop.f32.mrb[35].mxu1  ;;  %v5005_v49 = vadd.f32 %v4360_v46, %v1497_v39  ;;  %v1498_v52 = vadd.f32 %v3941_v6, %v3613_v0 }
 0x764   :  { %v5000_v42 = vadd.f32 %v4359_v1, %v1495_v41  ;;  %v1496_v43 = vadd.f32 %v3613_v0, %v1472_v32 }
 0x765   :  { %v5019_v51 = vadd.f32 %v4362_v47, %v1498_v52  ;;  %v1511_v58 = vsel %vm111_vm0, %v5005_v49, 0.0  ;;  %v4165_v47 = vld [vmem:[%s5512_s11 + $0x10] sm:$0xff]  }
 0x766   :  { %v5010_v55 = vadd.f32 %v4361_v54, %v1496_v43  ;;  %v1505_v59 = vsel %vm111_vm0, %v5000_v42, 0.0 }
 0x767   :  { %1506 = vadd.xlane.f32.xlu0 %v1505_v59  ;;  %v1514_v62 = vsel %vm111_vm0, %v5019_v51, 0.0  ;;  %v4163_v59 = vld [vmem:[%s5512_s11] sm:$0xff]  }
 0x768   :  { %v1508_v53 = vsel %vm111_vm0, %v5010_v55, 0.0  ;;  %3950 = vmatprep.subr.bf16.mxu0 %v4163_v59 }
 0x769   :  { %1509 = vadd.xlane.f32.xlu1 %v1508_v53  ;;  %v4164_v53 = vld [vmem:[%s5512_s11 + $0x8] sm:$0xff]  }
 0x76b   :  { %1512 = vadd.xlane.f32.xlu0 %v1511_v58  ;;  %v4166_v58 = vld [vmem:[%s5512_s11 + $0x18] sm:$0xff]  }
 0x76f   :  { %1515 = vadd.xlane.f32.xlu0 %v1514_v62  ;;  %v3616_v62 = vld [vmem:[#allocation5] ss:$0 sm:$0xff] }
 0x7f4   :  { %v1507_v10 = vpop.xlane.xlu0 %1506 }
 0x7f5   :  { %v1517_v63 = vmul.f32 0.03125, %v1507_v10 }
 0x7f6   :  { %v1510_v45 = vpop.xlane.xlu1 %1509 }
 0x7f7   :  { %v1521_v50 = vsub.f32 %v5000_v42, %v1517_v63  ;;  %v1518_v3 = vmul.f32 0.03125, %v1510_v45 }
 0x7f8   :  { %v1513_v15 = vpop.xlane.xlu0 %1512 }
 0x7f9   :  { %v1522_v16 = vsub.f32 %v5010_v55, %v1518_v3  ;;  %v1519_v18 = vmul.f32 0.03125, %v1513_v15  ;;  %v1525_v19 = vmul.f32 %v1521_v50, %v1521_v50 }
 0x7fb   :  { %v1523_v20 = vsub.f32 %v5005_v49, %v1519_v18  ;;  %v1529_v34 = vsel %vm111_vm0, %v1525_v19, 0.0  ;;  %v1526_v36 = vmul.f32 %v1522_v16, %v1522_v16 }
 0x7fc   :  { %1530 = vadd.xlane.f32.xlu0 %v1529_v34  ;;  %v1516_v38 = vpop.xlane.xlu0 %1515 }
 0x7fd   :  { %v1520_v40 = vmul.f32 0.03125, %v1516_v38  ;;  %v1532_v21 = vsel %vm111_vm0, %v1526_v36, 0.0  ;;  %v1527_v14 = vmul.f32 %v1523_v20, %v1523_v20 }
 0x7fe   :  { %1533 = vadd.xlane.f32.xlu1 %v1532_v21 }
 0x7ff   :  { %v1524_v12 = vsub.f32 %v5019_v51, %v1520_v40  ;;  %v1535_v22 = vsel %vm111_vm0, %v1527_v14, 0.0 }
 0x800   :  { %1536 = vadd.xlane.f32.xlu0 %v1535_v22 }
 0x801   :  { %v1528_v13 = vmul.f32 %v1524_v12, %v1524_v12 }
 0x803   :  { %v1538_v23 = vsel %vm111_vm0, %v1528_v13, 0.0 }
 0x804   :  { %1539 = vadd.xlane.f32.xlu1 %v1538_v23 }
 0x889   :  { %v1531_v25 = vpop.xlane.xlu0 %1530 }
 0x88a   :  { %v1541_v26 = vmul.f32 0.03125, %v1531_v25 }
 0x88b   :  { %v1534_v27 = vpop.xlane.xlu1 %1533 }
 0x88c   :  { %v1545_v44 = vadd.f32 1e-06, %v1541_v26  ;;  %v1542_v48 = vmul.f32 0.03125, %v1534_v27 }
 0x88d   :  { %v1537_v8 = vpop.xlane.xlu0 %1536 }
 0x88e   :  { %4247 = vrsqrt.f32 %v1545_v44  ;;  %v1546_v2 = vadd.f32 1e-06, %v1542_v48  ;;  %v1543_v7 = vmul.f32 0.03125, %v1537_v8 }
 0x890   :  { %4249 = vrsqrt.f32 %v1546_v2  ;;  %v1547_v9 = vadd.f32 1e-06, %v1543_v7 }
 0x891   :  { %v1540_v11 = vpop.xlane.xlu1 %1539 }
 0x892   :  { %4251 = vrsqrt.f32 %v1547_v9  ;;  %v1544_v56 = vmul.f32 0.03125, %v1540_v11 }
 0x894   :  { %v1548_v28 = vadd.f32 1e-06, %v1544_v56 }
 0x896   :  { %4253 = vrsqrt.f32 %v1548_v28 }
 0x898   :  { %v4248_v60 = vpop.eup %4247 }
 0x899   :  { %v1553_v30 = vmul.f32 %v4248_v60, %v1521_v50 }
 0x89a   :  { %v4250_v57 = vpop.eup %4249 }
 0x89b   :  { %v1554_v31 = vmul.f32 %v4250_v57, %v1522_v16  ;;  %v1563_v61 = vmul.f32 %v3614_v29, %v1553_v30 }
 0x89c   :  { %v4252_v33 = vpop.eup %4251 }
 0x89d   :  { %v1555_v0 = vmul.f32 %v4252_v33, %v1523_v20  ;;  %v1564_v37 = vmul.f32 %v3614_v29, %v1554_v31  ;;  %v1573_v4 = vadd.f32 %v3615_v35, %v1563_v61 }
 0x89f   :  { %v1574_v39 = vadd.f32 %v3615_v35, %v1564_v37  ;;  %v1565_v6 = vmul.f32 %v3614_v29, %v1555_v0 }
 0x8a0   :  { %v4254_v41 = vpop.eup %4253 }
 0x8a1   :  { %v1556_v32 = vmul.f32 %v4254_v41, %v1524_v12  ;;  %v1577_v1 = vpack.c.bf16 %v1574_v39, %v1573_v4  ;;  %v1575_v46 = vadd.f32 %v3615_v35, %v1565_v6  ;;  %v3621_v41 = vld [vmem:[#allocation7] ss:$0 sm:$0xff] }
 0x8a3   :  { %v1566_v43 = vmul.f32 %v3614_v29, %v1556_v32  ;;  %3946 = vmatprep.mubr.msk.bf16.mxu0 %vm111_vm0, %v1577_v1 }
 0x8a5   :  { %v1576_v52 = vadd.f32 %v3615_v35, %v1566_v43 }
 0x8a7   :  { %v1578_v54 = vpack.c.bf16 %v1576_v52, %v1575_v46 }
 0x8a9   :  { %3947 = vmatmul.mubr.msk.bf16.vlgmr.msra.gmra.mrb[36].mxu0 %vm111_vm0, %v1578_v54 }
 0x8aa   :  { %3951 = vmatpush3.bf16.msra.mxu0 %v4163_v59 }
 0x8ab   :  { %3952 = vmatprep.subr.bf16.mxu0 %v4164_v53 }
 0x8ae   :  { %3953 = vmatpush3.bf16.msra.mxu0 %v4164_v53 }
 0x8af   :  { %3954 = vmatprep.subr.bf16.mxu0 %v4165_v47 }
 0x8b2   :  { %3955 = vmatpush3.bf16.msra.mxu0 %v4165_v47 }
 0x8b3   :  { %3956 = vmatprep.subr.bf16.mxu0 %v4166_v58 }
 0x8b6   :  { %3957 = vmatpush3.bf16.msra.mxu0 %v4166_v58 }
 0x97c   :  { %v3948_v10 = vpop.f32.mrb[36].mxu0 }
 0x97d   :  { %v1651_v63 = vadd.f32 %v3948_v10, %v3616_v62  ;;  %v1642_v45 = vpop.f32.mrb[37].mxu0 }
 0x97e   :  { %v1643_v50 = vadd.f32 %v3616_v62, %v1642_v45  ;;  %v3949_v3 = vpop.f32.mrb[38].mxu0 }
 0x97f   :  { %v1659_v15 = vmul.f32 %v1651_v63, %v1651_v63  ;;  %v1654_v16 = vadd.f32 %v3949_v3, %v3616_v62  ;;  %v1645_v18 = vpop.f32.mrb[39].mxu0 }
 0x980   :  { %v1657_v19 = vmul.f32 %v1643_v50, %v1643_v50  ;;  %v1646_v20 = vadd.f32 %v3616_v62, %v1645_v18 }
 0x981   :  { %v1663_v34 = vmul.f32 %v1659_v15, %v1651_v63  ;;  %v1660_v36 = vmul.f32 %v1654_v16, %v1654_v16 }
 0x982   :  { %v1661_v38 = vmul.f32 %v1657_v19, %v1643_v50  ;;  %v1658_v40 = vmul.f32 %v1646_v20, %v1646_v20 }
 0x983   :  { %v1667_v21 = vmul.f32 0.044715, %v1663_v34  ;;  %v1664_v14 = vmul.f32 %v1660_v36, %v1654_v16 }
 0x984   :  { %v1665_v12 = vmul.f32 0.044715, %v1661_v38  ;;  %v1662_v22 = vmul.f32 %v1658_v40, %v1646_v20 }
 0x985   :  { %v1671_v13 = vadd.f32 %v1667_v21, %v1651_v63  ;;  %v1668_v23 = vmul.f32 0.044715, %v1664_v14 }
 0x986   :  { %v1669_v17 = vadd.f32 %v1665_v12, %v1643_v50  ;;  %v1666_v24 = vmul.f32 0.044715, %v1662_v22 }
 0x987   :  { %v1675_v25 = vmul.f32 0.7978846, %v1671_v13  ;;  %v1672_v26 = vadd.f32 %v1668_v23, %v1654_v16 }
 0x988   :  { %v1673_v27 = vmul.f32 0.7978846, %v1669_v17  ;;  %v1670_v44 = vadd.f32 %v1666_v24, %v1646_v20  ;;  %v4167_v17 = vld [vmem:[%s5504_s3 + $0x10] sm:$0xff]   ;;  %v4168_v24 = vld [vmem:[%s5504_s3 + $0x18] sm:$0xff]  }
 0x989   :  { %4255 = vtanh.f32 %v1675_v25  ;;  %v1676_v48 = vmul.f32 0.7978846, %v1672_v26  ;;  %3962 = vmatprep.subr.bf16.mxu0 %v4167_v17 }
 0x98a   :  { %4257 = vtanh.f32 %v1673_v27  ;;  %v1674_v8 = vmul.f32 0.7978846, %v1670_v44 }
 0x98b   :  { %4259 = vtanh.f32 %v1676_v48 }
 0x98c   :  { %4261 = vtanh.f32 %v1674_v8 }
 0x993   :  { %v4256_v2 = vpop.eup %4255 }
 0x994   :  { %v4258_v7 = vpop.eup %4257  ;;  %v1683_v9 = vadd.f32 1.0, %v4256_v2 }
 0x995   :  { %v4260_v11 = vpop.eup %4259  ;;  %v1681_v56 = vadd.f32 1.0, %v4258_v7 }
 0x996   :  { %v4262_v28 = vpop.eup %4261  ;;  %v1687_v60 = vmul.f32 0.5, %v1683_v9  ;;  %v1684_v29 = vadd.f32 1.0, %v4260_v11 }
 0x997   :  { %v1685_v30 = vmul.f32 0.5, %v1681_v56  ;;  %v1682_v57 = vadd.f32 1.0, %v4262_v28 }
 0x998   :  { %v1688_v31 = vmul.f32 0.5, %v1684_v29  ;;  %v1691_v33 = vmul.f32 %v1687_v60, %v1651_v63  ;;  %v3630_v29 = vld [vmem:[%s5502_s1 + $0x1] ss:$0 sm:$0xff] }
 0x999   :  { %v1686_v61 = vmul.f32 0.5, %v1682_v57  ;;  %v1689_v0 = vmul.f32 %v1685_v30, %v1643_v50 }
 0x99a   :  { %v1692_v35 = vmul.f32 %v1688_v31, %v1654_v16 }
 0x99b   :  { %v1690_v37 = vmul.f32 %v1686_v61, %v1646_v20 }
 0x99c   :  { %v1694_v4 = vpack.c.bf16 %v1692_v35, %v1691_v33  ;;  %v3631_v35 = vld [vmem:[%s5503_s2 + $0x1] ss:$0 sm:$0xff] }
 0x99d   :  { %v1693_v39 = vpack.c.bf16 %v1690_v37, %v1689_v0 }
 0x99f   :  { %3958 = vmatprep.mubr.msk.bf16.mxu0 %vm1734_vm5, %v1693_v39 }
 0x9a0   :  { %3959 = vmatmul.mubr.msk.bf16.vlgmr.msra.gmra.mrb[40].mxu0 %vm1734_vm5, %v1694_v4 }
 0x9a1   :  { %3963 = vmatpush3.bf16.msra.mxu0 %v4167_v17 }
 0x9a2   :  { %3964 = vmatprep.subr.bf16.mxu0 %v4168_v24 }
 0x9a5   :  { %3965 = vmatpush3.bf16.msra.mxu0 %v4168_v24 }
 0x9a6   :  { %3976 = vmatprep.subr.bf16.mxu0 %v4489_v5 }
 0xa73   :  { %v3960_v6 = vpop.f32.mrb[40].mxu0 }
 0xa74   :  { %v1775_v32 = vpop.f32.mrb[41].mxu0  ;;  %v1784_v1 = vadd.f32 %v3960_v6, %v3621_v41 }
 0xa75   :  { %v1776_v43 = vadd.f32 %v3621_v41, %v1775_v32  ;;  %v3961_v46 = vpop.f32.mrb[42].mxu0 }
 0xa76   :  { %v1778_v52 = vpop.f32.mrb[43].mxu0  ;;  %v1787_v59 = vadd.f32 %v3961_v46, %v3621_v41  ;;  %v5059_v47 = vadd.f32 %v1784_v1, %v5005_v49 }
 0xa77   :  { %v5056_v54 = vadd.f32 %v1776_v43, %v5000_v42  ;;  %v1779_v53 = vadd.f32 %v3621_v41, %v1778_v52 }
 0xa78   :  { %v5067_v10 = vadd.f32 %v1787_v59, %v5019_v51  ;;  %v1804_v42 = vsel %vm111_vm0, %v5059_v47, 0.0 }
 0xa79   :  { %v5062_v58 = vadd.f32 %v1779_v53, %v5010_v55  ;;  %v1798_v62 = vsel %vm111_vm0, %v5056_v54, 0.0 }
 0xa7a   :  { %1799 = vadd.xlane.f32.xlu0 %v1798_v62  ;;  %v1807_v49 = vsel %vm111_vm0, %v5067_v10, 0.0  ;;  %v3637_v62 = vld [vmem:[%s5505_s4 + $0x1] ss:$0 sm:$0xff] }
 0xa7b   :  { %v1801_v63 = vsel %vm111_vm0, %v5062_v58, 0.0 }
 0xa7c   :  { %1802 = vadd.xlane.f32.xlu1 %v1801_v63 }
 0xa7e   :  { %1805 = vadd.xlane.f32.xlu0 %v1804_v42 }
 0xa80   :  { %1808 = vadd.xlane.f32.xlu1 %v1807_v49 }
 0xb07   :  { %v1800_v55 = vpop.xlane.xlu0 %1799 }
 0xb08   :  { %v1810_v45 = vmul.f32 0.03125, %v1800_v55 }
 0xb09   :  { %v1803_v50 = vpop.xlane.xlu1 %1802 }
 0xb0a   :  { %v1814_v3 = vsub.f32 %v5056_v54, %v1810_v45  ;;  %v1811_v15 = vmul.f32 0.03125, %v1803_v50 }
 0xb0b   :  { %v1806_v51 = vpop.xlane.xlu0 %1805 }
 0xb0c   :  { %v1815_v16 = vsub.f32 %v5062_v58, %v1811_v15  ;;  %v1812_v18 = vmul.f32 0.03125, %v1806_v51  ;;  %v1818_v19 = vmul.f32 %v1814_v3, %v1814_v3 }
 0xb0d   :  { %v1809_v20 = vpop.xlane.xlu1 %1808 }
 0xb0e   :  { %v1816_v34 = vsub.f32 %v5059_v47, %v1812_v18  ;;  %v1813_v36 = vmul.f32 0.03125, %v1809_v20  ;;  %v1822_v38 = vsel %vm111_vm0, %v1818_v19, 0.0  ;;  %v1819_v40 = vmul.f32 %v1815_v16, %v1815_v16 }
 0xb0f   :  { %1823 = vadd.xlane.f32.xlu0 %v1822_v38 }
 0xb10   :  { %v1817_v21 = vsub.f32 %v5067_v10, %v1813_v36  ;;  %v1825_v14 = vsel %vm111_vm0, %v1819_v40, 0.0  ;;  %v1820_v12 = vmul.f32 %v1816_v34, %v1816_v34 }
 0xb11   :  { %1826 = vadd.xlane.f32.xlu1 %v1825_v14 }
 0xb12   :  { %v1828_v22 = vsel %vm111_vm0, %v1820_v12, 0.0  ;;  %v1821_v13 = vmul.f32 %v1817_v21, %v1817_v21 }
 0xb13   :  { %1829 = vadd.xlane.f32.xlu0 %v1828_v22 }
 0xb14   :  { %v1831_v23 = vsel %vm111_vm0, %v1821_v13, 0.0 }
 0xb15   :  { %1832 = vadd.xlane.f32.xlu1 %v1831_v23 }
 0xb9c   :  { %v1824_v25 = vpop.xlane.xlu0 %1823 }
 0xb9d   :  { %v1834_v26 = vmul.f32 0.03125, %v1824_v25 }
 0xb9e   :  { %v1827_v27 = vpop.xlane.xlu1 %1826 }
 0xb9f   :  { %v1838_v44 = vadd.f32 1e-06, %v1834_v26  ;;  %v1835_v48 = vmul.f32 0.03125, %v1827_v27 }
 0xba0   :  { %v1830_v8 = vpop.xlane.xlu0 %1829 }
 0xba1   :  { %4263 = vrsqrt.f32 %v1838_v44  ;;  %v1839_v2 = vadd.f32 1e-06, %v1835_v48  ;;  %v1836_v7 = vmul.f32 0.03125, %v1830_v8 }
 0xba2   :  { %v1833_v9 = vpop.xlane.xlu1 %1832 }
 0xba3   :  { %4265 = vrsqrt.f32 %v1839_v2  ;;  %v1840_v11 = vadd.f32 1e-06, %v1836_v7  ;;  %v1837_v56 = vmul.f32 0.03125, %v1833_v9 }
 0xba5   :  { %4267 = vrsqrt.f32 %v1840_v11  ;;  %v1841_v28 = vadd.f32 1e-06, %v1837_v56 }
 0xba7   :  { %4269 = vrsqrt.f32 %v1841_v28 }
 0xbab   :  { %v4264_v60 = vpop.eup %4263 }
 0xbac   :  { %v1846_v30 = vmul.f32 %v4264_v60, %v1814_v3 }
 0xbad   :  { %v4266_v57 = vpop.eup %4265 }
 0xbae   :  { %v1847_v31 = vmul.f32 %v4266_v57, %v1815_v16  ;;  %v1856_v61 = vmul.f32 %v3630_v29, %v1846_v30 }
 0xbaf   :  { %v4268_v33 = vpop.eup %4267 }
 0xbb0   :  { %v1848_v0 = vmul.f32 %v4268_v33, %v1816_v34  ;;  %v1857_v37 = vmul.f32 %v3630_v29, %v1847_v31  ;;  %v1866_v6 = vadd.f32 %v3631_v35, %v1856_v61 }
 0xbb1   :  { %v4270_v4 = vpop.eup %4269 }
 0xbb2   :  { %v1858_v39 = vmul.f32 %v3630_v29, %v1848_v0  ;;  %v1849_v41 = vmul.f32 %v4270_v4, %v1817_v21  ;;  %v1867_v32 = vadd.f32 %v3631_v35, %v1857_v37 }
 0xbb4   :  { %v1859_v1 = vmul.f32 %v3630_v29, %v1849_v41  ;;  %v1870_v43 = vpack.c.bf16 %v1867_v32, %v1866_v6  ;;  %v1868_v46 = vadd.f32 %v3631_v35, %v1858_v39 }
 0xbb6   :  { %3966 = vmatprep.mubr.msk.bf16.mxu0 %vm111_vm0, %v1870_v43  ;;  %v1869_v52 = vadd.f32 %v3631_v35, %v1859_v1 }
 0xbb8   :  { %v1871_v59 = vpack.c.bf16 %v1869_v52, %v1868_v46 }
 0xbba   :  { %3967 = vmatmul.mubr.msk.bf16.vlgmr.msra.gmra.mrb[44].mxu0 %vm111_vm0, %v1871_v59 }
 0xbbb   :  { %3978 = vmatprep.mubr.msk.bf16.mxu0 %vm4492_vm1, %v4489_v5 }
 0xc8d   :  { %v3968_v53 = vpop.f32.mrb[44].mxu0 }
 0xc8e   :  { %v1937_v63 = vpop.f32.mrb[45].mxu0  ;;  %v1946_v49 = vadd.f32 %v3968_v53, %v3637_v62 }
 0xc8f   :  { %v3969_v42 = vpop.f32.mrb[46].mxu0  ;;  %v1938_v50 = vadd.f32 %v3637_v62, %v1937_v63 }
 0xc90   :  { %v1949_v55 = vadd.f32 %v3969_v42, %v3637_v62  ;;  %v1940_v45 = vpop.f32.mrb[47].mxu0 }
 0xc91   :  { %v1941_v3 = vadd.f32 %v3637_v62, %v1940_v45 }
 0xc92   :  { %v5103_v15 = vpack.c.bf16 %v1949_v55, %v1946_v49 }
 0xc93   :  { %v5105_v51 = vpack.c.bf16 %v1941_v3, %v1938_v50 }
 0xc94   :  { %1958 = vrot.lane.b32.xlu1 %v5103_v15, %s4490_s9 }
 0xc95   :  { %1956 = vrot.lane.b32.xlu0 %v5105_v51, %s4490_s9 }
 0xc98   :  { %1960 = vrot.lane.b32.xlu1 %v5105_v51, %s4491_s18 }
 0xc99   :  { %1964 = vrot.lane.b32.xlu0 %v5105_v51, %s4493_s19 }
 0xc9c   :  { %1962 = vrot.lane.b32.xlu1 %v5103_v15, %s4491_s18 }
 0xc9d   :  { %1968 = vrot.lane.b32.xlu0 %v5105_v51, %s4494_s30 }
 0xca0   :  { %1966 = vrot.lane.b32.xlu1 %v5103_v15, %s4493_s19 }
 0xca4   :  { %2017 = vrot.lane.b32.xlu1 %v5103_v15, %s4494_s30 }
 0xd06   :  { %v5123_v16 = vpop.permute.xlu1 %1958 }
 0xd07   :  { %2115 = vrot.lane.b32.xlu1 %v5123_v16, %s4494_s30  ;;  %v5127_v18 = vpop.permute.xlu0 %1956 }
 0xd08   :  { %2066 = vrot.lane.b32.xlu0 %v5127_v18, %s4494_s30 }
 0xd0a   :  { %v5131_v19 = vpop.permute.xlu1 %1960 }
 0xd0b   :  { %v5133_v20 = vpop.permute.xlu0 %1964 }
 0xd0c   :  { %2164 = vrot.lane.b32.xlu0 %v5131_v19, %s4494_s30 }
 0xd0e   :  { %v5137_v34 = vpop.permute.xlu1 %1962 }
 0xd0f   :  { %2213 = vrot.lane.b32.xlu1 %v5137_v34, %s4494_s30  ;;  %v1969_v36 = vpop.permute.xlu0 %1968 }
 0xd10   :  { %v1974_v38 = vsel %vm283_vm2, %v1969_v36, 0  ;;  %2262 = vrot.lane.b32.xlu0 %v5133_v20, %s4494_s30 }
 0xd11   :  { %3971 = vmatpush3.bf16.xpose.msra.mxu1 %v1974_v38 }
 0xd12   :  { %v5144_v40 = vpop.permute.xlu1 %1966  ;;  %3982 = vmatprep.subr.bf16.mxu1 %v4489_v5 }
 0xd13   :  { %2311 = vrot.lane.b32.xlu1 %v5144_v40, %s4494_s30 }
 0xd16   :  { %v2018_v21 = vpop.permute.xlu1 %2017 }
 0xd17   :  { %v2023_v14 = vsel %vm283_vm2, %v2018_v21, 0 }
 0xd18   :  { %3973 = vmatmul.mubr.msk.bf16.vlgmr.msra.gmra.mrb[36].mxu1 %vm283_vm2, %v5105_v51  ;;  %3977 = vmatpush3.bf16.xpose.msra.mxu0 %v2023_v14 }
 0xd19   :  { %3988 = vmatprep.subr.bf16.mxu0 %v4489_v5  ;;  %3984 = vmatprep.mubr.msk.bf16.mxu1 %vm4492_vm1, %v4489_v5 }
 0xd1f   :  { %3979 = vmatmul.mubr.msk.bf16.vlgmr.msra.gmra.mrb[48].mxu0 %vm283_vm2, %v5103_v15 }
 0xd20   :  { %3990 = vmatprep.mubr.msk.bf16.mxu0 %vm4492_vm1, %v4489_v5 }
 0xd79   :  { %v2116_v12 = vpop.permute.xlu1 %2115 }
 0xd7a   :  { %v2121_v22 = vsel %vm283_vm2, %v2116_v12, 0  ;;  %v2067_v13 = vpop.permute.xlu0 %2066 }
 0xd7b   :  { %v2072_v23 = vsel %vm283_vm2, %v2067_v13, 0  ;;  %3989 = vmatpush3.bf16.xpose.msra.mxu0 %v2121_v22 }
 0xd7c   :  { %3983 = vmatpush3.bf16.xpose.msra.mxu1 %v2072_v23  ;;  %4000 = vmatprep.subr.bf16.mxu0 %v4489_v5 }
 0xd7d   :  { %3994 = vmatprep.subr.bf16.mxu1 %v4489_v5 }
 0xd7e   :  { %v2165_v17 = vpop.permute.xlu0 %2164 }
 0xd7f   :  { %v2170_v26 = vsel %vm283_vm2, %v2165_v17, 0 }
 0xd81   :  { %v2214_v24 = vpop.permute.xlu1 %2213 }
 0xd82   :  { %v2219_v25 = vsel %vm283_vm2, %v2214_v24, 0  ;;  %3991 = vmatmul.mubr.msk.bf16.vlgmr.msra.gmra.mrb[52].mxu0 %vm283_vm2, %v5123_v16  ;;  %v2263_v44 = vpop.permute.xlu0 %2262 }
 0xd83   :  { %3985 = vmatmul.mubr.msk.bf16.vlgmr.msra.gmra.mrb[40].mxu1 %vm283_vm2, %v5127_v18  ;;  %4001 = vmatpush3.bf16.xpose.msra.mxu0 %v2219_v25  ;;  %v2268_v8 = vsel %vm283_vm2, %v2263_v44, 0 }
 0xd84   :  { %3995 = vmatpush3.bf16.xpose.msra.mxu1 %v2170_v26  ;;  %4002 = vmatprep.mubr.msk.bf16.mxu0 %vm4492_vm1, %v4489_v5 }
 0xd85   :  { %3996 = vmatprep.mubr.msk.bf16.mxu1 %vm4492_vm1, %v4489_v5  ;;  %4012 = vmatprep.subr.bf16.mxu0 %v4489_v5  ;;  %v2312_v27 = vpop.permute.xlu1 %2311 }
 0xd86   :  { %4006 = vmatprep.subr.bf16.mxu1 %v4489_v5  ;;  %v2317_v48 = vsel %vm283_vm2, %v2312_v27, 0 }
 0xd8a   :  { %4003 = vmatmul.mubr.msk.bf16.vlgmr.msra.gmra.mrb[56].mxu0 %vm283_vm2, %v5137_v34 }
 0xd8b   :  { %3997 = vmatmul.mubr.msk.bf16.vlgmr.msra.gmra.mrb[44].mxu1 %vm283_vm2, %v5131_v19  ;;  %4013 = vmatpush3.bf16.xpose.msra.mxu0 %v2317_v48 }
 0xd8c   :  { %4007 = vmatpush3.bf16.xpose.msra.mxu1 %v2268_v8  ;;  %4014 = vmatprep.mubr.msk.bf16.mxu0 %vm4492_vm1, %v4489_v5 }
 0xd8d   :  { %4008 = vmatprep.mubr.msk.bf16.mxu1 %vm4492_vm1, %v4489_v5  ;;  %4018 = vmatprep.subr.bf16.mxu1 %v4489_v5 }
 0xd8e   :  { %4024 = vmatprep.subr.bf16.mxu0 %v4489_v5 }
 0xd92   :  { %4015 = vmatmul.mubr.msk.bf16.vlgmr.msra.gmra.mrb[60].mxu0 %vm283_vm2, %v5144_v40 }
 0xd93   :  { %4009 = vmatmul.mubr.msk.bf16.vlgmr.msra.gmra.mrb[48].mxu1 %vm283_vm2, %v5133_v20  ;;  %4026 = vmatprep.mubr.msk.bf16.mxu0 %vm4492_vm1, %v4489_v5 }
 0xd94   :  { %4020 = vmatprep.mubr.msk.bf16.mxu1 %vm4492_vm1, %v4489_v5 }
 0xdeb   :  { %v5195_v2 = vpop.f32.mrb[36].mxu1 }
 0xdec   :  { %v3974_v7 = vpop.f32.mrb[37].mxu1  ;;  %v2360_v31 = vsel %vm674_vm3, %v5195_v2, -inf }
 0xded   :  { %v5197_v9 = vpop.f32.mrb[38].mxu1 }
 0xdee   :  { %v3975_v11 = vpop.f32.mrb[39].mxu1  ;;  %v2363_v56 = vsel %vm674_vm3, %v5197_v9, -inf }
 0xdef   :  { %2364 = vmax.xlane.f32.xlu1 %v2363_v56 }
 0xdf2   :  { %v2059_v28 = vpop.f32.mrb[48].mxu0 }
 0xdf3   :  { %v3980_v60 = vpop.f32.mrb[49].mxu0  ;;  %v2366_v29 = vsel %vm674_vm3, %v2059_v28, -inf }
 0xdf4   :  { %v2062_v30 = vpop.f32.mrb[50].mxu0  ;;  %2367 = vmax.xlane.f32.xlu0 %v2366_v29 }
 0xdf5   :  { %v3981_v57 = vpop.f32.mrb[51].mxu0  ;;  %v2369_v61 = vsel %vm674_vm3, %v2062_v30, -inf }
 0xdf8   :  { %2361 = vmax.xlane.f32.xlu0 %v2360_v31 }
 0xdfc   :  { %2370 = vmax.xlane.f32.xlu0 %v2369_v61 }
 0xe55   :  { %v5205_v33 = vpop.f32.mrb[52].mxu0 }
 0xe56   :  { %v5207_v35 = vpop.f32.mrb[40].mxu1  ;;  %v3992_v0 = vpop.f32.mrb[53].mxu0  ;;  %v2378_v37 = vsel %vm674_vm3, %v5205_v33, -inf }
 0xe57   :  { %v5211_v4 = vpop.f32.mrb[54].mxu0  ;;  %2379 = vmax.xlane.f32.xlu0 %v2378_v37  ;;  %v3986_v39 = vpop.f32.mrb[41].mxu1  ;;  %v2372_v43 = vsel %vm674_vm3, %v5207_v35, -inf }
 0xe58   :  { %v5213_v41 = vpop.f32.mrb[42].mxu1  ;;  %v3993_v6 = vpop.f32.mrb[55].mxu0  ;;  %v2381_v32 = vsel %vm674_vm3, %v5211_v4, -inf }
 0xe59   :  { %2382 = vmax.xlane.f32.xlu1 %v2381_v32  ;;  %v3987_v1 = vpop.f32.mrb[43].mxu1  ;;  %v2375_v46 = vsel %vm674_vm3, %v5213_v41, -inf }
 0xe5b   :  { %2373 = vmax.xlane.f32.xlu0 %v2372_v43 }
 0xe5d   :  { %v5221_v52 = vpop.f32.mrb[56].mxu0  ;;  %2376 = vmax.xlane.f32.xlu1 %v2375_v46 }
 0xe5e   :  { %v5223_v59 = vpop.f32.mrb[44].mxu1  ;;  %v4004_v53 = vpop.f32.mrb[57].mxu0  ;;  %v2390_v44 = vsel %vm674_vm3, %v5221_v52, -inf }
 0xe5f   :  { %v3998_v62 = vpop.f32.mrb[45].mxu1  ;;  %v5225_v63 = vpop.f32.mrb[58].mxu0  ;;  %v2384_v7 = vsel %vm674_vm3, %v5223_v59, -inf }
 0xe60   :  { %v5227_v42 = vpop.f32.mrb[46].mxu1  ;;  %v4005_v49 = vpop.f32.mrb[59].mxu0 }
 0xe61   :  { %v3999_v55 = vpop.f32.mrb[47].mxu1 }
 0xe65   :  { %v5229_v45 = vpop.f32.mrb[60].mxu0 }
 0xe66   :  { %v5231_v50 = vpop.f32.mrb[48].mxu1  ;;  %v4016_v3 = vpop.f32.mrb[61].mxu0 }
 0xe67   :  { %v4010_v36 = vpop.f32.mrb[49].mxu1  ;;  %v5233_v38 = vpop.f32.mrb[62].mxu0 }
 0xe68   :  { %v5235_v21 = vpop.f32.mrb[50].mxu1  ;;  %v4017_v14 = vpop.f32.mrb[63].mxu0  ;;  %v2405_v56 = vsel %vm674_vm3, %v5233_v38, -inf }
 0xe69   :  { %v4011_v12 = vpop.f32.mrb[51].mxu1  ;;  %v2399_v29 = vsel %vm674_vm3, %v5235_v21, -inf }
 0xe6e   :  { %2591 = vrot.lane.b32.xlu1 %v5103_v15, %s4485_s10  ;;  %v2393_v15 = vsel %vm674_vm3, %v5225_v63, -inf }
 0xe71   :  { %2544 = vrot.lane.b32.xlu0 %v5105_v51, %s4485_s10 }
 0xe7c   :  { %v2365_v25 = vpop.xlane.xlu1 %2364 }
 0xe7d   :  { %v2409_v48 = vsub.f32 %v5197_v9, %v2365_v25  ;;  %v2402_v9 = vsel %vm674_vm3, %v5229_v45, -inf }
 0xe7f   :  { %v2426_v11 = vmul.f32 1.442695, %v2409_v48 }
 0xe81   :  { %v2368_v22 = vpop.xlane.xlu0 %2367 }
 0xe82   :  { %v2410_v17 = vsub.f32 %v2059_v28, %v2368_v22  ;;  %v2396_v28 = vsel %vm674_vm3, %v5231_v50, -inf }
 0xe84   :  { %v2428_v26 = vmul.f32 1.442695, %v2410_v17 }
 0xe85   :  { %v2362_v13 = vpop.xlane.xlu0 %2361 }
 0xe86   :  { %v2408_v27 = vsub.f32 %v5195_v2, %v2362_v13  ;;  %4271 = vpow2.f32 %v2428_v26  ;;  %v2387_v2 = vsel %vm674_vm3, %v5227_v42, -inf }
 0xe88   :  { %v2424_v51 = vmul.f32 1.442695, %v2408_v27 }
 0xe89   :  { %v2371_v23 = vpop.xlane.xlu0 %2370 }
 0xe8a   :  { %v2411_v24 = vsub.f32 %v2062_v30, %v2371_v23 }
 0xe8c   :  { %v2430_v8 = vmul.f32 1.442695, %v2411_v24 }
 0xe8e   :  { %4273 = vpow2.f32 %v2430_v8 }
 0xe8f   :  { %4275 = vpow2.f32 %v2424_v51 }
 0xe90   :  { %2391 = vmax.xlane.f32.xlu0 %v2390_v44  ;;  %4277 = vpow2.f32 %v2426_v11  ;;  %v5257_v60 = vpop.eup %4271 }
 0xe91   :  { %v2462_v57 = vsel %vm674_vm3, %v5257_v60, 0.0 }
 0xe92   :  { %2394 = vmax.xlane.f32.xlu1 %v2393_v15 }
 0xe94   :  { %2385 = vmax.xlane.f32.xlu0 %v2384_v7 }
 0xe96   :  { %2388 = vmax.xlane.f32.xlu1 %v2387_v2 }
 0xe98   :  { %2403 = vmax.xlane.f32.xlu0 %v2402_v9  ;;  %v5261_v30 = vpop.eup %4273 }
 0xe99   :  { %v5265_v31 = vpop.eup %4275  ;;  %v2465_v61 = vsel %vm674_vm3, %v5261_v30, 0.0 }
 0xe9a   :  { %2406 = vmax.xlane.f32.xlu1 %v2405_v56  ;;  %v5269_v0 = vpop.eup %4277  ;;  %v2456_v37 = vsel %vm674_vm3, %v5265_v31, 0.0 }
 0xe9b   :  { %v2459_v39 = vsel %vm674_vm3, %v5269_v0, 0.0 }
 0xe9c   :  { %2397 = vmax.xlane.f32.xlu0 %v2396_v28 }
 0xe9e   :  { %2400 = vmax.xlane.f32.xlu1 %v2399_v29 }
 0xea0   :  { %2463 = vadd.xlane.f32.xlu0 %v2462_v57 }
 0xea2   :  { %2466 = vadd.xlane.f32.xlu1 %v2465_v61 }
 0xea4   :  { %2457 = vadd.xlane.f32.xlu0 %v2456_v37 }
 0xea6   :  { %2460 = vadd.xlane.f32.xlu1 %v2459_v39 }
 0xeb7   :  { %2685 = vrot.lane.b32.xlu1 %v5123_v16, %s4485_s10 }
 0xee4   :  { %v2380_v6 = vpop.xlane.xlu0 %2379 }
 0xee5   :  { %v2414_v32 = vsub.f32 %v5205_v33, %v2380_v6 }
 0xee6   :  { %v2383_v1 = vpop.xlane.xlu1 %2382 }
 0xee7   :  { %v2436_v43 = vmul.f32 1.442695, %v2414_v32  ;;  %v2415_v46 = vsub.f32 %v5211_v4, %v2383_v1 }
 0xee8   :  { %v2374_v53 = vpop.xlane.xlu0 %2373 }
 0xee9   :  { %4279 = vpow2.f32 %v2436_v43  ;;  %v2438_v62 = vmul.f32 1.442695, %v2415_v46  ;;  %v2412_v49 = vsub.f32 %v5207_v35, %v2374_v53 }
 0xeea   :  { %v2377_v55 = vpop.xlane.xlu1 %2376 }
 0xeeb   :  { %4281 = vpow2.f32 %v2438_v62  ;;  %v2432_v3 = vmul.f32 1.442695, %v2412_v49  ;;  %v2413_v36 = vsub.f32 %v5213_v41, %v2377_v55 }
 0xeec   :  { %v2545_v14 = vpop.permute.xlu0 %2544 }
 0xeed   :  { %4283 = vpow2.f32 %v2432_v3  ;;  %v2434_v16 = vmul.f32 1.442695, %v2413_v36  ;;  %4019 = vmatpush3.bf16.msra.mxu1 %v2545_v14 }
 0xeee   :  { %v2592_v12 = vpop.permute.xlu1 %2591  ;;  %4030 = vmatprep.subr.bf16.mxu1 %v4489_v5 }
 0xeef   :  { %4285 = vpow2.f32 %v2434_v16  ;;  %4025 = vmatpush3.bf16.msra.mxu0 %v2592_v12 }
 0xef0   :  { %4036 = vmatprep.subr.bf16.mxu0 %v4489_v5 }
 0xef3   :  { %v5283_v33 = vpop.eup %4279 }
 0xef4   :  { %v2474_v35 = vsel %vm674_vm3, %v5283_v33, 0.0 }
 0xef5   :  { %v5287_v4 = vpop.eup %4281  ;;  %2475 = vadd.xlane.f32.xlu0 %v2474_v35 }
 0xef6   :  { %v2477_v41 = vsel %vm674_vm3, %v5287_v4, 0.0 }
 0xef7   :  { %v5291_v22 = vpop.eup %4283  ;;  %2478 = vadd.xlane.f32.xlu1 %v2477_v41 }
 0xef8   :  { %v2468_v13 = vsel %vm674_vm3, %v5291_v22, 0.0 }
 0xef9   :  { %v5295_v23 = vpop.eup %4285  ;;  %2469 = vadd.xlane.f32.xlu0 %v2468_v13 }
 0xefa   :  { %v2471_v17 = vsel %vm674_vm3, %v5295_v23, 0.0 }
 0xefb   :  { %2472 = vadd.xlane.f32.xlu1 %v2471_v17 }
 0xf0f   :  { %2638 = vrot.lane.b32.xlu0 %v5127_v18, %s4485_s10 }
 0xf1d   :  { %v2392_v24 = vpop.xlane.xlu0 %2391 }
 0xf1e   :  { %v2418_v25 = vsub.f32 %v5221_v52, %v2392_v24 }
 0xf1f   :  { %v2395_v26 = vpop.xlane.xlu1 %2394 }
 0xf20   :  { %v2444_v27 = vmul.f32 1.442695, %v2418_v25  ;;  %v2419_v44 = vsub.f32 %v5225_v63, %v2395_v26 }
 0xf21   :  { %v2386_v48 = vpop.xlane.xlu0 %2385 }
 0xf22   :  { %4287 = vpow2.f32 %v2444_v27  ;;  %v2416_v8 = vsub.f32 %v5223_v59, %v2386_v48  ;;  %v2446_v15 = vmul.f32 1.442695, %v2419_v44 }
 0xf23   :  { %v2389_v51 = vpop.xlane.xlu1 %2388 }
 0xf24   :  { %v2440_v7 = vmul.f32 1.442695, %v2416_v8  ;;  %v2417_v11 = vsub.f32 %v5227_v42, %v2389_v51 }
 0xf25   :  { %v2404_v2 = vpop.xlane.xlu0 %2403 }
 0xf26   :  { %4289 = vpow2.f32 %v2440_v7  ;;  %v2442_v9 = vmul.f32 1.442695, %v2417_v11  ;;  %v2422_v18 = vsub.f32 %v5229_v45, %v2404_v2 }
 0xf27   :  { %4291 = vpow2.f32 %v2446_v15  ;;  %v2407_v52 = vpop.xlane.xlu1 %2406 }
 0xf28   :  { %4293 = vpow2.f32 %v2442_v9  ;;  %v2452_v56 = vmul.f32 1.442695, %v2422_v18  ;;  %v2423_v63 = vsub.f32 %v5233_v38, %v2407_v52 }
 0xf29   :  { %v2398_v28 = vpop.xlane.xlu0 %2397 }
 0xf2a   :  { %4295 = vpow2.f32 %v2452_v56  ;;  %v2454_v29 = vmul.f32 1.442695, %v2423_v63  ;;  %v2420_v59 = vsub.f32 %v5231_v50, %v2398_v28 }
 0xf2b   :  { %v2401_v57 = vpop.xlane.xlu1 %2400 }
 0xf2c   :  { %v5308_v61 = vpop.eup %4287  ;;  %v2448_v42 = vmul.f32 1.442695, %v2420_v59  ;;  %v2421_v37 = vsub.f32 %v5235_v21, %v2401_v57  ;;  %4297 = vpow2.f32 %v2454_v29 }
 0xf2d   :  { %v2464_v39 = vpop.xlane.xlu0 %2463  ;;  %v2486_v45 = vsel %vm674_vm3, %v5308_v61, 0.0 }
 0xf2e   :  { %4299 = vpow2.f32 %v2448_v42  ;;  %v2450_v6 = vmul.f32 1.442695, %v2421_v37  ;;  %2487 = vadd.xlane.f32.xlu0 %v2486_v45 }
 0xf2f   :  { %4301 = vrcp.f32 %v2464_v39  ;;  %v2467_v38 = vpop.xlane.xlu1 %2466 }
 0xf30   :  { %v5313_v32 = vpop.eup %4289  ;;  %4303 = vpow2.f32 %v2450_v6 }
 0xf31   :  { %v5315_v50 = vpop.eup %4291  ;;  %4305 = vrcp.f32 %v2467_v38  ;;  %v2458_v1 = vpop.xlane.xlu0 %2457  ;;  %v2480_v21 = vsel %vm674_vm3, %v5313_v32, 0.0 }
 0xf32   :  { %v5319_v43 = vpop.eup %4293  ;;  %4307 = vrcp.f32 %v2458_v1  ;;  %2481 = vadd.xlane.f32.xlu1 %v2480_v21  ;;  %v2489_v49 = vsel %vm674_vm3, %v5315_v50, 0.0 }
 0xf33   :  { %v2461_v46 = vpop.xlane.xlu1 %2460  ;;  %v2483_v53 = vsel %vm674_vm3, %v5319_v43, 0.0 }
 0xf34   :  { %v5323_v62 = vpop.eup %4295  ;;  %4309 = vrcp.f32 %v2461_v46  ;;  %2484 = vadd.xlane.f32.xlu0 %v2483_v53 }
 0xf35   :  { %v2498_v3 = vsel %vm674_vm3, %v5323_v62, 0.0 }
 0xf36   :  { %2490 = vadd.xlane.f32.xlu1 %v2489_v49  ;;  %v5327_v55 = vpop.eup %4297 }
 0xf37   :  { %v2501_v25 = vsel %vm674_vm3, %v5327_v55, 0.0  ;;  %v2686_v8 = vpop.permute.xlu1 %2685 }
 0xf38   :  { %v5331_v36 = vpop.eup %4299  ;;  %2499 = vadd.xlane.f32.xlu0 %v2498_v3 }
 0xf39   :  { %v4302_v14 = vpop.eup %4301  ;;  %v2492_v16 = vsel %vm674_vm3, %v5331_v36, 0.0 }
 0xf3a   :  { %v5335_v12 = vpop.eup %4303  ;;  %2493 = vadd.xlane.f32.xlu1 %v2492_v16  ;;  %v2522_v17 = vmul.f32 %v4302_v14, %v5257_v60 }
 0xf3b   :  { %v4306_v35 = vpop.eup %4305  ;;  %v2495_v41 = vsel %vm674_vm3, %v5335_v12, 0.0 }
 0xf3c   :  { %v4308_v13 = vpop.eup %4307  ;;  %v2523_v24 = vmul.f32 %v4306_v35, %v5261_v30  ;;  %2496 = vadd.xlane.f32.xlu0 %v2495_v41 }
 0xf3d   :  { %v2520_v44 = vmul.f32 %v4308_v13, %v5265_v31 }
 0xf3e   :  { %v4310_v26 = vpop.eup %4309  ;;  %2502 = vadd.xlane.f32.xlu1 %v2501_v25  ;;  %v2537_v27 = vpack.c.bf16 %v2523_v24, %v2522_v17 }
 0xf3f   :  { %v2521_v48 = vmul.f32 %v4310_v26, %v5269_v0 }
 0xf40   :  { %4027 = vmatmul.mubr.msk.bf16.vlgmr.msra.gmra.mrb[64].mxu0 %vm674_vm3, %v2537_v27 }
 0xf41   :  { %4037 = vmatpush3.bf16.msra.mxu0 %v2686_v8  ;;  %v2536_v15 = vpack.c.bf16 %v2521_v48, %v2520_v44  ;;  %4038 = vmatprep.mubr.msk.bf16.mxu0 %vm4492_vm1, %v4489_v5 }
 0xf42   :  { %4048 = vmatprep.subr.bf16.mxu0 %v4489_v5 }
 0xf43   :  { %4021 = vmatmul.mubr.msk.bf16.vlgmr.msra.gmra.mrb[52].mxu1 %vm674_vm3, %v2536_v15 }
 0xf44   :  { %4032 = vmatprep.mubr.msk.bf16.mxu1 %vm4492_vm1, %v4489_v5 }
 0xf4f   :  { %2779 = vrot.lane.b32.xlu1 %v5137_v34, %s4485_s10 }
 0xf52   :  { %2732 = vrot.lane.b32.xlu0 %v5131_v19, %s4485_s10 }
 0xf53   :  { %2826 = vrot.lane.b32.xlu1 %v5133_v20, %s4485_s10 }
 0xf57   :  { %2873 = vrot.lane.b32.xlu1 %v5144_v40, %s4485_s10 }
 0xf82   :  { %v2476_v60 = vpop.xlane.xlu0 %2475 }
 0xf83   :  { %4311 = vrcp.f32 %v2476_v60 }
 0xf84   :  { %v2479_v30 = vpop.xlane.xlu1 %2478 }
 0xf85   :  { %4313 = vrcp.f32 %v2479_v30 }
 0xf86   :  { %v2470_v31 = vpop.xlane.xlu0 %2469 }
 0xf87   :  { %4315 = vrcp.f32 %v2470_v31 }
 0xf88   :  { %v2473_v0 = vpop.xlane.xlu1 %2472 }
 0xf89   :  { %4317 = vrcp.f32 %v2473_v0 }
 0xf8a   :  { %v2639_v51 = vpop.permute.xlu0 %2638 }
 0xf8b   :  { %4031 = vmatpush3.bf16.msra.mxu1 %v2639_v51 }
 0xf8c   :  { %4042 = vmatprep.subr.bf16.mxu1 %v4489_v5 }
 0xf8d   :  { %v4312_v34 = vpop.eup %4311 }
 0xf8e   :  { %v2526_v7 = vmul.f32 %v4312_v34, %v5283_v33 }
 0xf8f   :  { %v4314_v19 = vpop.eup %4313 }
 0xf90   :  { %v2527_v20 = vmul.f32 %v4314_v19, %v5287_v4 }
 0xf91   :  { %v4316_v11 = vpop.eup %4315 }
 0xf92   :  { %v2539_v40 = vpack.c.bf16 %v2527_v20, %v2526_v7  ;;  %v2524_v9 = vmul.f32 %v4316_v11, %v5291_v22 }
 0xf93   :  { %v4318_v2 = vpop.eup %4317 }
 0xf94   :  { %v2525_v18 = vmul.f32 %v4318_v2, %v5295_v23  ;;  %4039 = vmatmul.mubr.msk.bf16.vlgmr.msra.gmra.mrb[68].mxu0 %vm674_vm3, %v2539_v40  ;;  %v3660_v2 = vld [vmem:[%s5506_s5 + $0x18] sm:$0xf] }
 0xf95   :  { %4050 = vmatprep.mubr.msk.bf16.mxu0 %vm4492_vm1, %v4489_v5 }
 0xf96   :  { %v2538_v52 = vpack.c.bf16 %v2525_v18, %v2524_v9  ;;  %v3054_v9 = vsel %vm1249_vm4, %v3660_v2, 0  ;;  %v3661_v18 = vld [vmem:[%s5506_s5 + $0x1c] sm:$0xf] }
 0xf98   :  { %4033 = vmatmul.mubr.msk.bf16.vlgmr.msra.gmra.mrb[56].mxu1 %vm674_vm3, %v2538_v52 }
 0xf99   :  { %4044 = vmatprep.mubr.msk.bf16.mxu1 %vm4492_vm1, %v4489_v5 }
 0xfbb   :  { %v2488_v33 = vpop.xlane.xlu0 %2487 }
 0xfbf   :  { %v2482_v4 = vpop.xlane.xlu1 %2481 }
 0xfc0   :  { %4319 = vrcp.f32 %v2482_v4 }
 0xfc1   :  { %4321 = vrcp.f32 %v2488_v33  ;;  %v2485_v56 = vpop.xlane.xlu0 %2484 }
 0xfc2   :  { %4323 = vrcp.f32 %v2485_v56 }
 0xfc3   :  { %v2491_v22 = vpop.xlane.xlu1 %2490 }
 0xfc4   :  { %4325 = vrcp.f32 %v2491_v22 }
 0xfc5   :  { %v2500_v23 = vpop.xlane.xlu0 %2499 }
 0xfc7   :  { %v2494_v63 = vpop.xlane.xlu1 %2493 }
 0xfc8   :  { %4327 = vrcp.f32 %v2494_v63 }
 0xfc9   :  { %4329 = vrcp.f32 %v2500_v23  ;;  %v2497_v28 = vpop.xlane.xlu0 %2496 }
 0xfca   :  { %v4320_v29 = vpop.eup %4319  ;;  %4331 = vrcp.f32 %v2497_v28 }
 0xfcb   :  { %v4322_v59 = vpop.eup %4321  ;;  %v2503_v57 = vpop.xlane.xlu1 %2502  ;;  %v2528_v37 = vmul.f32 %v4320_v29, %v5313_v32 }
 0xfcc   :  { %v4324_v42 = vpop.eup %4323  ;;  %4333 = vrcp.f32 %v2503_v57  ;;  %v2530_v38 = vmul.f32 %v4322_v59, %v5308_v61  ;;  %v3118_v57 = vsel %vm1249_vm4, %v3661_v18, 0 }
 0xfcd   :  { %v2529_v39 = vmul.f32 %v4324_v42, %v5319_v43  ;;  %v2733_v45 = vpop.permute.xlu0 %2732 }
 0xfce   :  { %v4326_v6 = vpop.eup %4325  ;;  %4043 = vmatpush3.bf16.msra.mxu1 %v2733_v45 }
 0xfcf   :  { %v2531_v1 = vmul.f32 %v4326_v6, %v5315_v50  ;;  %v2780_v21 = vpop.permute.xlu1 %2779  ;;  %v2540_v46 = vpack.c.bf16 %v2529_v39, %v2528_v37  ;;  %4054 = vmatprep.subr.bf16.mxu1 %v4489_v5 }
 0xfd0   :  { %4049 = vmatpush3.bf16.msra.mxu0 %v2780_v21 }
 0xfd1   :  { %4045 = vmatmul.mubr.msk.bf16.vlgmr.msra.gmra.mrb[60].mxu1 %vm674_vm3, %v2540_v46  ;;  %v2541_v53 = vpack.c.bf16 %v2531_v1, %v2530_v38  ;;  %4060 = vmatprep.subr.bf16.mxu0 %v4489_v5 }
 0xfd2   :  { %v4328_v32 = vpop.eup %4327  ;;  %4056 = vmatprep.mubr.msk.bf16.mxu1 %vm4492_vm1, %v4489_v5 }
 0xfd3   :  { %v4330_v43 = vpop.eup %4329  ;;  %v2827_v49 = vpop.permute.xlu1 %2826  ;;  %4051 = vmatmul.mubr.msk.bf16.vlgmr.msra.gmra.mrb[72].mxu0 %vm674_vm3, %v2541_v53  ;;  %v2532_v50 = vmul.f32 %v4328_v32, %v5331_v36  ;;  %v3671_v32 = vld [vmem:[%s5507_s6 + $0x1] ss:$0 sm:$0xff] }
 0xfd4   :  { %v4332_v61 = vpop.eup %4331  ;;  %4055 = vmatpush3.bf16.msra.mxu1 %v2827_v49  ;;  %4062 = vmatprep.mubr.msk.bf16.mxu0 %vm4492_vm1, %v4489_v5  ;;  %v2534_v16 = vmul.f32 %v4330_v43, %v5323_v62  ;;  %v3659_v5 = vld [vmem:[%s5506_s5 + $0x14] sm:$0xf]  ;;  %v3658_v62 = vld [vmem:[%s5506_s5 + $0x10] sm:$0xf] }
 0xfd5   :  { %v2533_v3 = vmul.f32 %v4332_v61, %v5335_v12  ;;  %4138 = vmatprep.subr.msk.bf16.mxu1 %vm1249_vm4, %v3659_v5  ;;  %v2936_v36 = vsel %vm1249_vm4, %v3659_v5, 0  ;;  %v2994_v40 = vsel %vm1249_vm4, %v3658_v62, 0 }
 0xfd6   :  { %v4334_v14 = vpop.eup %4333 }
 0xfd7   :  { %v2535_v35 = vmul.f32 %v4334_v14, %v5327_v55  ;;  %v2874_v41 = vpop.permute.xlu1 %2873  ;;  %v2542_v13 = vpack.c.bf16 %v2533_v3, %v2532_v50 }
 0xfd8   :  { %4061 = vmatpush3.bf16.msra.mxu0 %v2874_v41 }
 0xfd9   :  { %4057 = vmatmul.mubr.msk.bf16.vlgmr.msra.gmra.mrb[64].mxu1 %vm674_vm3, %v2542_v13  ;;  %v2543_v17 = vpack.c.bf16 %v2535_v35, %v2534_v16 }
 0xfda   :  { %4067 = vmatpush3.bf16.msra.mxu1 %v2936_v36 }
 0xfdb   :  { %4063 = vmatmul.mubr.msk.bf16.vlgmr.msra.gmra.mrb[76].mxu0 %vm674_vm3, %v2543_v17  ;;  %4139 = vmatprep.subr.msk.bf16.mxu1 %vm1249_vm4, %v3658_v62 }
0x1013   :  { %v2631_v55 = vpop.f32.mrb[64].mxu0 }
0x1014   :  { %v4028_v12 = vpop.f32.mrb[65].mxu0 }
0x1015   :  { %v2634_v24 = vpop.f32.mrb[66].mxu0 }
0x1016   :  { %v2926_v25 = vpack.c.bf16 %v2634_v24, %v2631_v55  ;;  %v4029_v26 = vpop.f32.mrb[67].mxu0  ;;  %v2584_v27 = vpop.f32.mrb[52].mxu1 }
0x1017   :  { %v4022_v44 = vpop.f32.mrb[53].mxu1 }
0x1018   :  { %v2587_v48 = vpop.f32.mrb[54].mxu1 }
0x1019   :  { %v2925_v8 = vpack.c.bf16 %v2587_v48, %v2584_v27  ;;  %v4023_v15 = vpop.f32.mrb[55].mxu1 }
0x1067   :  { %v2725_v60 = vpop.f32.mrb[68].mxu0 }
0x1068   :  { %v4040_v30 = vpop.f32.mrb[69].mxu0 }
0x1069   :  { %v2728_v31 = vpop.f32.mrb[70].mxu0 }
0x106a   :  { %v2928_v0 = vpack.c.bf16 %v2728_v31, %v2725_v60  ;;  %v4041_v51 = vpop.f32.mrb[71].mxu0 }
0x106b   :  { %v2678_v34 = vpop.f32.mrb[56].mxu1 }
0x106c   :  { %v4034_v19 = vpop.f32.mrb[57].mxu1 }
0x106d   :  { %v2681_v7 = vpop.f32.mrb[58].mxu1 }
0x106e   :  { %v2927_v20 = vpack.c.bf16 %v2681_v7, %v2678_v34  ;;  %v4035_v11 = vpop.f32.mrb[59].mxu1 }
0x106f   :  { %v4170_v11 = vld [vmem:[#allocation2 + $0x18] sm:$0xff]  }
0x1070   :  { %4068 = vmatprep.mubr.msk.bf16.mxu1 %vm283_vm2, %v2927_v20  ;;  %v4169_v20 = vld [vmem:[#allocation2 + $0x10] sm:$0xff]  }
0x1071   :  { %4069 = vmatmul.mubr.msk.bf16.vlgmr.msra.gmra.mrb[68].mxu1 %vm283_vm2, %v2928_v0  ;;  %4090 = vmatprep.subr.bf16.mxu0 %v4169_v20 }
0x1072   :  { %4074 = vmatprep.mubr.msk.bf16.mxu1 %vm283_vm2, %v2925_v8  ;;  %4073 = vmatpush3.bf16.msra.mxu1 %v2994_v40 }
0x1073   :  { %4140 = vmatprep.subr.msk.bf16.mxu1 %vm1249_vm4, %v3660_v2  ;;  %4091 = vmatpush3.bf16.msra.mxu0 %v4169_v20 }
0x1074   :  { %4092 = vmatprep.subr.bf16.mxu0 %v4170_v11 }
0x1077   :  { %4093 = vmatpush3.bf16.msra.mxu0 %v4170_v11 }
0x107d   :  { %4075 = vmatmul.mubr.msk.bf16.vlgmr.msra.gmra.mrb[68].mxu1 %vm283_vm2, %v2926_v25 }
0x107e   :  { %4079 = vmatpush3.bf16.msra.mxu1 %v3054_v9 }
0x107f   :  { %4141 = vmatprep.subr.msk.bf16.mxu1 %vm1249_vm4, %v3661_v18 }
0x10a4   :  { %v2772_v52 = vpop.f32.mrb[60].mxu1 }
0x10a5   :  { %v4046_v33 = vpop.f32.mrb[61].mxu1 }
0x10a6   :  { %v2775_v4 = vpop.f32.mrb[62].mxu1  ;;  %v2819_v56 = vpop.f32.mrb[72].mxu0 }
0x10a7   :  { %v3045_v22 = vpack.c.bf16 %v2775_v4, %v2772_v52  ;;  %v4047_v23 = vpop.f32.mrb[63].mxu1  ;;  %v4052_v63 = vpop.f32.mrb[73].mxu0 }
0x10a8   :  { %v2822_v28 = vpop.f32.mrb[74].mxu0 }
0x10a9   :  { %v3046_v29 = vpack.c.bf16 %v2822_v28, %v2819_v56  ;;  %v4053_v59 = vpop.f32.mrb[75].mxu0  ;;  %4080 = vmatprep.mubr.msk.bf16.mxu1 %vm283_vm2, %v3045_v22 }
0x10aa   :  { %v3674_v59 = vld [vmem:[%s5508_s7 + $0x1] ss:$0 sm:$0xff] }
0x10ab   :  { %4081 = vmatmul.mubr.msk.bf16.vlgmr.msra.gmra.mrb[68].mxu1 %vm283_vm2, %v3046_v29 }
0x10ac   :  { %v2866_v42 = vpop.f32.mrb[64].mxu1  ;;  %4085 = vmatpush3.bf16.msra.mxu1 %v3118_v57 }
0x10ad   :  { %v4058_v37 = vpop.f32.mrb[65].mxu1 }
0x10ae   :  { %v2869_v39 = vpop.f32.mrb[66].mxu1  ;;  %v2913_v45 = vpop.f32.mrb[76].mxu0 }
0x10af   :  { %v3109_v6 = vpack.c.bf16 %v2869_v39, %v2866_v42  ;;  %v4059_v38 = vpop.f32.mrb[67].mxu1  ;;  %v4064_v1 = vpop.f32.mrb[77].mxu0 }
0x10b0   :  { %v2916_v21 = vpop.f32.mrb[78].mxu0 }
0x10b1   :  { %v3110_v46 = vpack.c.bf16 %v2916_v21, %v2913_v45  ;;  %v4065_v53 = vpop.f32.mrb[79].mxu0  ;;  %4086 = vmatprep.mubr.msk.bf16.mxu1 %vm283_vm2, %v3109_v6  ;;  %v3675_v6 = vld [vmem:[%s5509_s8 + $0x1] ss:$0 sm:$0xff] }
0x10b7   :  { %4087 = vmatmul.mubr.msk.bf16.vlgmr.msra.gmra.mrb[68].mxu1 %vm283_vm2, %v3110_v46 }
0x118a   :  { %v4088_v43 = vpop.f32.mrb[68].mxu1 }
0x118b   :  { %v3154_v49 = vpop.f32.mrb[69].mxu1  ;;  %v3183_v61 = vadd.f32 %v4088_v43, %v3671_v32 }
0x118c   :  { %v3181_v50 = vadd.f32 %v3671_v32, %v3154_v49  ;;  %v4089_v3 = vpop.f32.mrb[70].mxu1 }
0x118d   :  { %v3157_v14 = vpop.f32.mrb[71].mxu1  ;;  %v5424_v41 = vadd.f32 %v3183_v61, %v5059_v47  ;;  %v3184_v13 = vadd.f32 %v4089_v3, %v3671_v32 }
0x118e   :  { %v5421_v16 = vadd.f32 %v3181_v50, %v5056_v54  ;;  %v3182_v35 = vadd.f32 %v3671_v32, %v3157_v14 }
0x118f   :  { %v5434_v62 = vadd.f32 %v3184_v13, %v5067_v10  ;;  %v3199_v54 = vsel %vm111_vm0, %v5424_v41, 0.0  ;;  %v4172_v13 = vld [vmem:[%s5512_s11 + $0x28] sm:$0xff]  }
0x1190   :  { %v5427_v17 = vadd.f32 %v3182_v35, %v5062_v58  ;;  %v3193_v5 = vsel %vm111_vm0, %v5421_v16, 0.0  ;;  %v4171_v35 = vld [vmem:[%s5512_s11 + $0x20] sm:$0xff]  }
0x1191   :  { %3194 = vadd.xlane.f32.xlu0 %v3193_v5  ;;  %v3202_v47 = vsel %vm111_vm0, %v5434_v62, 0.0  ;;  %4098 = vmatprep.subr.bf16.mxu0 %v4171_v35  ;;  %v4173_v5 = vld [vmem:[%s5512_s11 + $0x30] sm:$0xff]  }
0x1192   :  { %v3196_v36 = vsel %vm111_vm0, %v5427_v17, 0.0 }
0x1193   :  { %3197 = vadd.xlane.f32.xlu1 %v3196_v36  ;;  %v4174_v36 = vld [vmem:[%s5512_s11 + $0x38] sm:$0xff]  }
0x1195   :  { %3200 = vadd.xlane.f32.xlu0 %v3199_v54  ;;  %v3676_v54 = vld [vmem:[#allocation5 + $0x1] ss:$0 sm:$0xff] }
0x1199   :  { %3203 = vadd.xlane.f32.xlu0 %v3202_v47 }
0x121e   :  { %v3195_v58 = vpop.xlane.xlu0 %3194 }
0x121f   :  { %v3205_v55 = vmul.f32 0.03125, %v3195_v58 }
0x1220   :  { %v3198_v12 = vpop.xlane.xlu1 %3197 }
0x1221   :  { %v3209_v24 = vsub.f32 %v5421_v16, %v3205_v55  ;;  %v3206_v25 = vmul.f32 0.03125, %v3198_v12 }
0x1222   :  { %v3201_v26 = vpop.xlane.xlu0 %3200 }
0x1223   :  { %v3210_v27 = vsub.f32 %v5427_v17, %v3206_v25  ;;  %v3207_v44 = vmul.f32 0.03125, %v3201_v26  ;;  %v3213_v10 = vmul.f32 %v3209_v24, %v3209_v24 }
0x1225   :  { %v3211_v48 = vsub.f32 %v5424_v41, %v3207_v44  ;;  %v3217_v8 = vsel %vm111_vm0, %v3213_v10, 0.0  ;;  %v3214_v15 = vmul.f32 %v3210_v27, %v3210_v27 }
0x1226   :  { %3218 = vadd.xlane.f32.xlu0 %v3217_v8  ;;  %v3204_v60 = vpop.xlane.xlu0 %3203 }
0x1227   :  { %v3208_v30 = vmul.f32 0.03125, %v3204_v60  ;;  %v3220_v31 = vsel %vm111_vm0, %v3214_v15, 0.0  ;;  %v3215_v0 = vmul.f32 %v3211_v48, %v3211_v48 }
0x1228   :  { %3221 = vadd.xlane.f32.xlu1 %v3220_v31 }
0x1229   :  { %v3212_v51 = vsub.f32 %v5434_v62, %v3208_v30  ;;  %v3223_v34 = vsel %vm111_vm0, %v3215_v0, 0.0 }
0x122a   :  { %3224 = vadd.xlane.f32.xlu0 %v3223_v34 }
0x122b   :  { %v3216_v19 = vmul.f32 %v3212_v51, %v3212_v51 }
0x122d   :  { %v3226_v7 = vsel %vm111_vm0, %v3216_v19, 0.0 }
0x122e   :  { %3227 = vadd.xlane.f32.xlu1 %v3226_v7 }
0x12b3   :  { %v3219_v40 = vpop.xlane.xlu0 %3218 }
0x12b4   :  { %v3229_v2 = vmul.f32 0.03125, %v3219_v40 }
0x12b5   :  { %v3222_v9 = vpop.xlane.xlu1 %3221 }
0x12b6   :  { %v3233_v18 = vadd.f32 1e-06, %v3229_v2  ;;  %v3230_v52 = vmul.f32 0.03125, %v3222_v9 }
0x12b7   :  { %v3225_v33 = vpop.xlane.xlu0 %3224 }
0x12b8   :  { %4335 = vrsqrt.f32 %v3233_v18  ;;  %v3234_v4 = vadd.f32 1e-06, %v3230_v52  ;;  %v3231_v56 = vmul.f32 0.03125, %v3225_v33 }
0x12ba   :  { %4337 = vrsqrt.f32 %v3234_v4  ;;  %v3235_v22 = vadd.f32 1e-06, %v3231_v56 }
0x12bb   :  { %v3228_v23 = vpop.xlane.xlu1 %3227 }
0x12bc   :  { %4339 = vrsqrt.f32 %v3235_v22  ;;  %v3232_v63 = vmul.f32 0.03125, %v3228_v23 }
0x12be   :  { %v3236_v28 = vadd.f32 1e-06, %v3232_v63 }
0x12c0   :  { %4341 = vrsqrt.f32 %v3236_v28 }
0x12c2   :  { %v4336_v29 = vpop.eup %4335 }
0x12c3   :  { %v3241_v57 = vmul.f32 %v4336_v29, %v3209_v24 }
0x12c4   :  { %v4338_v42 = vpop.eup %4337 }
0x12c5   :  { %v3242_v37 = vmul.f32 %v4338_v42, %v3210_v27  ;;  %v3251_v39 = vmul.f32 %v3674_v59, %v3241_v57 }
0x12c6   :  { %v4340_v45 = vpop.eup %4339 }
0x12c7   :  { %v3243_v38 = vmul.f32 %v4340_v45, %v3211_v48  ;;  %v3252_v1 = vmul.f32 %v3674_v59, %v3242_v37  ;;  %v3261_v21 = vadd.f32 %v3675_v6, %v3251_v39 }
0x12c9   :  { %v3262_v46 = vadd.f32 %v3675_v6, %v3252_v1  ;;  %v3253_v32 = vmul.f32 %v3674_v59, %v3243_v38 }
0x12ca   :  { %v4342_v53 = vpop.eup %4341 }
0x12cb   :  { %v3244_v43 = vmul.f32 %v4342_v53, %v3212_v51  ;;  %v3265_v49 = vpack.c.bf16 %v3262_v46, %v3261_v21  ;;  %v3263_v50 = vadd.f32 %v3675_v6, %v3253_v32  ;;  %v3689_v46 = vld [vmem:[#allocation7 + $0x1] ss:$0 sm:$0xff] }
0x12cd   :  { %v3254_v61 = vmul.f32 %v3674_v59, %v3244_v43  ;;  %4094 = vmatprep.mubr.msk.bf16.mxu0 %vm111_vm0, %v3265_v49 }
0x12cf   :  { %v3264_v3 = vadd.f32 %v3675_v6, %v3254_v61 }
0x12d1   :  { %v3266_v14 = vpack.c.bf16 %v3264_v3, %v3263_v50 }
0x12d3   :  { %4095 = vmatmul.mubr.msk.bf16.vlgmr.msra.gmra.mrb[80].mxu0 %vm111_vm0, %v3266_v14 }
0x12d4   :  { %4099 = vmatpush3.bf16.msra.mxu0 %v4171_v35 }
0x12d5   :  { %4100 = vmatprep.subr.bf16.mxu0 %v4172_v13 }
0x12d8   :  { %4101 = vmatpush3.bf16.msra.mxu0 %v4172_v13 }
0x12d9   :  { %4102 = vmatprep.subr.bf16.mxu0 %v4173_v5 }
0x12dc   :  { %4103 = vmatpush3.bf16.msra.mxu0 %v4173_v5 }
0x12dd   :  { %4104 = vmatprep.subr.bf16.mxu0 %v4174_v36 }
0x12e0   :  { %4105 = vmatpush3.bf16.msra.mxu0 %v4174_v36 }
0x13a6   :  { %v4096_v47 = vpop.f32.mrb[80].mxu0 }
0x13a7   :  { %v3341_v58 = vadd.f32 %v4096_v47, %v3676_v54  ;;  %v3332_v55 = vpop.f32.mrb[81].mxu0 }
0x13a8   :  { %v3333_v12 = vadd.f32 %v3676_v54, %v3332_v55  ;;  %v4097_v24 = vpop.f32.mrb[82].mxu0 }
0x13a9   :  { %v3349_v25 = vmul.f32 %v3341_v58, %v3341_v58  ;;  %v3344_v26 = vadd.f32 %v4097_v24, %v3676_v54  ;;  %v3335_v27 = vpop.f32.mrb[83].mxu0 }
0x13aa   :  { %v3347_v44 = vmul.f32 %v3333_v12, %v3333_v12  ;;  %v3336_v10 = vadd.f32 %v3676_v54, %v3335_v27 }
0x13ab   :  { %v3353_v48 = vmul.f32 %v3349_v25, %v3341_v58  ;;  %v3350_v8 = vmul.f32 %v3344_v26, %v3344_v26 }
0x13ac   :  { %v3351_v15 = vmul.f32 %v3347_v44, %v3333_v12  ;;  %v3348_v60 = vmul.f32 %v3336_v10, %v3336_v10 }
0x13ad   :  { %v3357_v30 = vmul.f32 0.044715, %v3353_v48  ;;  %v3354_v31 = vmul.f32 %v3350_v8, %v3344_v26 }
0x13ae   :  { %v3355_v0 = vmul.f32 0.044715, %v3351_v15  ;;  %v3352_v51 = vmul.f32 %v3348_v60, %v3336_v10 }
0x13af   :  { %v3361_v34 = vadd.f32 %v3357_v30, %v3341_v58  ;;  %v3358_v19 = vmul.f32 0.044715, %v3354_v31 }
0x13b0   :  { %v3359_v7 = vadd.f32 %v3355_v0, %v3333_v12  ;;  %v3356_v20 = vmul.f32 0.044715, %v3352_v51 }
0x13b1   :  { %v3365_v11 = vmul.f32 0.7978846, %v3361_v34  ;;  %v3362_v40 = vadd.f32 %v3358_v19, %v3344_v26 }
0x13b2   :  { %v3363_v2 = vmul.f32 0.7978846, %v3359_v7  ;;  %v3360_v9 = vadd.f32 %v3356_v20, %v3336_v10 }
0x13b3   :  { %4343 = vtanh.f32 %v3365_v11  ;;  %v3366_v18 = vmul.f32 0.7978846, %v3362_v40 }
0x13b4   :  { %4345 = vtanh.f32 %v3363_v2  ;;  %v3364_v52 = vmul.f32 0.7978846, %v3360_v9 }
0x13b5   :  { %4347 = vtanh.f32 %v3366_v18 }
0x13b6   :  { %4349 = vtanh.f32 %v3364_v52 }
0x13bd   :  { %v4344_v33 = vpop.eup %4343 }
0x13be   :  { %v4346_v4 = vpop.eup %4345  ;;  %v3373_v56 = vadd.f32 1.0, %v4344_v33 }
0x13bf   :  { %v4348_v22 = vpop.eup %4347  ;;  %v3371_v23 = vadd.f32 1.0, %v4346_v4 }
0x13c0   :  { %v4350_v63 = vpop.eup %4349  ;;  %v3377_v28 = vmul.f32 0.5, %v3373_v56  ;;  %v3374_v29 = vadd.f32 1.0, %v4348_v22 }
0x13c1   :  { %v3375_v59 = vmul.f32 0.5, %v3371_v23  ;;  %v3372_v57 = vadd.f32 1.0, %v4350_v63  ;;  %v3696_v23 = vld [vmem:[%s5514_s13] ss:$0 sm:$0xff]  ;;  %s4451_s13 = scalar_lea.vmem %s3569_s28, 512 }
0x13c2   :  { %v3378_v42 = vmul.f32 0.5, %v3374_v29  ;;  %v3381_v39 = vmul.f32 %v3377_v28, %v3341_v58  ;;  %v3697_v29 = vld [vmem:[#allocation8] ss:$0 sm:$0xff]  ;;  %p4452_p4 = scmp.ne.s32.totalorder %s3569_s28, %s4451_s13  ;;  %p4457_p6 = scmp.lt.s32.totalorder %s4451_s13, %s4451_s13 }
0x13c3   :  { %v3376_v37 = vmul.f32 0.5, %v3372_v57  ;;  %v3379_v6 = vmul.f32 %v3375_v59, %v3333_v12 }
0x13c4   :  { %v3382_v45 = vmul.f32 %v3378_v42, %v3344_v26  ;;  %p4458_p7 = por %p4457_p6, %p4456_p5 }
0x13c5   :  { %v3380_v38 = vmul.f32 %v3376_v37, %v3336_v10 }
0x13c6   :  { %v3384_v1 = vpack.c.bf16 %v3382_v45, %v3381_v39  ;;  %p4459_p8 = pnand %p4458_p7, %p4452_p4 }
0x13c7   :  { %v3383_v21 = vpack.c.bf16 %v3380_v38, %v3379_v6 }
0x13c9   :  { %4106 = vmatprep.mubr.msk.bf16.mxu0 %vm1734_vm5, %v3383_v21 }
0x13ca   :  { %4107 = vmatmul.mubr.msk.bf16.vlgmr.msra.gmra.mrb[84].mxu0 %vm1734_vm5, %v3384_v1 }
0x149d   :  { %v4108_v53 = vpop.f32.mrb[84].mxu0 }
0x149e   :  { %v3466_v32 = vpop.f32.mrb[85].mxu0  ;;  %v3475_v43 = vadd.f32 %v4108_v53, %v3689_v46 }
0x149f   :  { %v3467_v49 = vadd.f32 %v3689_v46, %v3466_v32  ;;  %v4109_v61 = vpop.f32.mrb[86].mxu0 }
0x14a0   :  { %v3469_v50 = vpop.f32.mrb[87].mxu0  ;;  %v3478_v14 = vadd.f32 %v4109_v61, %v3689_v46  ;;  %v3483_v13 = vadd.f32 %v3475_v43, %v5424_v41 }
0x14a1   :  { %v3481_v3 = vadd.f32 %v3467_v49, %v5421_v16  ;;  %v3470_v35 = vadd.f32 %v3689_v46, %v3469_v50 }
0x14a2   :  { %v3484_v54 = vadd.f32 %v3478_v14, %v5434_v62  ;;  %v3493_v58 = vsel %vm111_vm0, %v3483_v13, 0.0 }
0x14a3   :  { %v3482_v5 = vadd.f32 %v3470_v35, %v5427_v17  ;;  %v3487_v36 = vsel %vm111_vm0, %v3481_v3, 0.0 }
0x14a4   :  { %3488 = vadd.xlane.f32.xlu0 %v3487_v36  ;;  %v3496_v55 = vsel %vm111_vm0, %v3484_v54, 0.0 }
0x14a5   :  { %v3490_v47 = vsel %vm111_vm0, %v3482_v5, 0.0 }
0x14a6   :  { %3491 = vadd.xlane.f32.xlu1 %v3490_v47 }
0x14a8   :  { %3494 = vadd.xlane.f32.xlu0 %v3493_v58 }
0x14aa   :  { %3497 = vadd.xlane.f32.xlu1 %v3496_v55 }
0x1531   :  { %v3489_v16 = vpop.xlane.xlu0 %3488 }
0x1532   :  { %v3499_v12 = vmul.f32 0.03125, %v3489_v16 }
0x1533   :  { %v3492_v24 = vpop.xlane.xlu1 %3491 }
0x1534   :  { %v3503_v41 = vsub.f32 %v3481_v3, %v3499_v12  ;;  %v3500_v25 = vmul.f32 0.03125, %v3492_v24 }
0x1535   :  { %v3495_v17 = vpop.xlane.xlu0 %3494 }
0x1536   :  { %v3504_v26 = vsub.f32 %v3482_v5, %v3500_v25  ;;  %v3501_v27 = vmul.f32 0.03125, %v3495_v17  ;;  %v3507_v44 = vmul.f32 %v3503_v41, %v3503_v41 }
0x1537   :  { %v3498_v10 = vpop.xlane.xlu1 %3497 }
0x1538   :  { %v3505_v62 = vsub.f32 %v3483_v13, %v3501_v27  ;;  %v3502_v48 = vmul.f32 0.03125, %v3498_v10  ;;  %v3511_v8 = vsel %vm111_vm0, %v3507_v44, 0.0  ;;  %v3508_v15 = vmul.f32 %v3504_v26, %v3504_v26 }
0x1539   :  { %3512 = vadd.xlane.f32.xlu0 %v3511_v8 }
0x153a   :  { %v3506_v60 = vsub.f32 %v3484_v54, %v3502_v48  ;;  %v3514_v30 = vsel %vm111_vm0, %v3508_v15, 0.0  ;;  %v3509_v31 = vmul.f32 %v3505_v62, %v3505_v62 }
0x153b   :  { %3515 = vadd.xlane.f32.xlu1 %v3514_v30 }
0x153c   :  { %v3517_v0 = vsel %vm111_vm0, %v3509_v31, 0.0  ;;  %v3510_v51 = vmul.f32 %v3506_v60, %v3506_v60 }
0x153d   :  { %3518 = vadd.xlane.f32.xlu0 %v3517_v0 }
0x153e   :  { %v3520_v34 = vsel %vm111_vm0, %v3510_v51, 0.0 }
0x153f   :  { %3521 = vadd.xlane.f32.xlu1 %v3520_v34 }
0x15c6   :  { %v3513_v19 = vpop.xlane.xlu0 %3512 }
0x15c7   :  { %v3523_v7 = vmul.f32 0.03125, %v3513_v19 }
0x15c8   :  { %v3516_v20 = vpop.xlane.xlu1 %3515 }
0x15c9   :  { %v3527_v11 = vadd.f32 1e-06, %v3523_v7  ;;  %v3524_v40 = vmul.f32 0.03125, %v3516_v20 }
0x15ca   :  { %v3519_v2 = vpop.xlane.xlu0 %3518 }
0x15cb   :  { %4351 = vrsqrt.f32 %v3527_v11  ;;  %v3528_v9 = vadd.f32 1e-06, %v3524_v40  ;;  %v3525_v18 = vmul.f32 0.03125, %v3519_v2 }
0x15cc   :  { %v3522_v52 = vpop.xlane.xlu1 %3521 }
0x15cd   :  { %4353 = vrsqrt.f32 %v3528_v9  ;;  %v3529_v33 = vadd.f32 1e-06, %v3525_v18  ;;  %v3526_v4 = vmul.f32 0.03125, %v3522_v52 }
0x15cf   :  { %4355 = vrsqrt.f32 %v3529_v33  ;;  %v3530_v56 = vadd.f32 1e-06, %v3526_v4 }
0x15d1   :  { %4357 = vrsqrt.f32 %v3530_v56 }
0x15d5   :  { %v4352_v22 = vpop.eup %4351 }
0x15d6   :  { %v3535_v63 = vmul.f32 %v4352_v22, %v3503_v41 }
0x15d7   :  { %v4354_v28 = vpop.eup %4353 }
0x15d8   :  { %v3545_v59 = vmul.f32 %v3696_v23, %v3535_v63  ;;  %v3536_v57 = vmul.f32 %v4354_v28, %v3504_v26 }
0x15d9   :  { %v4356_v42 = vpop.eup %4355 }
0x15da   :  { %v3555_v37 = vadd.f32 %v3697_v29, %v3545_v59  ;;  %v3546_v39 = vmul.f32 %v3696_v23, %v3536_v57  ;;  %v3537_v45 = vmul.f32 %v4356_v42, %v3505_v62 }
0x15db   :  { %v4358_v6 = vpop.eup %4357 }
0x15dc   :  { %3559 = vst.msk [vmem:[#allocation10] sm:$0xff] %vm111_vm0, %v3555_v37  ;;  %v3556_v38 = vadd.f32 %v3697_v29, %v3546_v39  ;;  %v3547_v1 = vmul.f32 %v3696_v23, %v3537_v45  ;;  %v3538_v21 = vmul.f32 %v4358_v6, %v3506_v60 }
0x15de   :  { %3560 = vst.msk [vmem:[#allocation10 + $0x8] sm:$0xff] %vm111_vm0, %v3556_v38  ;;  %v3557_v46 = vadd.f32 %v3697_v29, %v3547_v1  ;;  %v3548_v53 = vmul.f32 %v3696_v23, %v3538_v21 }
0x15e0   :  { %3561 = vst.msk [vmem:[#allocation10 + $0x10] sm:$0xff] %vm111_vm0, %v3557_v46  ;;  %v3558_v32 = vadd.f32 %v3697_v29, %v3548_v53 }
0x15e2   :  { %3562 = vst.msk [vmem:[#allocation10 + $0x18] sm:$0xff] %vm111_vm0, %v3558_v32 }
0x15e3   :  { %4462 = shalt.err (!%p4459_p8)
}
0x15e4   :  { %s4463_s2 = scalar_lea.hbm %s5516_s15, 512 }
0x15e5   :  { %p4464_p9 = scmp.ne.s32.totalorder %s5516_s15, %s4463_s2  ;;  %p4467_p10 = scmp.lt.u32.totalorder %s4463_s2, %s5516_s15 }
0x15e7   :  { %p4469_p11 = pnand %p4467_p10, %p4464_p9 }
0x15e9   :  { %4472 = shalt.err (!%p4469_p11)
}
0x15ea   :  { %s4496_s19 = smov 128   ;;  %s4497_s30 = smov 8  }
0x15eb   :  { %3574 = dma.vmem_to_hbm [thread:$0]  %s3569_s28, 512, %s5516_s15, [#allocation4], %s4496_s19, %s4496_s19, %s4497_s30  }
0x15ec   :  { %4479 = dma.done.wait [#allocation4], 512  }
0x15ed   :  { %4480 = vsyncadd [#allocation4], 4294966784 }
0x15ee   :  { %3578 = vsyncpa [#allocation3], 1 }
0x15ef   :  { %3579 = vsyncpa [#allocation6], 1 }
0x15f0   :  { %3580 = vsyncpa [#allocation9], 1 }
0x15f1   :  { %3581 = vsyncpa [#allocation4], 1 }

</bundles_post_ra>
